<compile_context>
chip_gen: v7x
topology: tpu7x:2x2x1
jax: 0.10.0
libtpu: 0.0.40
codegen_flags: <defaults>
</compile_context>

<pallas_src>
import functools

import jax
import jax.numpy as jnp
from jax.experimental import pallas as pl
from jax.experimental.pallas import tpu as pltpu

OUT_CHANNELS = 32
C1 = OUT_CHANNELS            # conv1 output channels
C2 = 2 * OUT_CHANNELS        # conv2 output channels
BN_EPS = 1e-5
LEAKY_SLOPE = 0.2
DROPOUT_P = 0.5
BN_TILE_ROWS = 1024          # row tile (x 128 lanes) for the BN+dropout kernel


# -----------------------------------------------------------------------------
# Kernel 1: fused conv1 + LeakyReLU + conv2 + bias + partial BatchNorm stats.
# One grid step = one image.  conv2's im2col is built in VMEM from the conv1
# activation (zero-padded via concatenation), so the 9x patch matrix is never
# materialized in HBM.
# -----------------------------------------------------------------------------
def _fused_conv_kernel(H, W, xc_ref, w1_ref, b1_ref, w2_ref, b2_ref,
                       h2_ref, stats_ref):
    HW = H * W

    # conv1 (im2col matmul, K=9, Cin=1) + bias + LeakyReLU.  Tiny vs conv2
    # (~3% of the MXU work), so we keep it on the MXU for simplicity.
    h1 = jnp.dot(xc_ref[0], w1_ref[...], preferred_element_type=jnp.float32)
    h1 = h1 + b1_ref[...]
    h1 = jnp.where(h1 >= 0.0, h1, LEAKY_SLOPE * h1)              # (HW, C1) f32

    # Zero-pad the conv1 activation by 1 in H and W (pure value ops in VMEM).
    h1 = h1.reshape(H, W, C1)
    zw = jnp.zeros((H, 1, C1), jnp.float32)
    h1 = jnp.concatenate([zw, h1, zw], axis=1)                   # (H, W+2, C1)
    zh = jnp.zeros((1, W + 2, C1), jnp.float32)
    h1p = jnp.concatenate([zh, h1, zh], axis=0)                  # (H+2, W+2, C1)

    # conv2 as 9 accumulating bf16 matmuls against (C1, C2) weight slices.
    acc = jnp.zeros((HW, C2), jnp.float32)
    for kh in range(3):
        for kw in range(3):
            patch = jax.lax.slice(h1p, (kh, kw, 0), (kh + H, kw + W, C1))
            patch = patch.reshape(HW, C1).astype(jnp.bfloat16)
            acc = acc + jnp.dot(patch, w2_ref[3 * kh + kw],
                                preferred_element_type=jnp.float32)
    h2 = acc + b2_ref[...]                                       # (HW, C2) f32

    h2_ref[0] = h2
    s1 = jnp.sum(h2, axis=0, keepdims=True)                      # (1, C2)
    s2 = jnp.sum(h2 * h2, axis=0, keepdims=True)                 # (1, C2)
    stats_ref[0] = jnp.concatenate([s1, s2], axis=0)             # (2, C2)


def fused_conv1_conv2(x1_cols, w1_mat, b1, w2_slices, b2, H, W):
    N, HW, _ = x1_cols.shape
    kernel = functools.partial(_fused_conv_kernel, H, W)
    flops = N * HW * (2 * 9 * 1 * C1 + 2 * 9 * C1 * C2)
    bytes_accessed = (x1_cols.size * 4 + w1_mat.size * 4 + b1.size * 4
                      + w2_slices.size * 2 + b2.size * 4
                      + N * HW * C2 * 4 + N * 2 * C2 * 4)
    # TODO(synk): very large spectrograms (per-image h2 block > VMEM, esp. v7x
    # 64 MiB) would need intra-image H-tiling with halo DMA; per-image blocks
    # are correct and fully pipelined/megacore-parallel for typical sizes.
    return pl.pallas_call(
        kernel,
        out_shape=(jax.ShapeDtypeStruct((N, HW, C2), jnp.float32),
                   jax.ShapeDtypeStruct((N, 2, C2), jnp.float32)),
        grid=(N,),
        in_specs=[
            pl.BlockSpec((1, HW, 9), lambda n: (n, 0, 0)),
            pl.BlockSpec((9, C1), lambda n: (0, 0)),
            pl.BlockSpec((1, C1), lambda n: (0, 0)),
            pl.BlockSpec((9, C1, C2), lambda n: (0, 0, 0)),
            pl.BlockSpec((1, C2), lambda n: (0, 0)),
        ],
        out_specs=(
            pl.BlockSpec((1, HW, C2), lambda n: (n, 0, 0)),
            pl.BlockSpec((1, 2, C2), lambda n: (n, 0, 0)),
        ),
        compiler_params=pltpu.CompilerParams(
            dimension_semantics=("parallel",),
            vmem_limit_bytes=64 * 1024 * 1024),
        cost_estimate=pl.CostEstimate(flops=flops, transcendentals=0,
                                      bytes_accessed=bytes_accessed),
    )(x1_cols, w1_mat, b1, w2_slices, b2)


# -----------------------------------------------------------------------------
# Kernel 2: BatchNorm affine (precomputed per-channel scale/shift) + Dropout,
# on a lane-dense (rows, 128) packing of the (M, 64) conv2 output.
# -----------------------------------------------------------------------------
def _bn_dropout_kernel(y_ref, scale_ref, shift_ref, mask_ref, o_ref):
    y = y_ref[...]
    m = mask_ref[...].astype(jnp.float32)        # {0, 2} inverted-dropout scale
    o_ref[...] = (y * scale_ref[...] + shift_ref[...]) * m


def bn_dropout(y_packed, scale_row, shift_row, mask_packed):
    R, L = y_packed.shape                        # L == 128
    tile = BN_TILE_ROWS if R >= BN_TILE_ROWS else max(8, -(-R // 8) * 8)
    bytes_accessed = R * L * (4 + 2 + 4) + 2 * L * 4
    return pl.pallas_call(
        _bn_dropout_kernel,
        out_shape=jax.ShapeDtypeStruct((R, L), jnp.float32),
        grid=(pl.cdiv(R, tile),),
        in_specs=[
            pl.BlockSpec((tile, L), lambda i: (i, 0)),
            pl.BlockSpec((1, L), lambda i: (0, 0)),
            pl.BlockSpec((1, L), lambda i: (0, 0)),
            pl.BlockSpec((tile, L), lambda i: (i, 0)),
        ],
        out_specs=pl.BlockSpec((tile, L), lambda i: (i, 0)),
        compiler_params=pltpu.CompilerParams(dimension_semantics=("parallel",)),
        cost_estimate=pl.CostEstimate(flops=3 * R * L, transcendentals=0,
                                      bytes_accessed=bytes_accessed),
    )(y_packed, scale_row, shift_row, mask_packed)


# -----------------------------------------------------------------------------
# Glue: conv1 im2col (Cin=1, only 9 f32/pixel), params, layout plumbing.
# -----------------------------------------------------------------------------
def _im2col_3x3_pad1_c1(x_nhw1):
    N, H, W, _ = x_nhw1.shape
    xp = jnp.pad(x_nhw1, ((0, 0), (1, 1), (1, 1), (0, 0)))
    cols = []
    for kh in range(3):
        for kw in range(3):
            cols.append(xp[:, kh:kh + H, kw:kw + W, 0].reshape(N, H * W, 1))
    return jnp.concatenate(cols, axis=-1)                        # (N, HW, 9)


def init_params(key):
    """Parameters matching the torch module's shapes / default inits."""
    k1, k2, k3, k4 = jax.random.split(key, 4)
    lim1 = 1.0 / (1 * 3 * 3) ** 0.5
    w1 = jax.random.uniform(k1, (3, 3, 1, C1), jnp.float32, -lim1, lim1)
    b1 = jax.random.uniform(k2, (1, C1), jnp.float32, -lim1, lim1)
    lim2 = 1.0 / (C1 * 3 * 3) ** 0.5
    w2 = jax.random.uniform(k3, (3, 3, C1, C2), jnp.float32, -lim2, lim2)
    b2 = jax.random.uniform(k4, (1, C2), jnp.float32, -lim2, lim2)
    return dict(
        w1_mat=w1.reshape(9, C1),            # (kh*3+kw, cout)
        b1=b1,
        w2=w2.reshape(9, C1, C2),            # (kh*3+kw, cin, cout)
        b2=b2,
        gamma=jnp.ones((C2,), jnp.float32),  # BatchNorm2d affine defaults
        beta=jnp.zeros((C2,), jnp.float32),
    )


@jax.jit
def random_cnn_forward(x_nchw, params, dropout_key):
    """NCHW in / NCHW out (torch convention); NHWC / row-major inside."""
    N, _, H, W = x_nchw.shape
    x = jnp.transpose(x_nchw, (0, 2, 3, 1)).astype(jnp.float32)  # (N, H, W, 1)
    x1_cols = _im2col_3x3_pad1_c1(x)                             # (N, HW, 9)

    w2_bf16 = params["w2"].astype(jnp.bfloat16)
    h2, stats = fused_conv1_conv2(x1_cols, params["w1_mat"], params["b1"],
                                  w2_bf16, params["b2"], H, W)

    # BatchNorm2d (training): batch mean / biased variance from kernel-1 partials.
    M = N * H * W
    tot = jnp.sum(stats, axis=0)                                 # (2, C2)
    mean = tot[0] / M
    var = jnp.maximum(tot[1] / M - mean * mean, 0.0)
    scale = params["gamma"] * jax.lax.rsqrt(var + BN_EPS)
    shift = params["beta"] - mean * scale
    # TODO(synk): BatchNorm running_mean/running_var state updates are not
    # materialized; they do not affect the training-mode forward output.

    # Lane-dense (rows, 128) packing: flat index % C2 == channel, so per-channel
    # affine params simply tile twice across the 128 lanes.
    total = M * C2
    R = pl.cdiv(total, 128)
    flat = h2.reshape(total)
    if total != R * 128:                      # only when N*H*W is odd
        flat = jnp.pad(flat, (0, R * 128 - total))
    y_packed = flat.reshape(R, 128)
    scale_row = jnp.concatenate([scale, scale]).reshape(1, 128)
    shift_row = jnp.concatenate([shift, shift]).reshape(1, 128)

    # Dropout(p=0.5), training mode, inverted scaling.  Mask drawn with
    # jax.random in the wrapper (pltpu.prng_* has no CPU/interpret lowering).
    keep = jax.random.bernoulli(dropout_key, 1.0 - DROPOUT_P, (R, 128))
    mask = (keep.astype(jnp.bfloat16) * (1.0 / (1.0 - DROPOUT_P)))

    out = bn_dropout(y_packed, scale_row, shift_row, mask)
    out = out.reshape(R * 128)[:total].reshape(N, H, W, C2)
    return jnp.transpose(out, (0, 3, 1, 2))                      # (N, 64, H, W)


if __name__ == "__main__":
    key = jax.random.PRNGKey(0)
    k_param, k_input, k_drop = jax.random.split(key, 3)

    params = init_params(k_param)
    x = jax.random.normal(k_input, (2, 1, 16, 16), dtype=jnp.float32)  # NCHW, Cin=1

    out = random_cnn_forward(x, params, k_drop)
    out = jax.block_until_ready(out)

    assert out.shape == (2, C2, 16, 16), out.shape
    assert bool(jnp.all(jnp.isfinite(out)))
    print("KERNEL_OK")
</pallas_src>

<mosaic_0001>
module attributes {stable_mosaic.version = 11 : i64} {
  func.func @_fused_conv_kernel(%arg0: i32, %arg1: memref<1x256x9xf32, #tpu.memory_space<vmem>>, %arg2: memref<9x32xf32, #tpu.memory_space<vmem>>, %arg3: memref<1x32xf32, #tpu.memory_space<vmem>>, %arg4: memref<9x32x64xbf16, #tpu.memory_space<vmem>>, %arg5: memref<1x64xf32, #tpu.memory_space<vmem>>, %arg6: memref<1x256x64xf32, #tpu.memory_space<vmem>>, %arg7: memref<1x2x64xf32, #tpu.memory_space<vmem>>) attributes {dimension_semantics = [#tpu.dimension_semantics<parallel>], iteration_bounds = array<i64: 2>, scalar_prefetch = 0 : i64, scratch_operands = 0 : i64, tpu.core_type = #tpu.core_type<tc>, window_params = [{transform_indices = @transform_0, window_bounds = array<i64: 1, 256, 9>}, {pipeline_mode = #tpu.pipeline_mode<synchronous>, transform_indices = @transform_1, window_bounds = array<i64: 9, 32>}, {pipeline_mode = #tpu.pipeline_mode<synchronous>, transform_indices = @transform_2, window_bounds = array<i64: 1, 32>}, {pipeline_mode = #tpu.pipeline_mode<synchronous>, transform_indices = @transform_3, window_bounds = array<i64: 9, 32, 64>}, {pipeline_mode = #tpu.pipeline_mode<synchronous>, transform_indices = @transform_4, window_bounds = array<i64: 1, 64>}, {transform_indices = @transform_5, window_bounds = array<i64: 1, 256, 64>}, {transform_indices = @transform_6, window_bounds = array<i64: 1, 2, 64>}]} {
    %c0 = arith.constant 0 : index
    %c0_0 = arith.constant 0 : index
    %c0_1 = arith.constant 0 : index
    %0 = vector.load %arg1[%c0, %c0_0, %c0_1] : memref<1x256x9xf32, #tpu.memory_space<vmem>>, vector<1x256x9xf32>
    %1 = vector.shape_cast %0 : vector<1x256x9xf32> to vector<256x9xf32>
    %c0_2 = arith.constant 0 : index
    %c0_3 = arith.constant 0 : index
    %2 = vector.load %arg2[%c0_2, %c0_3] : memref<9x32xf32, #tpu.memory_space<vmem>>, vector<9x32xf32>
    %cst = arith.constant dense<0.000000e+00> : vector<256x32xf32>
    %3 = tpu.matmul %1, %2, %cst {dimension_numbers = #tpu.dot_dimension_numbers<[1], [0], [0], [1], [0, 0, 1, 1], [], []>} : vector<256x9xf32>, vector<9x32xf32>, vector<256x32xf32> -> vector<256x32xf32>
    %c0_4 = arith.constant 0 : index
    %c0_5 = arith.constant 0 : index
    %4 = vector.load %arg3[%c0_4, %c0_5] : memref<1x32xf32, #tpu.memory_space<vmem>>, vector<1x32xf32>
    %5 = vector.broadcast %4 : vector<1x32xf32> to vector<256x32xf32>
    %6 = arith.addf %3, %5 : vector<256x32xf32>
    %cst_6 = arith.constant 0.000000e+00 : f32
    %7 = vector.broadcast %cst_6 : f32 to vector<256x32xf32>
    %8 = arith.cmpf oge, %6, %7 : vector<256x32xf32>
    %cst_7 = arith.constant 2.000000e-01 : f32
    %9 = vector.broadcast %cst_7 : f32 to vector<256x32xf32>
    %10 = arith.mulf %9, %6 : vector<256x32xf32>
    %11 = arith.select %8, %6, %10 : vector<256x32xi1>, vector<256x32xf32>
    %12 = vector.shape_cast %11 : vector<256x32xf32> to vector<16x16x32xf32>
    %cst_8 = arith.constant 0.000000e+00 : f32
    %13 = vector.broadcast %cst_8 : f32 to vector<16x1x32xf32>
    %14 = tpu.concatenate %13, %12, %13 in 1 : vector<16x1x32xf32>, vector<16x16x32xf32>, vector<16x1x32xf32> -> vector<16x18x32xf32>
    %cst_9 = arith.constant 0.000000e+00 : f32
    %15 = vector.broadcast %cst_9 : f32 to vector<1x18x32xf32>
    %16 = tpu.concatenate %15, %14, %15 in 0 : vector<1x18x32xf32>, vector<16x18x32xf32>, vector<1x18x32xf32> -> vector<18x18x32xf32>
    %cst_10 = arith.constant 0.000000e+00 : f32
    %17 = vector.broadcast %cst_10 : f32 to vector<256x64xf32>
    %18 = vector.extract_strided_slice %16 {offsets = [0, 0, 0], sizes = [16, 16, 32], strides = [1, 1, 1]} : vector<18x18x32xf32> to vector<16x16x32xf32>
    %19 = vector.shape_cast %18 : vector<16x16x32xf32> to vector<256x32xf32>
    %20 = arith.truncf %19 : vector<256x32xf32> to vector<256x32xbf16>
    %c0_11 = arith.constant 0 : index
    %c0_12 = arith.constant 0 : index
    %c0_13 = arith.constant 0 : index
    %21 = vector.load %arg4[%c0_11, %c0_12, %c0_13] : memref<9x32x64xbf16, #tpu.memory_space<vmem>>, vector<1x32x64xbf16>
    %22 = vector.shape_cast %21 : vector<1x32x64xbf16> to vector<32x64xbf16>
    %cst_14 = arith.constant dense<0.000000e+00> : vector<256x64xf32>
    %23 = tpu.matmul %20, %22, %cst_14 {dimension_numbers = #tpu.dot_dimension_numbers<[1], [0], [0], [1], [0, 0, 1, 1], [], []>} : vector<256x32xbf16>, vector<32x64xbf16>, vector<256x64xf32> -> vector<256x64xf32>
    %24 = arith.addf %17, %23 : vector<256x64xf32>
    %25 = vector.extract_strided_slice %16 {offsets = [0, 1, 0], sizes = [16, 16, 32], strides = [1, 1, 1]} : vector<18x18x32xf32> to vector<16x16x32xf32>
    %26 = vector.shape_cast %25 : vector<16x16x32xf32> to vector<256x32xf32>
    %27 = arith.truncf %26 : vector<256x32xf32> to vector<256x32xbf16>
    %c1 = arith.constant 1 : index
    %c0_15 = arith.constant 0 : index
    %c0_16 = arith.constant 0 : index
    %28 = vector.load %arg4[%c1, %c0_15, %c0_16] : memref<9x32x64xbf16, #tpu.memory_space<vmem>>, vector<1x32x64xbf16>
    %29 = vector.shape_cast %28 : vector<1x32x64xbf16> to vector<32x64xbf16>
    %cst_17 = arith.constant dense<0.000000e+00> : vector<256x64xf32>
    %30 = tpu.matmul %27, %29, %cst_17 {dimension_numbers = #tpu.dot_dimension_numbers<[1], [0], [0], [1], [0, 0, 1, 1], [], []>} : vector<256x32xbf16>, vector<32x64xbf16>, vector<256x64xf32> -> vector<256x64xf32>
    %31 = arith.addf %24, %30 : vector<256x64xf32>
    %32 = vector.extract_strided_slice %16 {offsets = [0, 2, 0], sizes = [16, 16, 32], strides = [1, 1, 1]} : vector<18x18x32xf32> to vector<16x16x32xf32>
    %33 = vector.shape_cast %32 : vector<16x16x32xf32> to vector<256x32xf32>
    %34 = arith.truncf %33 : vector<256x32xf32> to vector<256x32xbf16>
    %c2 = arith.constant 2 : index
    %c0_18 = arith.constant 0 : index
    %c0_19 = arith.constant 0 : index
    %35 = vector.load %arg4[%c2, %c0_18, %c0_19] : memref<9x32x64xbf16, #tpu.memory_space<vmem>>, vector<1x32x64xbf16>
    %36 = vector.shape_cast %35 : vector<1x32x64xbf16> to vector<32x64xbf16>
    %cst_20 = arith.constant dense<0.000000e+00> : vector<256x64xf32>
    %37 = tpu.matmul %34, %36, %cst_20 {dimension_numbers = #tpu.dot_dimension_numbers<[1], [0], [0], [1], [0, 0, 1, 1], [], []>} : vector<256x32xbf16>, vector<32x64xbf16>, vector<256x64xf32> -> vector<256x64xf32>
    %38 = arith.addf %31, %37 : vector<256x64xf32>
    %39 = vector.extract_strided_slice %16 {offsets = [1, 0, 0], sizes = [16, 16, 32], strides = [1, 1, 1]} : vector<18x18x32xf32> to vector<16x16x32xf32>
    %40 = vector.shape_cast %39 : vector<16x16x32xf32> to vector<256x32xf32>
    %41 = arith.truncf %40 : vector<256x32xf32> to vector<256x32xbf16>
    %c3 = arith.constant 3 : index
    %c0_21 = arith.constant 0 : index
    %c0_22 = arith.constant 0 : index
    %42 = vector.load %arg4[%c3, %c0_21, %c0_22] : memref<9x32x64xbf16, #tpu.memory_space<vmem>>, vector<1x32x64xbf16>
    %43 = vector.shape_cast %42 : vector<1x32x64xbf16> to vector<32x64xbf16>
    %cst_23 = arith.constant dense<0.000000e+00> : vector<256x64xf32>
    %44 = tpu.matmul %41, %43, %cst_23 {dimension_numbers = #tpu.dot_dimension_numbers<[1], [0], [0], [1], [0, 0, 1, 1], [], []>} : vector<256x32xbf16>, vector<32x64xbf16>, vector<256x64xf32> -> vector<256x64xf32>
    %45 = arith.addf %38, %44 : vector<256x64xf32>
    %46 = vector.extract_strided_slice %16 {offsets = [1, 1, 0], sizes = [16, 16, 32], strides = [1, 1, 1]} : vector<18x18x32xf32> to vector<16x16x32xf32>
    %47 = vector.shape_cast %46 : vector<16x16x32xf32> to vector<256x32xf32>
    %48 = arith.truncf %47 : vector<256x32xf32> to vector<256x32xbf16>
    %c4 = arith.constant 4 : index
    %c0_24 = arith.constant 0 : index
    %c0_25 = arith.constant 0 : index
    %49 = vector.load %arg4[%c4, %c0_24, %c0_25] : memref<9x32x64xbf16, #tpu.memory_space<vmem>>, vector<1x32x64xbf16>
    %50 = vector.shape_cast %49 : vector<1x32x64xbf16> to vector<32x64xbf16>
    %cst_26 = arith.constant dense<0.000000e+00> : vector<256x64xf32>
    %51 = tpu.matmul %48, %50, %cst_26 {dimension_numbers = #tpu.dot_dimension_numbers<[1], [0], [0], [1], [0, 0, 1, 1], [], []>} : vector<256x32xbf16>, vector<32x64xbf16>, vector<256x64xf32> -> vector<256x64xf32>
    %52 = arith.addf %45, %51 : vector<256x64xf32>
    %53 = vector.extract_strided_slice %16 {offsets = [1, 2, 0], sizes = [16, 16, 32], strides = [1, 1, 1]} : vector<18x18x32xf32> to vector<16x16x32xf32>
    %54 = vector.shape_cast %53 : vector<16x16x32xf32> to vector<256x32xf32>
    %55 = arith.truncf %54 : vector<256x32xf32> to vector<256x32xbf16>
    %c5 = arith.constant 5 : index
    %c0_27 = arith.constant 0 : index
    %c0_28 = arith.constant 0 : index
    %56 = vector.load %arg4[%c5, %c0_27, %c0_28] : memref<9x32x64xbf16, #tpu.memory_space<vmem>>, vector<1x32x64xbf16>
    %57 = vector.shape_cast %56 : vector<1x32x64xbf16> to vector<32x64xbf16>
    %cst_29 = arith.constant dense<0.000000e+00> : vector<256x64xf32>
    %58 = tpu.matmul %55, %57, %cst_29 {dimension_numbers = #tpu.dot_dimension_numbers<[1], [0], [0], [1], [0, 0, 1, 1], [], []>} : vector<256x32xbf16>, vector<32x64xbf16>, vector<256x64xf32> -> vector<256x64xf32>
    %59 = arith.addf %52, %58 : vector<256x64xf32>
    %60 = vector.extract_strided_slice %16 {offsets = [2, 0, 0], sizes = [16, 16, 32], strides = [1, 1, 1]} : vector<18x18x32xf32> to vector<16x16x32xf32>
    %61 = vector.shape_cast %60 : vector<16x16x32xf32> to vector<256x32xf32>
    %62 = arith.truncf %61 : vector<256x32xf32> to vector<256x32xbf16>
    %c6 = arith.constant 6 : index
    %c0_30 = arith.constant 0 : index
    %c0_31 = arith.constant 0 : index
    %63 = vector.load %arg4[%c6, %c0_30, %c0_31] : memref<9x32x64xbf16, #tpu.memory_space<vmem>>, vector<1x32x64xbf16>
    %64 = vector.shape_cast %63 : vector<1x32x64xbf16> to vector<32x64xbf16>
    %cst_32 = arith.constant dense<0.000000e+00> : vector<256x64xf32>
    %65 = tpu.matmul %62, %64, %cst_32 {dimension_numbers = #tpu.dot_dimension_numbers<[1], [0], [0], [1], [0, 0, 1, 1], [], []>} : vector<256x32xbf16>, vector<32x64xbf16>, vector<256x64xf32> -> vector<256x64xf32>
    %66 = arith.addf %59, %65 : vector<256x64xf32>
    %67 = vector.extract_strided_slice %16 {offsets = [2, 1, 0], sizes = [16, 16, 32], strides = [1, 1, 1]} : vector<18x18x32xf32> to vector<16x16x32xf32>
    %68 = vector.shape_cast %67 : vector<16x16x32xf32> to vector<256x32xf32>
    %69 = arith.truncf %68 : vector<256x32xf32> to vector<256x32xbf16>
    %c7 = arith.constant 7 : index
    %c0_33 = arith.constant 0 : index
    %c0_34 = arith.constant 0 : index
    %70 = vector.load %arg4[%c7, %c0_33, %c0_34] : memref<9x32x64xbf16, #tpu.memory_space<vmem>>, vector<1x32x64xbf16>
    %71 = vector.shape_cast %70 : vector<1x32x64xbf16> to vector<32x64xbf16>
    %cst_35 = arith.constant dense<0.000000e+00> : vector<256x64xf32>
    %72 = tpu.matmul %69, %71, %cst_35 {dimension_numbers = #tpu.dot_dimension_numbers<[1], [0], [0], [1], [0, 0, 1, 1], [], []>} : vector<256x32xbf16>, vector<32x64xbf16>, vector<256x64xf32> -> vector<256x64xf32>
    %73 = arith.addf %66, %72 : vector<256x64xf32>
    %74 = vector.extract_strided_slice %16 {offsets = [2, 2, 0], sizes = [16, 16, 32], strides = [1, 1, 1]} : vector<18x18x32xf32> to vector<16x16x32xf32>
    %75 = vector.shape_cast %74 : vector<16x16x32xf32> to vector<256x32xf32>
    %76 = arith.truncf %75 : vector<256x32xf32> to vector<256x32xbf16>
    %c8 = arith.constant 8 : index
    %c0_36 = arith.constant 0 : index
    %c0_37 = arith.constant 0 : index
    %77 = vector.load %arg4[%c8, %c0_36, %c0_37] : memref<9x32x64xbf16, #tpu.memory_space<vmem>>, vector<1x32x64xbf16>
    %78 = vector.shape_cast %77 : vector<1x32x64xbf16> to vector<32x64xbf16>
    %cst_38 = arith.constant dense<0.000000e+00> : vector<256x64xf32>
    %79 = tpu.matmul %76, %78, %cst_38 {dimension_numbers = #tpu.dot_dimension_numbers<[1], [0], [0], [1], [0, 0, 1, 1], [], []>} : vector<256x32xbf16>, vector<32x64xbf16>, vector<256x64xf32> -> vector<256x64xf32>
    %80 = arith.addf %73, %79 : vector<256x64xf32>
    %c0_39 = arith.constant 0 : index
    %c0_40 = arith.constant 0 : index
    %81 = vector.load %arg5[%c0_39, %c0_40] : memref<1x64xf32, #tpu.memory_space<vmem>>, vector<1x64xf32>
    %82 = vector.broadcast %81 : vector<1x64xf32> to vector<256x64xf32>
    %83 = arith.addf %80, %82 : vector<256x64xf32>
    %c0_41 = arith.constant 0 : index
    %c0_42 = arith.constant 0 : index
    %c0_43 = arith.constant 0 : index
    %84 = vector.load %arg6[%c0_41, %c0_42, %c0_43] : memref<1x256x64xf32, #tpu.memory_space<vmem>>, vector<1x256x64xf32>
    %85 = vector.shape_cast %84 : vector<1x256x64xf32> to vector<256x64xf32>
    %86 = vector.shape_cast %83 : vector<256x64xf32> to vector<1x256x64xf32>
    tpu.vector_store %arg6[%c0_41, %c0_42, %c0_43], %86 {strides = array<i32>} : memref<1x256x64xf32, #tpu.memory_space<vmem>>, vector<1x256x64xf32>,
    %cst_44 = arith.constant dense<0.000000e+00> : vector<64xf32>
    %87 = vector.multi_reduction <add>, %83, %cst_44 [0] : vector<256x64xf32> to vector<64xf32>
    %88 = vector.shape_cast %87 : vector<64xf32> to vector<1x64xf32>
    %89 = arith.mulf %83, %83 : vector<256x64xf32>
    %cst_45 = arith.constant dense<0.000000e+00> : vector<64xf32>
    %90 = vector.multi_reduction <add>, %89, %cst_45 [0] : vector<256x64xf32> to vector<64xf32>
    %91 = vector.shape_cast %90 : vector<64xf32> to vector<1x64xf32>
    %92 = tpu.concatenate %88, %91 in 0 : vector<1x64xf32>, vector<1x64xf32> -> vector<2x64xf32>
    %c0_46 = arith.constant 0 : index
    %c0_47 = arith.constant 0 : index
    %c0_48 = arith.constant 0 : index
    %93 = vector.load %arg7[%c0_46, %c0_47, %c0_48] : memref<1x2x64xf32, #tpu.memory_space<vmem>>, vector<1x2x64xf32>
    %94 = vector.shape_cast %93 : vector<1x2x64xf32> to vector<2x64xf32>
    %95 = vector.shape_cast %92 : vector<2x64xf32> to vector<1x2x64xf32>
    tpu.vector_store %arg7[%c0_46, %c0_47, %c0_48], %95 {strides = array<i32>} : memref<1x2x64xf32, #tpu.memory_space<vmem>>, vector<1x2x64xf32>,
    return
  }
  func.func @transform_0(%arg0: i32) -> (i32, i32, i32) {
    %c0_i32 = arith.constant 0 : i32
    %c0_i32_0 = arith.constant 0 : i32
    %c0_i32_1 = arith.constant 0 : i32
    return %arg0, %c0_i32, %c0_i32_0 : i32, i32, i32
  }
  func.func @transform_1(%arg0: i32) -> (i32, i32) {
    %c0_i32 = arith.constant 0 : i32
    %c0_i32_0 = arith.constant 0 : i32
    %c0_i32_1 = arith.constant 0 : i32
    return %c0_i32, %c0_i32_0 : i32, i32
  }
  func.func @transform_2(%arg0: i32) -> (i32, i32) {
    %c0_i32 = arith.constant 0 : i32
    %c0_i32_0 = arith.constant 0 : i32
    %c0_i32_1 = arith.constant 0 : i32
    return %c0_i32, %c0_i32_0 : i32, i32
  }
  func.func @transform_3(%arg0: i32) -> (i32, i32, i32) {
    %c0_i32 = arith.constant 0 : i32
    %c0_i32_0 = arith.constant 0 : i32
    %c0_i32_1 = arith.constant 0 : i32
    %c0_i32_2 = arith.constant 0 : i32
    return %c0_i32, %c0_i32_0, %c0_i32_1 : i32, i32, i32
  }
  func.func @transform_4(%arg0: i32) -> (i32, i32) {
    %c0_i32 = arith.constant 0 : i32
    %c0_i32_0 = arith.constant 0 : i32
    %c0_i32_1 = arith.constant 0 : i32
    return %c0_i32, %c0_i32_0 : i32, i32
  }
  func.func @transform_5(%arg0: i32) -> (i32, i32, i32) {
    %c0_i32 = arith.constant 0 : i32
    %c0_i32_0 = arith.constant 0 : i32
    %c0_i32_1 = arith.constant 0 : i32
    return %arg0, %c0_i32, %c0_i32_0 : i32, i32, i32
  }
  func.func @transform_6(%arg0: i32) -> (i32, i32, i32) {
    %c0_i32 = arith.constant 0 : i32
    %c0_i32_0 = arith.constant 0 : i32
    %c0_i32_1 = arith.constant 0 : i32
    return %arg0, %c0_i32, %c0_i32_0 : i32, i32, i32
  }
}

module attributes {stable_mosaic.version = 11 : i64} {
  func.func @_bn_dropout_kernel(%arg0: i32, %arg1: memref<256x128xf32, #tpu.memory_space<vmem>>, %arg2: memref<1x128xf32, #tpu.memory_space<vmem>>, %arg3: memref<1x128xf32, #tpu.memory_space<vmem>>, %arg4: memref<256x128xbf16, #tpu.memory_space<vmem>>, %arg5: memref<256x128xf32, #tpu.memory_space<vmem>>) attributes {dimension_semantics = [#tpu.dimension_semantics<parallel>], iteration_bounds = array<i64: 1>, scalar_prefetch = 0 : i64, scratch_operands = 0 : i64, tpu.core_type = #tpu.core_type<tc>, window_params = [{transform_indices = @transform_0, window_bounds = array<i64: 256, 128>}, {pipeline_mode = #tpu.pipeline_mode<synchronous>, transform_indices = @transform_1, window_bounds = array<i64: 1, 128>}, {pipeline_mode = #tpu.pipeline_mode<synchronous>, transform_indices = @transform_2, window_bounds = array<i64: 1, 128>}, {transform_indices = @transform_3, window_bounds = array<i64: 256, 128>}, {transform_indices = @transform_4, window_bounds = array<i64: 256, 128>}]} {
    %c0 = arith.constant 0 : index
    %c0_0 = arith.constant 0 : index
    %0 = vector.load %arg1[%c0, %c0_0] : memref<256x128xf32, #tpu.memory_space<vmem>>, vector<256x128xf32>
    %c0_1 = arith.constant 0 : index
    %c0_2 = arith.constant 0 : index
    %1 = vector.load %arg4[%c0_1, %c0_2] : memref<256x128xbf16, #tpu.memory_space<vmem>>, vector<256x128xbf16>
    %2 = arith.extf %1 : vector<256x128xbf16> to vector<256x128xf32>
    %c0_3 = arith.constant 0 : index
    %c0_4 = arith.constant 0 : index
    %3 = vector.load %arg2[%c0_3, %c0_4] : memref<1x128xf32, #tpu.memory_space<vmem>>, vector<1x128xf32>
    %4 = vector.broadcast %3 : vector<1x128xf32> to vector<256x128xf32>
    %5 = arith.mulf %0, %4 : vector<256x128xf32>
    %c0_5 = arith.constant 0 : index
    %c0_6 = arith.constant 0 : index
    %6 = vector.load %arg3[%c0_5, %c0_6] : memref<1x128xf32, #tpu.memory_space<vmem>>, vector<1x128xf32>
    %7 = vector.broadcast %6 : vector<1x128xf32> to vector<256x128xf32>
    %8 = arith.addf %5, %7 : vector<256x128xf32>
    %9 = arith.mulf %8, %2 : vector<256x128xf32>
    %c0_7 = arith.constant 0 : index
    %c0_8 = arith.constant 0 : index
    %10 = vector.load %arg5[%c0_7, %c0_8] : memref<256x128xf32, #tpu.memory_space<vmem>>, vector<256x128xf32>
    tpu.vector_store %arg5[%c0_7, %c0_8], %9 {strides = array<i32>} : memref<256x128xf32, #tpu.memory_space<vmem>>, vector<256x128xf32>,
    return
  }
  func.func @transform_0(%arg0: i32) -> (i32, i32) {
    %c0_i32 = arith.constant 0 : i32
    %c0_i32_0 = arith.constant 0 : i32
    return %arg0, %c0_i32 : i32, i32
  }
  func.func @transform_1(%arg0: i32) -> (i32, i32) {
    %c0_i32 = arith.constant 0 : i32
    %c0_i32_0 = arith.constant 0 : i32
    %c0_i32_1 = arith.constant 0 : i32
    return %c0_i32, %c0_i32_0 : i32, i32
  }
  func.func @transform_2(%arg0: i32) -> (i32, i32) {
    %c0_i32 = arith.constant 0 : i32
    %c0_i32_0 = arith.constant 0 : i32
    %c0_i32_1 = arith.constant 0 : i32
    return %c0_i32, %c0_i32_0 : i32, i32
  }
  func.func @transform_3(%arg0: i32) -> (i32, i32) {
    %c0_i32 = arith.constant 0 : i32
    %c0_i32_0 = arith.constant 0 : i32
    return %arg0, %c0_i32 : i32, i32
  }
  func.func @transform_4(%arg0: i32) -> (i32, i32) {
    %c0_i32 = arith.constant 0 : i32
    %c0_i32_0 = arith.constant 0 : i32
    return %arg0, %c0_i32 : i32, i32
  }
}

</mosaic_0001>

<bundles_post_ra>
// kernel: squeeze.15
= control target key start
LH: loop header
LB: loop body
LE: loop exit
PB: predicated region body
PF: predicated region fallthrough
CT: control target
= control target key end

     0   :  { %s8_s6 = smov 3  ;;  %s11_s7 = smov 12  ;;  %vm13_vm0 = vcmask 1043458   ;;  %vm3_vm1 = vcmask 130048   ;;  %vm17_vm2 = vcmask 1048448   ;;  %vm31_vm3 = vcmask 917248   ;;  %s213_s0 = inlined_call_operand.vmem [shape: f32[2,16,16,1], index: 0, kind: input, shape index: {}]   ;;  %s214_s1 = inlined_call_operand.vmem [shape: f32[2,256,1], index: 1, kind: output, shape index: {}]  }
   0x1   :  { %v116_v0 = vld [vmem:[%s213_s0 + $0x7] ss:$16 sm:%s8_s6]   ;;  %v117_v1 = vld [vmem:[%s213_s0 - $0x11] ss:$16 sm:%s11_s7]   ;;  %s36_s12 = smov 3  ;;  %s39_s15 = smov 12 }
   0x2   :  { %v14_v2 = vsel %vm13_vm0, %v117_v1, %v116_v0  ;;  %v120_v3 = vld [vmem:[%s213_s0 + $0x5] ss:$16 sm:%s36_s12]   ;;  %s138_s16 = smov 112   ;;  %v121_v4 = vld [vmem:[%s213_s0 - $0x13] ss:$16 sm:%s39_s15]   ;;  %s22_s19 = smov 3 }
   0x3   :  { %15 = vrot.lane.b32.xlu0 %v14_v2, %s138_s16  ;;  %s25_s20 = smov 12  ;;  %v42_v5 = vsel %vm13_vm0, %v121_v4, %v120_v3  ;;  %v118_v6 = vld [vmem:[%s213_s0 + $0x6] ss:$16 sm:%s22_s19]   ;;  %s50_s25 = smov 3  ;;  %vm45_vm4 = vcmask 786048   ;;  %vm59_vm5 = vcmask 654848  }
   0x4   :  { %v119_v7 = vld [vmem:[%s213_s0 - $0x12] ss:$16 sm:%s25_s20]   ;;  %s139_s26 = smov 80   ;;  %v122_v9 = vld [vmem:[%s213_s0 + $0x4] ss:$16 sm:%s50_s25]   ;;  %s53_s29 = smov 12 }
   0x5   :  { %43 = vrot.lane.b32.xlu1 %v42_v5, %s139_s26  ;;  %v28_v8 = vsel %vm13_vm0, %v119_v7, %v118_v6  ;;  %v123_v10 = vld [vmem:[%s213_s0 - $0x14] ss:$16 sm:%s53_s29]   ;;  %s64_s3 = smov 3  ;;  %s67_s4 = smov 12  ;;  %vm73_vm6 = vcmask 523648   ;;  %vm87_vm7 = vcmask 392448  }
   0x6   :  { %s140_s5 = smov 96   ;;  %v56_v11 = vsel %vm13_vm0, %v123_v10, %v122_v9  ;;  %v124_v12 = vld [vmem:[%s213_s0 + $0x3] ss:$16 sm:%s64_s3]   ;;  %s78_s8 = smov 3  ;;  %v125_v13 = vld [vmem:[%s213_s0 - $0x15] ss:$16 sm:%s67_s4]  }
   0x7   :  { %29 = vrot.lane.b32.xlu0 %v28_v8, %s140_s5  ;;  %v126_v14 = vld [vmem:[%s213_s0 + $0x2] ss:$16 sm:%s78_s8]   ;;  %s81_s13 = smov 12  ;;  %s141_s14 = smov 64   ;;  %v70_v15 = vsel %vm13_vm0, %v125_v13, %v124_v12  ;;  %vm101_vm8 = vcmask 261248  }
   0x8   :  { %v127_v16 = vld [vmem:[%s213_s0 - $0x16] ss:$16 sm:%s81_s13]   ;;  %s92_s17 = smov 3  ;;  %s95_s18 = smov 12 }
   0x9   :  { %57 = vrot.lane.b32.xlu1 %v56_v11, %s141_s14  ;;  %v84_v17 = vsel %vm13_vm0, %v127_v16, %v126_v14  ;;  %v128_v18 = vld [vmem:[%s213_s0 + $0x1] ss:$16 sm:%s92_s17]   ;;  %s142_s23 = smov 48   ;;  %v2_v20 = vld [vmem:[%s213_s0] ss:$8 sm:$0xf]  }
   0xa   :  { %v129_v19 = vld [vmem:[%s213_s0 - $0x17] ss:$16 sm:%s95_s18]   ;;  %4 = vst.msk [vmem:[#allocation0] ss:$8 sm:$0x3] %vm3_vm1, %v2_v20   ;;  %s143_s0 = smov 32  }
   0xb   :  { %71 = vrot.lane.b32.xlu0 %v70_v15, %s142_s23  ;;  %v98_v21 = vsel %vm13_vm0, %v129_v19, %v128_v18  ;;  %6 = vst.msk [vmem:[#allocation0 - $0xf] ss:$8 sm:$0xc] %vm3_vm1, %v2_v20   ;;  %s144_s26 = smov 16  }
   0xd   :  { %85 = vrot.lane.b32.xlu1 %v84_v17, %s143_s0 }
   0xf   :  { %99 = vrot.lane.b32.xlu0 %v98_v21, %s144_s26 }
  0x75   :  { %v16_v22 = vpop.permute.xlu0 %15  }
  0x76   :  { %18 = vst.msk [vmem:[#allocation0] sm:$0x3] %vm17_vm2, %v16_v22   ;;  %20 = vst.msk [vmem:[#allocation0 + $0x6] sm:$0xc] %vm17_vm2, %v16_v22  }
  0x77   :  { %v44_v23 = vpop.permute.xlu1 %43  }
  0x79   :  { %v30_v24 = vpop.permute.xlu0 %29  }
  0x7a   :  { %32 = vst.msk [vmem:[#allocation0] sm:$0x3] %vm31_vm3, %v30_v24   ;;  %34 = vst.msk [vmem:[#allocation0 + $0x6] sm:$0xc] %vm31_vm3, %v30_v24  }
  0x7b   :  { %46 = vst.msk [vmem:[#allocation0] sm:$0x3] %vm45_vm4, %v44_v23   ;;  %48 = vst.msk [vmem:[#allocation0 + $0x6] sm:$0xc] %vm45_vm4, %v44_v23   ;;  %v58_v25 = vpop.permute.xlu1 %57  }
  0x7c   :  { %60 = vst.msk [vmem:[#allocation0] sm:$0x3] %vm59_vm5, %v58_v25   ;;  %62 = vst.msk [vmem:[#allocation0 + $0x6] sm:$0xc] %vm59_vm5, %v58_v25  }
  0x7d   :  { %v72_v26 = vpop.permute.xlu0 %71  }
  0x7e   :  { %74 = vst.msk [vmem:[#allocation0] sm:$0x3] %vm73_vm6, %v72_v26   ;;  %76 = vst.msk [vmem:[#allocation0 + $0x6] sm:$0xc] %vm73_vm6, %v72_v26  }
  0x7f   :  { %v86_v27 = vpop.permute.xlu1 %85  }
  0x80   :  { %88 = vst.msk [vmem:[#allocation0] sm:$0x3] %vm87_vm7, %v86_v27   ;;  %90 = vst.msk [vmem:[#allocation0 + $0x6] sm:$0xc] %vm87_vm7, %v86_v27  }
  0x81   :  { %v100_v28 = vpop.permute.xlu0 %99  }
  0x82   :  { %102 = vst.msk [vmem:[#allocation0] sm:$0x3] %vm101_vm8, %v100_v28   ;;  %104 = vst.msk [vmem:[#allocation0 + $0x6] sm:$0xc] %vm101_vm8, %v100_v28  }
  0x89   :  { %v108_v29 = vld [vmem:[#allocation0] sm:$0x3]  ;;  %v112_v30 = vld [vmem:[#allocation0 + $0x8] sm:$0x3] }
  0x8a   :  { %110 = vst [vmem:[%s214_s1] sm:$0x3] %v108_v29  ;;  %130 = vst [vmem:[%s214_s1 + $0x2] sm:$0x3] %v112_v30 }

// kernel: squeeze.19
= control target key start
LH: loop header
LB: loop body
LE: loop exit
PB: predicated region body
PF: predicated region fallthrough
CT: control target
= control target key end

     0   :  { %s8_s6 = smov 3  ;;  %s11_s7 = smov 12  ;;  %vm13_vm0 = vcmask 1043458   ;;  %vm3_vm1 = vcmask 130048   ;;  %vm17_vm2 = vcmask 1048448   ;;  %vm31_vm3 = vcmask 917248   ;;  %s213_s0 = inlined_call_operand.vmem [shape: f32[2,1,16,16], index: 0, kind: input, shape index: {}]   ;;  %s214_s1 = inlined_call_operand.vmem [shape: f32[2,256,1], index: 1, kind: output, shape index: {}]  }
   0x1   :  { %v116_v0 = vld [vmem:[%s213_s0 + $0x7] ss:$16 sm:%s8_s6]   ;;  %v117_v1 = vld [vmem:[%s213_s0 - $0x11] ss:$16 sm:%s11_s7]   ;;  %s36_s12 = smov 3  ;;  %s39_s15 = smov 12 }
   0x2   :  { %v14_v2 = vsel %vm13_vm0, %v117_v1, %v116_v0  ;;  %v120_v3 = vld [vmem:[%s213_s0 + $0x5] ss:$16 sm:%s36_s12]   ;;  %s138_s16 = smov 112   ;;  %v121_v4 = vld [vmem:[%s213_s0 - $0x13] ss:$16 sm:%s39_s15]   ;;  %s22_s19 = smov 3 }
   0x3   :  { %15 = vrot.lane.b32.xlu0 %v14_v2, %s138_s16  ;;  %s25_s20 = smov 12  ;;  %v42_v5 = vsel %vm13_vm0, %v121_v4, %v120_v3  ;;  %v118_v6 = vld [vmem:[%s213_s0 + $0x6] ss:$16 sm:%s22_s19]   ;;  %s50_s25 = smov 3  ;;  %vm45_vm4 = vcmask 786048   ;;  %vm59_vm5 = vcmask 654848  }
   0x4   :  { %v119_v7 = vld [vmem:[%s213_s0 - $0x12] ss:$16 sm:%s25_s20]   ;;  %s139_s26 = smov 80   ;;  %v122_v9 = vld [vmem:[%s213_s0 + $0x4] ss:$16 sm:%s50_s25]   ;;  %s53_s29 = smov 12 }
   0x5   :  { %43 = vrot.lane.b32.xlu1 %v42_v5, %s139_s26  ;;  %v28_v8 = vsel %vm13_vm0, %v119_v7, %v118_v6  ;;  %v123_v10 = vld [vmem:[%s213_s0 - $0x14] ss:$16 sm:%s53_s29]   ;;  %s64_s3 = smov 3  ;;  %s67_s4 = smov 12  ;;  %vm73_vm6 = vcmask 523648   ;;  %vm87_vm7 = vcmask 392448  }
   0x6   :  { %s140_s5 = smov 96   ;;  %v56_v11 = vsel %vm13_vm0, %v123_v10, %v122_v9  ;;  %v124_v12 = vld [vmem:[%s213_s0 + $0x3] ss:$16 sm:%s64_s3]   ;;  %s78_s8 = smov 3  ;;  %v125_v13 = vld [vmem:[%s213_s0 - $0x15] ss:$16 sm:%s67_s4]  }
   0x7   :  { %29 = vrot.lane.b32.xlu0 %v28_v8, %s140_s5  ;;  %v126_v14 = vld [vmem:[%s213_s0 + $0x2] ss:$16 sm:%s78_s8]   ;;  %s81_s13 = smov 12  ;;  %s141_s14 = smov 64   ;;  %v70_v15 = vsel %vm13_vm0, %v125_v13, %v124_v12  ;;  %vm101_vm8 = vcmask 261248  }
   0x8   :  { %v127_v16 = vld [vmem:[%s213_s0 - $0x16] ss:$16 sm:%s81_s13]   ;;  %s92_s17 = smov 3  ;;  %s95_s18 = smov 12 }
   0x9   :  { %57 = vrot.lane.b32.xlu1 %v56_v11, %s141_s14  ;;  %v84_v17 = vsel %vm13_vm0, %v127_v16, %v126_v14  ;;  %v128_v18 = vld [vmem:[%s213_s0 + $0x1] ss:$16 sm:%s92_s17]   ;;  %s142_s23 = smov 48   ;;  %v2_v20 = vld [vmem:[%s213_s0] ss:$8 sm:$0xf]  }
   0xa   :  { %v129_v19 = vld [vmem:[%s213_s0 - $0x17] ss:$16 sm:%s95_s18]   ;;  %4 = vst.msk [vmem:[#allocation0] ss:$8 sm:$0x3] %vm3_vm1, %v2_v20   ;;  %s143_s0 = smov 32  }
   0xb   :  { %71 = vrot.lane.b32.xlu0 %v70_v15, %s142_s23  ;;  %v98_v21 = vsel %vm13_vm0, %v129_v19, %v128_v18  ;;  %6 = vst.msk [vmem:[#allocation0 - $0xf] ss:$8 sm:$0xc] %vm3_vm1, %v2_v20   ;;  %s144_s26 = smov 16  }
   0xd   :  { %85 = vrot.lane.b32.xlu1 %v84_v17, %s143_s0 }
   0xf   :  { %99 = vrot.lane.b32.xlu0 %v98_v21, %s144_s26 }
  0x75   :  { %v16_v22 = vpop.permute.xlu0 %15  }
  0x76   :  { %18 = vst.msk [vmem:[#allocation0] sm:$0x3] %vm17_vm2, %v16_v22   ;;  %20 = vst.msk [vmem:[#allocation0 + $0x6] sm:$0xc] %vm17_vm2, %v16_v22  }
  0x77   :  { %v44_v23 = vpop.permute.xlu1 %43  }
  0x79   :  { %v30_v24 = vpop.permute.xlu0 %29  }
  0x7a   :  { %32 = vst.msk [vmem:[#allocation0] sm:$0x3] %vm31_vm3, %v30_v24   ;;  %34 = vst.msk [vmem:[#allocation0 + $0x6] sm:$0xc] %vm31_vm3, %v30_v24  }
  0x7b   :  { %46 = vst.msk [vmem:[#allocation0] sm:$0x3] %vm45_vm4, %v44_v23   ;;  %48 = vst.msk [vmem:[#allocation0 + $0x6] sm:$0xc] %vm45_vm4, %v44_v23   ;;  %v58_v25 = vpop.permute.xlu1 %57  }
  0x7c   :  { %60 = vst.msk [vmem:[#allocation0] sm:$0x3] %vm59_vm5, %v58_v25   ;;  %62 = vst.msk [vmem:[#allocation0 + $0x6] sm:$0xc] %vm59_vm5, %v58_v25  }
  0x7d   :  { %v72_v26 = vpop.permute.xlu0 %71  }
  0x7e   :  { %74 = vst.msk [vmem:[#allocation0] sm:$0x3] %vm73_vm6, %v72_v26   ;;  %76 = vst.msk [vmem:[#allocation0 + $0x6] sm:$0xc] %vm73_vm6, %v72_v26  }
  0x7f   :  { %v86_v27 = vpop.permute.xlu1 %85  }
  0x80   :  { %88 = vst.msk [vmem:[#allocation0] sm:$0x3] %vm87_vm7, %v86_v27   ;;  %90 = vst.msk [vmem:[#allocation0 + $0x6] sm:$0xc] %vm87_vm7, %v86_v27  }
  0x81   :  { %v100_v28 = vpop.permute.xlu0 %99  }
  0x82   :  { %102 = vst.msk [vmem:[#allocation0] sm:$0x3] %vm101_vm8, %v100_v28   ;;  %104 = vst.msk [vmem:[#allocation0 + $0x6] sm:$0xc] %vm101_vm8, %v100_v28  }
  0x89   :  { %v108_v29 = vld [vmem:[#allocation0] sm:$0x3]  ;;  %v112_v30 = vld [vmem:[#allocation0 + $0x8] sm:$0x3] }
  0x8a   :  { %110 = vst [vmem:[%s214_s1] sm:$0x3] %v108_v29  ;;  %130 = vst [vmem:[%s214_s1 + $0x2] sm:$0x3] %v112_v30 }

// kernel: random_cnn_forward.3
= control target key start
LH: loop header
LB: loop body
LE: loop exit
PB: predicated region body
PF: predicated region fallthrough
CT: control target
= control target key end

     0   :  { %s679_s0 = inlined_call_operand.vmem [shape: f32[256,128], index: 0, kind: input, shape index: {}]   ;;  %s680_s1 = inlined_call_operand.vmem [shape: f32[1,128], index: 1, kind: input, shape index: {}]   ;;  %s681_s2 = inlined_call_operand.vmem [shape: f32[1,128], index: 2, kind: input, shape index: {}]   ;;  %s682_s3 = inlined_call_operand.vmem [shape: bf16[256,128], index: 3, kind: input, shape index: {}]   ;;  %s683_s4 = inlined_call_operand.vmem [shape: f32[256,128], index: 4, kind: output, shape index: {}]  }
   0x1   :  { %v17_v0 = vld [vmem:[%s679_s0] sm:$0xff]  ;;  %v18_v6 = vld [vmem:[%s679_s0 + $0x8] sm:$0xff]  ;;  %v19_v7 = vld [vmem:[%s679_s0 + $0x10] sm:$0xff] }
   0x2   :  { %v262_v1 = vld [vmem:[%s682_s3] sm:$0xff]   ;;  %v325_v10 = vld [vmem:[%s682_s3 + $0x8] sm:$0xff]   ;;  %v20_v12 = vld [vmem:[%s679_s0 + $0x18] sm:$0xff] }
   0x3   :  { %v374_v2 = vld [vmem:[%s680_s1] ss:$0 sm:$0xff]  ;;  %v263_v3 = vunpack.c.l.bf16 %v262_v1  ;;  %v264_v8 = vunpack.c.h.bf16 %v262_v1  ;;  %v267_v15 = vunpack.c.l.bf16 %v325_v10  ;;  %v268_v16 = vunpack.c.h.bf16 %v325_v10  ;;  %v326_v18 = vld [vmem:[%s682_s3 + $0x10] sm:$0xff]   ;;  %v22_v19 = vld [vmem:[%s679_s0 + $0x28] sm:$0xff] }
   0x4   :  { %v120_v4 = vmul.f32 %v374_v2, %v17_v0  ;;  %v380_v5 = vld [vmem:[%s681_s2] ss:$0 sm:$0xff]  ;;  %v121_v9 = vmul.f32 %v374_v2, %v18_v6  ;;  %v122_v11 = vmul.f32 %v374_v2, %v19_v7  ;;  %v123_v17 = vmul.f32 %v374_v2, %v20_v12  ;;  %v23_v24 = vld [vmem:[%s679_s0 + $0x30] sm:$0xff]  ;;  %v327_v25 = vld [vmem:[%s682_s3 + $0x18] sm:$0xff]  }
   0x5   :  { %v21_v13 = vld [vmem:[%s679_s0 + $0x20] sm:$0xff]  ;;  %v271_v22 = vunpack.c.l.bf16 %v326_v18  ;;  %v272_v28 = vunpack.c.h.bf16 %v326_v18  ;;  %v125_v29 = vmul.f32 %v374_v2, %v22_v19  ;;  %v24_v30 = vld [vmem:[%s679_s0 + $0x38] sm:$0xff]  ;;  %v275_v36 = vunpack.c.l.bf16 %v327_v25  ;;  %v26_v37 = vld [vmem:[%s679_s0 + $0x48] sm:$0xff] }
   0x6   :  { %v159_v14 = vadd.f32 %v380_v5, %v120_v4  ;;  %v160_v20 = vadd.f32 %v380_v5, %v121_v9  ;;  %v161_v21 = vadd.f32 %v380_v5, %v122_v11  ;;  %v124_v23 = vmul.f32 %v374_v2, %v21_v13  ;;  %v25_v31 = vld [vmem:[%s679_s0 + $0x40] sm:$0xff]  ;;  %v27_v42 = vld [vmem:[%s679_s0 + $0x50] sm:$0xff]  ;;  %v329_v43 = vld [vmem:[%s682_s3 + $0x28] sm:$0xff]  }
   0x7   :  { %v162_v27 = vadd.f32 %v380_v5, %v123_v17  ;;  %v328_v32 = vld [vmem:[%s682_s3 + $0x20] sm:$0xff]   ;;  %v164_v39 = vadd.f32 %v380_v5, %v125_v29  ;;  %v126_v40 = vmul.f32 %v374_v2, %v23_v24  ;;  %v276_v41 = vunpack.c.h.bf16 %v327_v25  ;;  %v28_v48 = vld [vmem:[%s679_s0 + $0x58] sm:$0xff]  ;;  %v330_v53 = vld [vmem:[%s682_s3 + $0x30] sm:$0xff]  }
   0x8   :  { %v191_v26 = vmul.f32 %v263_v3, %v159_v14  ;;  %v192_v33 = vmul.f32 %v264_v8, %v160_v20  ;;  %v193_v34 = vmul.f32 %v267_v15, %v161_v21  ;;  %v163_v35 = vadd.f32 %v380_v5, %v124_v23  ;;  %v29_v58 = vld [vmem:[%s679_s0 + $0x60] sm:$0xff]  ;;  %v30_v63 = vld [vmem:[%s679_s0 + $0x68] sm:$0xff]  ;;  %v31_v0 = vld [vmem:[%s679_s0 + $0x70] sm:$0xff] }
   0x9   :  { %v194_v38 = vmul.f32 %v268_v16, %v162_v27  ;;  %v127_v45 = vmul.f32 %v374_v2, %v24_v30  ;;  %v279_v46 = vunpack.c.l.bf16 %v328_v32  ;;  %v128_v47 = vmul.f32 %v374_v2, %v25_v31  ;;  %v331_v1 = vld [vmem:[%s682_s3 + $0x38] sm:$0xff]   ;;  %v33_v13 = vld [vmem:[%s679_s0 + $0x80] sm:$0xff]  ;;  %v34_v19 = vld [vmem:[%s679_s0 + $0x88] sm:$0xff] }
   0xa   :  { %223 = vst [vmem:[%s683_s4] sm:$0xff] %v191_v26  ;;  %224 = vst [vmem:[%s683_s4 + $0x8] sm:$0xff] %v192_v33  ;;  %v195_v44 = vmul.f32 %v271_v22, %v163_v35  ;;  %v196_v49 = vmul.f32 %v272_v28, %v164_v39  ;;  %v165_v50 = vadd.f32 %v380_v5, %v126_v40  ;;  %v280_v51 = vunpack.c.h.bf16 %v328_v32  ;;  %v32_v8 = vld [vmem:[%s679_s0 + $0x78] sm:$0xff]  ;;  %v332_v14 = vld [vmem:[%s682_s3 + $0x40] sm:$0xff]  }
   0xb   :  { %225 = vst [vmem:[%s683_s4 + $0x10] sm:$0xff] %v193_v34  ;;  %226 = vst [vmem:[%s683_s4 + $0x18] sm:$0xff] %v194_v38  ;;  %v129_v52 = vmul.f32 %v374_v2, %v26_v37  ;;  %v166_v54 = vadd.f32 %v380_v5, %v127_v45  ;;  %v167_v55 = vadd.f32 %v380_v5, %v128_v47  ;;  %v283_v56 = vunpack.c.l.bf16 %v329_v43  ;;  %v333_v24 = vld [vmem:[%s682_s3 + $0x48] sm:$0xff]   ;;  %v35_v29 = vld [vmem:[%s679_s0 + $0x90] sm:$0xff] }
   0xc   :  { %227 = vst [vmem:[%s683_s4 + $0x20] sm:$0xff] %v195_v44  ;;  %v130_v57 = vmul.f32 %v374_v2, %v27_v42  ;;  %228 = vst [vmem:[%s683_s4 + $0x28] sm:$0xff] %v196_v49  ;;  %v197_v59 = vmul.f32 %v275_v36, %v165_v50  ;;  %v284_v61 = vunpack.c.h.bf16 %v329_v43  ;;  %v131_v62 = vmul.f32 %v374_v2, %v28_v48  ;;  %v36_v34 = vld [vmem:[%s679_s0 + $0x98] sm:$0xff]  ;;  %v37_v35 = vld [vmem:[%s679_s0 + $0xa0] sm:$0xff] }
   0xd   :  { %v168_v60 = vadd.f32 %v380_v5, %v129_v52  ;;  %v198_v3 = vmul.f32 %v276_v41, %v166_v54  ;;  %v199_v4 = vmul.f32 %v279_v46, %v167_v55  ;;  %v287_v7 = vunpack.c.l.bf16 %v330_v53  ;;  %v334_v36 = vld [vmem:[%s682_s3 + $0x50] sm:$0xff]   ;;  %v38_v41 = vld [vmem:[%s679_s0 + $0xa8] sm:$0xff]  ;;  %v335_v47 = vld [vmem:[%s682_s3 + $0x58] sm:$0xff]  }
   0xe   :  { %v169_v6 = vadd.f32 %v380_v5, %v130_v57  ;;  %229 = vst [vmem:[%s683_s4 + $0x30] sm:$0xff] %v197_v59  ;;  %v170_v10 = vadd.f32 %v380_v5, %v131_v62  ;;  %v132_v11 = vmul.f32 %v374_v2, %v29_v58  ;;  %v288_v12 = vunpack.c.h.bf16 %v330_v53  ;;  %v39_v46 = vld [vmem:[%s679_s0 + $0xb0] sm:$0xff]  ;;  %v40_v52 = vld [vmem:[%s679_s0 + $0xb8] sm:$0xff]  ;;  %v336_v57 = vld [vmem:[%s682_s3 + $0x60] sm:$0xff]  }
   0xf   :  { %v200_v9 = vmul.f32 %v280_v51, %v168_v60  ;;  %230 = vst [vmem:[%s683_s4 + $0x38] sm:$0xff] %v198_v3  ;;  %231 = vst [vmem:[%s683_s4 + $0x40] sm:$0xff] %v199_v4  ;;  %v133_v16 = vmul.f32 %v374_v2, %v30_v63  ;;  %v291_v17 = vunpack.c.l.bf16 %v331_v1  ;;  %v134_v18 = vmul.f32 %v374_v2, %v31_v0  ;;  %v41_v62 = vld [vmem:[%s679_s0 + $0xc0] sm:$0xff]  ;;  %v42_v4 = vld [vmem:[%s679_s0 + $0xc8] sm:$0xff] }
  0x10   :  { %v201_v15 = vmul.f32 %v283_v56, %v169_v6  ;;  %v202_v20 = vmul.f32 %v284_v61, %v170_v10  ;;  %v171_v21 = vadd.f32 %v380_v5, %v132_v11  ;;  %v292_v22 = vunpack.c.h.bf16 %v331_v1  ;;  %v43_v6 = vld [vmem:[%s679_s0 + $0xd0] sm:$0xff] }
  0x11   :  { %232 = vst [vmem:[%s683_s4 + $0x48] sm:$0xff] %v200_v9  ;;  %v135_v23 = vmul.f32 %v374_v2, %v32_v8  ;;  %v172_v25 = vadd.f32 %v380_v5, %v133_v16  ;;  %v173_v26 = vadd.f32 %v380_v5, %v134_v18  ;;  %v295_v27 = vunpack.c.l.bf16 %v332_v14  ;;  %v338_v18 = vld [vmem:[%s682_s3 + $0x70] sm:$0xff]  }
  0x12   :  { %233 = vst [vmem:[%s683_s4 + $0x50] sm:$0xff] %v201_v15  ;;  %v136_v28 = vmul.f32 %v374_v2, %v33_v13  ;;  %234 = vst [vmem:[%s683_s4 + $0x58] sm:$0xff] %v202_v20  ;;  %v203_v30 = vmul.f32 %v287_v7, %v171_v21  ;;  %v296_v32 = vunpack.c.h.bf16 %v332_v14  ;;  %v137_v33 = vmul.f32 %v374_v2, %v34_v19  ;;  %v337_v7 = vld [vmem:[%s682_s3 + $0x68] sm:$0xff]  }
  0x13   :  { %v174_v31 = vadd.f32 %v380_v5, %v135_v23  ;;  %v204_v37 = vmul.f32 %v288_v12, %v172_v25  ;;  %v205_v38 = vmul.f32 %v291_v17, %v173_v26  ;;  %v299_v40 = vunpack.c.l.bf16 %v333_v24  ;;  %v44_v12 = vld [vmem:[%s679_s0 + $0xd8] sm:$0xff]  ;;  %v45_v17 = vld [vmem:[%s679_s0 + $0xe0] sm:$0xff]  ;;  %v46_v23 = vld [vmem:[%s679_s0 + $0xe8] sm:$0xff] }
  0x14   :  { %v175_v39 = vadd.f32 %v380_v5, %v136_v28  ;;  %235 = vst [vmem:[%s683_s4 + $0x60] sm:$0xff] %v203_v30  ;;  %v176_v43 = vadd.f32 %v380_v5, %v137_v33  ;;  %v138_v44 = vmul.f32 %v374_v2, %v35_v29  ;;  %v300_v45 = vunpack.c.h.bf16 %v333_v24  ;;  %v339_v33 = vld [vmem:[%s682_s3 + $0x78] sm:$0xff]  }
  0x15   :  { %v206_v42 = vmul.f32 %v292_v22, %v174_v31  ;;  %236 = vst [vmem:[%s683_s4 + $0x68] sm:$0xff] %v204_v37  ;;  %237 = vst [vmem:[%s683_s4 + $0x70] sm:$0xff] %v205_v38  ;;  %v139_v49 = vmul.f32 %v374_v2, %v36_v34  ;;  %v303_v50 = vunpack.c.l.bf16 %v334_v36  ;;  %v140_v51 = vmul.f32 %v374_v2, %v37_v35  ;;  %v48_v38 = vld [vmem:[%s679_s0 + $0xf8] sm:$0xff] }
  0x16   :  { %v207_v48 = vmul.f32 %v295_v27, %v175_v39  ;;  %v208_v53 = vmul.f32 %v296_v32, %v176_v43  ;;  %v177_v54 = vadd.f32 %v380_v5, %v138_v44  ;;  %v304_v55 = vunpack.c.h.bf16 %v334_v36  ;;  %v47_v32 = vld [vmem:[%s679_s0 + $0xf0] sm:$0xff] }
  0x17   :  { %238 = vst [vmem:[%s683_s4 + $0x78] sm:$0xff] %v206_v42  ;;  %v141_v56 = vmul.f32 %v374_v2, %v38_v41  ;;  %v178_v58 = vadd.f32 %v380_v5, %v139_v49  ;;  %v179_v59 = vadd.f32 %v380_v5, %v140_v51  ;;  %v307_v60 = vunpack.c.l.bf16 %v335_v47 }
  0x18   :  { %239 = vst [vmem:[%s683_s4 + $0x80] sm:$0xff] %v207_v48  ;;  %v142_v61 = vmul.f32 %v374_v2, %v39_v46  ;;  %240 = vst [vmem:[%s683_s4 + $0x88] sm:$0xff] %v208_v53  ;;  %v209_v63 = vmul.f32 %v299_v40, %v177_v54  ;;  %v308_v1 = vunpack.c.h.bf16 %v335_v47  ;;  %v143_v3 = vmul.f32 %v374_v2, %v40_v52 }
  0x19   :  { %v180_v0 = vadd.f32 %v380_v5, %v141_v56  ;;  %v210_v8 = vmul.f32 %v300_v45, %v178_v58  ;;  %v211_v9 = vmul.f32 %v303_v50, %v179_v59  ;;  %v311_v11 = vunpack.c.l.bf16 %v336_v57 }
  0x1a   :  { %v181_v10 = vadd.f32 %v380_v5, %v142_v61  ;;  %241 = vst [vmem:[%s683_s4 + $0x90] sm:$0xff] %v209_v63  ;;  %v182_v14 = vadd.f32 %v380_v5, %v143_v3  ;;  %v144_v15 = vmul.f32 %v374_v2, %v41_v62  ;;  %v312_v16 = vunpack.c.h.bf16 %v336_v57 }
  0x1b   :  { %v212_v13 = vmul.f32 %v304_v55, %v180_v0  ;;  %242 = vst [vmem:[%s683_s4 + $0x98] sm:$0xff] %v210_v8  ;;  %243 = vst [vmem:[%s683_s4 + $0xa0] sm:$0xff] %v211_v9  ;;  %v145_v20 = vmul.f32 %v374_v2, %v42_v4  ;;  %v315_v21 = vunpack.c.l.bf16 %v337_v7  ;;  %v146_v22 = vmul.f32 %v374_v2, %v43_v6 }
  0x1c   :  { %v213_v19 = vmul.f32 %v307_v60, %v181_v10  ;;  %v214_v24 = vmul.f32 %v308_v1, %v182_v14  ;;  %v183_v25 = vadd.f32 %v380_v5, %v144_v15  ;;  %v316_v26 = vunpack.c.h.bf16 %v337_v7 }
  0x1d   :  { %244 = vst [vmem:[%s683_s4 + $0xa8] sm:$0xff] %v212_v13  ;;  %v147_v27 = vmul.f32 %v374_v2, %v44_v12  ;;  %v184_v28 = vadd.f32 %v380_v5, %v145_v20  ;;  %v185_v29 = vadd.f32 %v380_v5, %v146_v22  ;;  %v319_v30 = vunpack.c.l.bf16 %v338_v18 }
  0x1e   :  { %245 = vst [vmem:[%s683_s4 + $0xb0] sm:$0xff] %v213_v19  ;;  %v148_v31 = vmul.f32 %v374_v2, %v45_v17  ;;  %246 = vst [vmem:[%s683_s4 + $0xb8] sm:$0xff] %v214_v24  ;;  %v215_v34 = vmul.f32 %v311_v11, %v183_v25  ;;  %v320_v36 = vunpack.c.h.bf16 %v338_v18  ;;  %v149_v37 = vmul.f32 %v374_v2, %v46_v23 }
  0x1f   :  { %v186_v35 = vadd.f32 %v380_v5, %v147_v27  ;;  %v216_v39 = vmul.f32 %v312_v16, %v184_v28  ;;  %v217_v40 = vmul.f32 %v315_v21, %v185_v29  ;;  %v323_v44 = vunpack.c.l.bf16 %v339_v33 }
  0x20   :  { %v187_v41 = vadd.f32 %v380_v5, %v148_v31  ;;  %247 = vst [vmem:[%s683_s4 + $0xc0] sm:$0xff] %v215_v34  ;;  %v188_v43 = vadd.f32 %v380_v5, %v149_v37  ;;  %v150_v45 = vmul.f32 %v374_v2, %v47_v32  ;;  %v324_v47 = vunpack.c.h.bf16 %v339_v33 }
  0x21   :  { %v218_v42 = vmul.f32 %v316_v26, %v186_v35  ;;  %248 = vst [vmem:[%s683_s4 + $0xc8] sm:$0xff] %v216_v39  ;;  %249 = vst [vmem:[%s683_s4 + $0xd0] sm:$0xff] %v217_v40  ;;  %v151_v48 = vmul.f32 %v374_v2, %v48_v38 }
  0x22   :  { %v219_v46 = vmul.f32 %v319_v30, %v187_v41  ;;  %v220_v49 = vmul.f32 %v320_v36, %v188_v43  ;;  %v189_v50 = vadd.f32 %v380_v5, %v150_v45 }
  0x23   :  { %250 = vst [vmem:[%s683_s4 + $0xd8] sm:$0xff] %v218_v42  ;;  %v190_v51 = vadd.f32 %v380_v5, %v151_v48 }
  0x24   :  { %251 = vst [vmem:[%s683_s4 + $0xe0] sm:$0xff] %v219_v46  ;;  %252 = vst [vmem:[%s683_s4 + $0xe8] sm:$0xff] %v220_v49  ;;  %v221_v52 = vmul.f32 %v323_v44, %v189_v50 }
  0x25   :  { %v222_v53 = vmul.f32 %v324_v47, %v190_v51 }
  0x26   :  { %253 = vst [vmem:[%s683_s4 + $0xf0] sm:$0xff] %v221_v52 }
  0x27   :  { %254 = vst [vmem:[%s683_s4 + $0xf8] sm:$0xff] %v222_v53 }

// kernel: random_cnn_forward.2
= control target key start
LH: loop header
LB: loop body
LE: loop exit
PB: predicated region body
PF: predicated region fallthrough
CT: control target
= control target key end

     0   :  { %12 = vsyncpa [#allocation3], 0  ;;  %s6672_s0 = inlined_call_operand.hbm [shape: f32[2,256,9], index: 0, kind: input, shape index: {}]   ;;  %s6673_s1 = inlined_call_operand.hbm [shape: f32[9,32], index: 1, kind: input, shape index: {}]   ;;  %s6674_s2 = inlined_call_operand.hbm [shape: f32[1,32], index: 2, kind: input, shape index: {}]   ;;  %s6675_s3 = inlined_call_operand.hbm [shape: bf16[9,32,64], index: 3, kind: input, shape index: {}]   ;;  %s6676_s4 = inlined_call_operand.hbm [shape: f32[1,64], index: 4, kind: input, shape index: {}]   ;;  %s6677_s5 = inlined_call_operand.hbm [shape: f32[2,256,64], index: 5, kind: output, shape index: {0}]   ;;  %s6678_s6 = inlined_call_operand.hbm [shape: f32[2,2,64], index: 6, kind: output, shape index: {1}]  }
   0x1   :  { %14 = vsyncpa [#allocation3 + $0x1], 0 }
   0x2   :  { %15 = vsyncpa [#allocation6], 0 }
   0x3   :  { %16 = vsyncpa [#allocation9], 0 }
   0x4   :  { %17 = vsyncpa [#allocation4], 0 }
   0x5   :  { %19 = vsyncpa [#allocation4 + $0x1], 0 }
   0x6   :  { %20 = vsyncpa [#allocation13], 0 }
   0x7   :  { %22 = vsyncpa [#allocation13 + $0x1], 0  ;;  %s5150_s21 = smov 0   ;;  %s5152_s22 = smov 0  }
   0x8   :  { %s5154_s23 = smov 0   ;;  %s5156_s24 = smov 0  }
   0x9 LB: > { %s5171_s25 = sadd.s32 4294967295, %s5097_s24   ;;  %s3674_s26 = sadd.s32 4294967294, %s5097_s24   ;;  %s5097_s24 = sphi %s5156_s24, %s6811_s24   ;;  %s5093_s23 = sphi %s5154_s23, %s6810_s23   ;;  %s5089_s22 = sphi %s5152_s22, %s6809_s22   ;;  %s5085_s21 = sphi %s5150_s21, %s6808_s21  }
   0xa   : > { %p48_p0 = scmp.ne.s32.totalorder %s5089_s22, %s5085_s21  ;;  %p6679_p1 = scmp.eq.s32.totalorder %s5171_s25, 0 }
   0xb   : > { %p162_p3 = scmp.eq.s32.totalorder %s3674_s26, 1  ;;  %p3675_p5 = scmp.ge.s32.totalorder %s5097_s24, 1 }
   0xc   : > { %p5180_p4 = por %p6679_p1, %p48_p0  ;;  %p195_p7 = scmp.lt.s32.totalorder %s5097_s24, 3 }
   0xd   : > { %p5185_p6 = por %p162_p3, %p48_p0  ;;  %s5099_s30 = smov [#allocation5]  }
   0xe   : > { %s6707_s27 = scalar_select %p5180_p4, 1, 0 }
   0xf   : > { %s6708_s28 = scalar_select %p5185_p6, 1, 0 }
  0x10   : > { %p5190_p8 = pnand %p3675_p5, %p195_p7  ;;  %s207_s7 = sshll.u32 %s5099_s30, 4  ;;  %s5194_s7 = int_to_ptr.vmem [resolvable:$true] %s207_s7 }
  0x11   : > { %s5100_s9 = smov [#allocation8]   ;;  %s4849_s13 = scalar_lea.hbm %s6673_s1, 256 }
  0x12   : > { %s6709_s29 = scalar_select %p5190_p8, 1, 0 }
  0x13   : > { %p4752_p9 = pneg %p5190_p8  ;;  %s231_s10 = sshll.u32 %s5100_s9, 4  ;;  %s5205_s10 = int_to_ptr.vmem [resolvable:$true] %s231_s10 }
  0x14   : > { %p4850_p12 = scmp.ne.s32.totalorder %s6673_s1, %s4849_s13  ;;  %p4856_p5 = scmp.lt.u32.totalorder %s4849_s13, %s6673_s1 }
  0x15   : > { %p5201_p11 = pnand %p4752_p9, %p6679_p1 }
  0x17   : > { %p5215_p13 = pneg %p5201_p11 }
  0x19   : > { %p4852_p0 = pnand %p5215_p13, %p4850_p12 }
  0x1b   : > { %p4853_p3 = pneg %p4852_p0 }
  0x1d   : > { %p4858_p7 = pnand %p4856_p5, %p4853_p3 }
  0x1f   : > { %4861 = shalt.err (!%p4858_p7)
}
  0x20   : > { %s4862_s19 = scalar_lea.vmem %s5194_s7, 256  ;;  %p4870_p2 = scmp.lt.s32.totalorder %s5194_s7, %s5194_s7 }
  0x21   : > { %p4863_p9 = scmp.ne.s32.totalorder %s5194_s7, %s4862_s19  ;;  %p4871_p6 = scmp.lt.s32.totalorder %s4862_s19, %s4862_s19 }
  0x23   : > { %p4865_p10 = pnand %p4863_p9, %p5215_p13  ;;  %p4872_p12 = por %p4871_p6, %p4870_p2 }
  0x25   : > { %p4866_p1 = pneg %p4865_p10 }
  0x27   : > { %p4873_p0 = pnand %p4872_p12, %p4866_p1 }
  0x29   : > { %4876 = shalt.err (!%p4873_p0)
}
  0x2a   : > { %s6680_s20 = smov 128   ;;  %s6681_s26 = smov 8  }
  0x2b   : > { %4755 = dma.hbm_to_vmem [thread:$0]  (!%p5201_p11), %s6673_s1, 256, %s5194_s7, [#allocation6], %s6680_s20, %s6680_s20, %s6681_s26  }
  0x2c   : > { %s4877_s13 = scalar_lea.hbm %s6675_s3, 2304 }
  0x2d   : > { %p4878_p1 = scmp.ne.s32.totalorder %s6675_s3, %s4877_s13  ;;  %p4884_p10 = scmp.lt.u32.totalorder %s4877_s13, %s6675_s3 }
  0x2f   : > { %p4880_p2 = pnand %p4878_p1, %p5215_p13 }
  0x31   : > { %p4881_p6 = pneg %p4880_p2 }
  0x33   : > { %p4886_p3 = pnand %p4884_p10, %p4881_p6 }
  0x35   : > { %4889 = shalt.err (!%p4886_p3)
}
  0x36   : > { %s4890_s7 = scalar_lea.vmem %s5205_s10, 2304  ;;  %p4898_p12 = scmp.lt.s32.totalorder %s5205_s10, %s5205_s10 }
  0x37   : > { %p4891_p5 = scmp.ne.s32.totalorder %s5205_s10, %s4890_s7  ;;  %p4899_p0 = scmp.lt.s32.totalorder %s4890_s7, %s4890_s7 }
  0x39   : > { %p4893_p7 = pnand %p4891_p5, %p5215_p13  ;;  %p4900_p1 = por %p4899_p0, %p4898_p12 }
  0x3b   : > { %p4894_p9 = pneg %p4893_p7 }
  0x3d   : > { %p4901_p2 = pnand %p4900_p1, %p4894_p9 }
  0x3f   : > { %4904 = shalt.err (!%p4901_p2)
}
  0x40   : > { %s5103_s19 = smov 64   ;;  %s5104_s30 = smov 4  }
  0x41   : > { %4761 = dma.hbm_to_vmem [thread:$0]  (!%p5201_p11), %s6675_s3, 2304, %s5205_s10, [#allocation9], %s5103_s19, %s5103_s19, %s5104_s30  }
  0x42   : > { %s5105_s12 = smov [#allocation7]   ;;  %s5106_s14 = smov [#allocation10]  }
  0x43   : > { %s221_s13 = sshll.u32 %s5105_s12, 4  ;;  %s245_s15 = sshll.u32 %s5106_s14, 4  ;;  %s222_s13 = int_to_ptr.vmem [resolvable:$true] %s221_s13  ;;  %s5262_s15 = int_to_ptr.vmem [resolvable:$true] %s245_s15 }
  0x44   : > { %s4905_s7 = scalar_lea.hbm %s6674_s2, 16 }
  0x45   : > { %p4906_p6 = scmp.ne.s32.totalorder %s6674_s2, %s4905_s7  ;;  %p4912_p5 = scmp.lt.u32.totalorder %s4905_s7, %s6674_s2 }
  0x47   : > { %p4908_p10 = pnand %p4906_p6, %p5215_p13 }
  0x49   : > { %p4909_p3 = pneg %p4908_p10 }
  0x4b   : > { %p4914_p7 = pnand %p4912_p5, %p4909_p3 }
  0x4d   : > { %4917 = shalt.err (!%p4914_p7)
}
  0x4e   : > { %s4918_s19 = scalar_lea.vmem %s222_s13, 16  ;;  %s4925_s30 = scalar_lea.vmem %s222_s13, 32 }
  0x4f   : > { %p4919_p9 = scmp.ne.s32.totalorder %s222_s13, %s4918_s19  ;;  %p4926_p1 = scmp.lt.s32.totalorder %s222_s13, %s222_s13 }
  0x50   : > { %p4927_p2 = scmp.lt.s32.totalorder %s4925_s30, %s4918_s19 }
  0x51   : > { %p4921_p12 = pnand %p4919_p9, %p5215_p13 }
  0x52   : > { %p4928_p4 = por %p4927_p2, %p4926_p1 }
  0x53   : > { %p4922_p0 = pneg %p4921_p12 }
  0x55   : > { %p4929_p8 = pnand %p4928_p4, %p4922_p0 }
  0x57   : > { %4932 = shalt.err (!%p4929_p8)
}
  0x58   : > { %4758 = dma.hbm_to_vmem [thread:$0]  (!%p5201_p11), %s6674_s2, 16, %s222_s13, [#allocation6]  }
  0x59   : > { %s4933_s14 = scalar_lea.hbm %s6676_s4, 16 }
  0x5a   : > { %p4934_p6 = scmp.ne.s32.totalorder %s6676_s4, %s4933_s14  ;;  %p4940_p4 = scmp.lt.u32.totalorder %s4933_s14, %s6676_s4 }
  0x5c   : > { %p4936_p10 = pnand %p4934_p6, %p5215_p13 }
  0x5e   : > { %p4937_p3 = pneg %p4936_p10 }
  0x60   : > { %p4942_p8 = pnand %p4940_p4, %p4937_p3 }
  0x62   : > { %4945 = shalt.err (!%p4942_p8)
}
  0x63   : > { %s4946_s13 = scalar_lea.vmem %s5262_s15, 16  ;;  %s4953_s10 = scalar_lea.vmem %s5262_s15, 32 }
  0x64   : > { %p4947_p5 = scmp.ne.s32.totalorder %s5262_s15, %s4946_s13  ;;  %p4954_p12 = scmp.lt.s32.totalorder %s5262_s15, %s5262_s15 }
  0x65   : > { %p4955_p0 = scmp.lt.s32.totalorder %s4953_s10, %s4946_s13 }
  0x66   : > { %p4949_p7 = pnand %p4947_p5, %p5215_p13 }
  0x67   : > { %p4956_p1 = por %p4955_p0, %p4954_p12 }
  0x68   : > { %p4950_p9 = pneg %p4949_p7 }
  0x6a   : > { %p4957_p2 = pnand %p4956_p1, %p4950_p9 }
  0x6c   : > { %4960 = shalt.err (!%p4957_p2)
}
  0x6d   : > { %4764 = dma.hbm_to_vmem [thread:$0]  (!%p5201_p11), %s6676_s4, 16, %s5262_s15, [#allocation9]  }
  0x6e   : > { %s5307_s16 = sadd.s32 1, %s5097_s24   ;;  %s35_s20 = sadd.s32 1, %s5093_s23 }
  0x6f   : > { %s32_s8 = ssub.s32 %s5097_s24, %s5307_s16  ;;  %p42_p6 = scmp.ne.s32.totalorder %s5093_s23, %s5089_s22 }
  0x70   : > { %p33_p13 = scmp.eq.s32.totalorder %s32_s8, 0  ;;  %p43_p10 = scmp.eq.s32.totalorder %s5097_s24, 0 }
  0x71   : > { %p6712_p4 = scmp.eq.s32.totalorder %s5171_s25, 1  ;;  %p4780_p5 = scmp.lt.s32.totalorder %s5097_s24, 2 }
  0x72   : > { %s5316_s26 = scalar_select %p33_p13, %s5093_s23, %s35_s20  }
  0x73   : > { %p44_p3 = por %p43_p10, %p42_p6  ;;  %p5320_p8 = por %p6712_p4, %p42_p6 }
  0x74   : > { %s256_s12 = sand.u32 1, %s5093_s23   ;;  %s3894_s15 = sshll.u32 %s5097_s24, 12 }
  0x75   : > { %s3681_s14 = sshll.u32 %s256_s12, 8  ;;  %s5330_s7 = scalar_lea.hbm %s6672_s0, %s3894_s15 }
  0x76   : > { %s260_s9 = scalar_lea.vmem [#allocation2], %s3681_s14  ;;  %p5334_p11 = pnand %p4780_p5, %p44_p3 }
  0x77   : > { %s267_s13 = sshll.u32 %s260_s9, 4  ;;  %s5338_s19 = scalar_lea.sflag [#allocation3], %s256_s12  ;;  %s5332_s13 = int_to_ptr.vmem [resolvable:$true] %s267_s13 }
  0x78   : > { %s4961_s30 = scalar_lea.hbm %s5330_s7, 4096  ;;  %p4963_p9 = pneg %p5334_p11 }
  0x79   : > { %p4962_p7 = scmp.ne.s32.totalorder %s5330_s7, %s4961_s30  ;;  %s4966_s14 = scalar_lea.hbm %s6672_s0, 8192 }
  0x7a   : > { %p4967_p1 = scmp.lt.u32.totalorder %s5330_s7, %s6672_s0  ;;  %p4968_p2 = scmp.lt.u32.totalorder %s4966_s14, %s4961_s30 }
  0x7b   : > { %p4964_p12 = pnand %p4963_p9, %p4962_p7  ;;  %p4970_p6 = scmp.lt.u32.totalorder %s4961_s30, %s5330_s7 }
  0x7c   : > { %p4969_p13 = por %p4968_p2, %p4967_p1 }
  0x7d   : > { %p4965_p0 = pneg %p4964_p12 }
  0x7e   : > { %p4971_p10 = por %p4970_p6, %p4969_p13 }
  0x80   : > { %p4972_p3 = pnand %p4971_p10, %p4965_p0 }
  0x82   : > { %4975 = shalt.err (!%p4972_p3)
}
  0x83   : > { %s4976_s12 = scalar_lea.vmem %s5332_s13, 4096  ;;  %s5107_s18 = smov [#allocation2]  }
  0x84   : > { %p4977_p4 = scmp.ne.s32.totalorder %s5332_s13, %s4976_s12  ;;  %s4981_s9 = sshll.u32 %s5107_s18, 4  ;;  %s4982_s9 = int_to_ptr.vmem [resolvable:$false] %s4981_s9 }
  0x85   : > { %s4983_s8 = scalar_lea.vmem %s4982_s9, 8192  ;;  %p4984_p12 = scmp.lt.s32.totalorder %s5332_s13, %s4982_s9 }
  0x86   : > { %p4979_p5 = pnand %p4977_p4, %p4963_p9  ;;  %p4985_p1 = scmp.lt.s32.totalorder %s4983_s8, %s4976_s12 }
  0x88   : > { %p4980_p7 = pneg %p4979_p5  ;;  %p4986_p2 = por %p4985_p1, %p4984_p12 }
  0x8a   : > { %p4987_p13 = pnand %p4986_p2, %p4980_p7 }
  0x8c   : > { %4990 = shalt.err (!%p4987_p13)
}
  0x8d   : > { %s6715_s30 = smov 8   ;;  %s6716_s20 = smov 128  }
  0x8e   : > { %4768 = dma.hbm_to_vmem [thread:$0]  (!%p5334_p11), %s5330_s7, 4096, %s5332_s13, %s5338_s19, %s6716_s20, %s6716_s20, %s6715_s30  }
  0x8f   : > { %p6717_p9 = scmp.ne.s32.totalorder %s6709_s29, 0 }
  0x91   : > { %279 = sbr.rel (%p6717_p9) target bundleno = 1005 (0x3ed), region = 40 }
  0x98   : > { %s5372_s14 = sand.u32 1, %s5089_s22   ;;  %p6718_p0 = scmp.ne.s32.totalorder %s6707_s27, 0 }
  0x99   : > { %s3685_s15 = sshll.u32 %s5372_s14, 8  ;;  %s282_s17 = scalar_lea.sflag [#allocation3], %s5372_s14 }
  0x9a   : > { %s5378_s10 = scalar_lea.vmem [#allocation2], %s3685_s15 }
  0x9b   : > { %5064 = dma.done.wait (%p6718_p0), %s282_s17, 4096  }
  0x9c   : > { %5066 = vsyncadd (%p6718_p0), %s282_s17, 4294963200  ;;  %p6719_p11 = scmp.eq.s32.totalorder %s5171_s25, 0 }
  0x9e   : > { %5068 = dma.done.wait (%p6719_p11), [#allocation6], 272   ;;  %p6720_p6 = pmov %p6719_p11 }
  0xa0   : > { %5070 = vsyncadd (%p6720_p6), [#allocation6], 4294967024  ;;  %p6721_p10 = pmov %p6720_p6 }
  0xa1   : > { %p6722_p3 = pmov %p6720_p6 }
  0xa2   : > { %5072 = dma.done.wait (%p6721_p10), [#allocation9], 2320  }
  0xa3   : > { %5074 = vsyncadd (%p6722_p3), [#allocation9], 4294964976  ;;  %vm474_vm0 = vcmask 1040384   ;;  %vm377_vm1 = vcmask 72704   ;;  %vm5108_vm2 = vmmov 1   ;;  %v368_v0 = vld [vmem:[#allocation5] sm:$0xff] }
  0xa4   : > { %vm4469_vm3 = vmpackc.low %vm474_vm0, %vm5108_vm2  ;;  %v369_v1 = vld [vmem:[#allocation5 + $0x8] sm:$0x1]  ;;  %v336_v2 = vld [vmem:[%s5378_s10] sm:$0xff]  ;;  %v6684_v38 = vmov 0.0   ;;  %vm1152_vm4 = vcmask 261120   ;;  %vm1010_vm9 = vcmask 1046528  }
  0xa5   : > { %v4468_v3 = vpack.c.bf16 %v369_v1, %v368_v0  ;;  %4096 = vmatprep.mubr.msk.f32.mxu0 %vm377_vm1, %v336_v2  ;;  %v337_v4 = vld [vmem:[%s5378_s10 + $0x8] sm:$0xff]  ;;  %v338_v5 = vld [vmem:[%s5378_s10 + $0x10] sm:$0xff]  ;;  %v339_v6 = vld [vmem:[%s5378_s10 + $0x18] sm:$0xff]  ;;  %v1011_v39 = vrot.slane %v6684_v38, 1  ;;  %vm1583_vm13 = vcmask 1045504   ;;  %s6403_s27 = scalar_lea.vmem [#allocation11], %s3685_s15 }
  0xa6   : > { %v340_v7 = vld [vmem:[%s5378_s10 + $0x20] sm:$0xff]  ;;  %v341_v8 = vld [vmem:[%s5378_s10 + $0x28] sm:$0xff]  ;;  %v342_v9 = vld [vmem:[%s5378_s10 + $0x30] sm:$0xff]  ;;  %s3895_s29 = sshll.u32 %s5171_s25, 12  ;;  %s3518_s7 = sshll.u32 %s6403_s27, 4  ;;  %s6582_s7 = int_to_ptr.vmem [resolvable:$true] %s3518_s7 }
  0xa7   : > { %4470 = vmatprep.subr.msk.bf16.mxu0 %vm4469_vm3, %v4468_v3  ;;  %v343_v10 = vld [vmem:[%s5378_s10 + $0x38] sm:$0xff]  ;;  %v344_v11 = vld [vmem:[%s5378_s10 + $0x40] sm:$0xff]  ;;  %v345_v12 = vld [vmem:[%s5378_s10 + $0x48] sm:$0xff]  ;;  %v5458_v40 = vpack.c.bf16 %v1011_v39, %v1011_v39  ;;  %s6580_s12 = scalar_lea.hbm %s6677_s5, %s3895_s29  ;;  %s3500_s18 = scalar_lea.sflag [#allocation4], %s5372_s14 }
  0xa8   : > { %4473 = vmatpush3.bf16.msk.msra.mxu0 %vm4469_vm3, %v4468_v3  ;;  %v346_v13 = vld [vmem:[%s5378_s10 + $0x50] sm:$0xff]  ;;  %v347_v14 = vld [vmem:[%s5378_s10 + $0x58] sm:$0xff]  ;;  %v348_v15 = vld [vmem:[%s5378_s10 + $0x60] sm:$0xff]  ;;  %s4991_s9 = scalar_lea.vmem %s6582_s7, 4096  ;;  %s5111_s8 = smov [#allocation11]  }
  0xa9   : > { %v349_v16 = vld [vmem:[%s5378_s10 + $0x68] sm:$0xff]  ;;  %v350_v17 = vld [vmem:[%s5378_s10 + $0x70] sm:$0xff]  ;;  %v351_v18 = vld [vmem:[%s5378_s10 + $0x78] sm:$0xff]  ;;  %6723 = vst [vmem:[#allocation19_spill] sm:$0xff] %v5458_v40  ;;  %p4992_p4 = scmp.ne.s32.totalorder %s6582_s7, %s4991_s9  ;;  %s4995_s30 = sshll.u32 %s5111_s8, 4  ;;  %s4996_s30 = int_to_ptr.vmem [resolvable:$false] %s4995_s30 }
  0xaa   : > { %v352_v19 = vld [vmem:[%s5378_s10 + $0x80] sm:$0xff]  ;;  %v353_v20 = vld [vmem:[%s5378_s10 + $0x88] sm:$0xff]  ;;  %v354_v21 = vld [vmem:[%s5378_s10 + $0x90] sm:$0xff]  ;;  %s4997_s20 = scalar_lea.vmem %s4996_s30, 8192  ;;  %p4998_p12 = scmp.lt.s32.totalorder %s6582_s7, %s4996_s30 }
  0xab   : > { %4097 = vmatmul.mubr.msk.f32.vlgmr.msra.gmra.mrb[0].mxu0 %vm377_vm1, %v337_v4  ;;  %v355_v22 = vld [vmem:[%s5378_s10 + $0x98] sm:$0xff]  ;;  %v356_v23 = vld [vmem:[%s5378_s10 + $0xa0] sm:$0xff]  ;;  %v357_v24 = vld [vmem:[%s5378_s10 + $0xa8] sm:$0xff]  ;;  %p4993_p5 = pnand %p4992_p4, %p5320_p8  ;;  %p4999_p1 = scmp.lt.s32.totalorder %s4997_s20, %s4991_s9 }
  0xac   : > { %4099 = vmatprep.mubr.msk.f32.mxu0 %vm377_vm1, %v338_v5  ;;  %v358_v25 = vld [vmem:[%s5378_s10 + $0xb0] sm:$0xff]  ;;  %v359_v26 = vld [vmem:[%s5378_s10 + $0xb8] sm:$0xff]  ;;  %v360_v27 = vld [vmem:[%s5378_s10 + $0xc0] sm:$0xff] }
  0xad   : > { %v361_v28 = vld [vmem:[%s5378_s10 + $0xc8] sm:$0xff]  ;;  %v362_v29 = vld [vmem:[%s5378_s10 + $0xd0] sm:$0xff]  ;;  %v363_v30 = vld [vmem:[%s5378_s10 + $0xd8] sm:$0xff]  ;;  %p4994_p7 = pneg %p4993_p5  ;;  %p5000_p2 = por %p4999_p1, %p4998_p12 }
  0xae   : > { %v364_v31 = vld [vmem:[%s5378_s10 + $0xe0] sm:$0xff]  ;;  %v365_v32 = vld [vmem:[%s5378_s10 + $0xe8] sm:$0xff]  ;;  %v366_v33 = vld [vmem:[%s5378_s10 + $0xf0] sm:$0xff] }
  0xaf   : > { %4100 = vmatmul.mubr.msk.f32.gmra.mrb[2].mxu0 %vm377_vm1, %v339_v6  ;;  %v367_v34 = vld [vmem:[%s5378_s10 + $0xf8] sm:$0xff]  ;;  %v4831_v35 = vld [vmem:[#allocation8 + $0x10] sm:$0xff]   ;;  %v4833_v37 = vld [vmem:[#allocation8 + $0x18] sm:$0xff]   ;;  %p5001_p13 = pnand %p5000_p2, %p4994_p7 }
  0xb0   : > { %4102 = vmatprep.mubr.msk.f32.mxu0 %vm377_vm1, %v340_v7  ;;  %4144 = vmatprep.subr.bf16.mxu0 %v4831_v35  ;;  %v4832_v36 = vld [vmem:[#allocation8 + $0x40] sm:$0xff]   ;;  %v4834_v41 = vld [vmem:[#allocation8 + $0x48] sm:$0xff]   ;;  %v5462_v42 = vld [vmem:[#allocation8 + $0x50] sm:$0xff]  }
  0xb1   : > { %4145 = vmatpush3.bf16.msra.mxu0 %v4831_v35  ;;  %4288 = vmatprep.subr.bf16.mxu1 %v4832_v36  ;;  %v4837_v43 = vld [vmem:[#allocation8] sm:$0xff]   ;;  %v5465_v44 = vld [vmem:[#allocation7] ss:$0 sm:$0xff] }
  0xb2   : > { %4146 = vmatprep.subr.bf16.mxu0 %v4833_v37  ;;  %4289 = vmatpush3.bf16.msra.mxu1 %v4832_v36 }
  0xb3   : > { %4103 = vmatmul.mubr.msk.f32.gmra.mrb[4].mxu0 %vm377_vm1, %v341_v8  ;;  %4290 = vmatprep.subr.bf16.mxu1 %v4834_v41 }
  0xb4   : > { %4105 = vmatprep.mubr.msk.f32.mxu0 %vm377_vm1, %v342_v9 }
  0xb5   : > { %4147 = vmatpush3.bf16.msra.mxu0 %v4833_v37 }
  0xb6   : > { %4291 = vmatpush3.bf16.msra.mxu1 %v4834_v41  ;;  %4180 = vmatprep.subr.bf16.mxu0 %v4837_v43 }
  0xb7   : > { %4106 = vmatmul.mubr.msk.f32.gmra.mrb[6].mxu0 %vm377_vm1, %v343_v10  ;;  %4324 = vmatprep.subr.bf16.mxu1 %v5462_v42 }
  0xb8   : > { %4108 = vmatprep.mubr.msk.f32.mxu0 %vm377_vm1, %v344_v11 }
  0xbb   : > { %4109 = vmatmul.mubr.msk.f32.gmra.mrb[8].mxu0 %vm377_vm1, %v345_v12 }
  0xbc   : > { %4111 = vmatprep.mubr.msk.f32.mxu0 %vm377_vm1, %v346_v13 }
  0xbf   : > { %4112 = vmatmul.mubr.msk.f32.gmra.mrb[10].mxu0 %vm377_vm1, %v347_v14 }
  0xc0   : > { %4114 = vmatprep.mubr.msk.f32.mxu0 %vm377_vm1, %v348_v15 }
  0xc3   : > { %4115 = vmatmul.mubr.msk.f32.gmra.mrb[12].mxu0 %vm377_vm1, %v349_v16 }
  0xc4   : > { %4117 = vmatprep.mubr.msk.f32.mxu0 %vm377_vm1, %v350_v17 }
  0xc7   : > { %4118 = vmatmul.mubr.msk.f32.gmra.mrb[14].mxu0 %vm377_vm1, %v351_v18  ;;  %v4838_v18 = vld [vmem:[#allocation8 + $0x8] sm:$0xff]  }
  0xc8   : > { %4120 = vmatprep.mubr.msk.f32.mxu0 %vm377_vm1, %v352_v19 }
  0xcb   : > { %4121 = vmatmul.mubr.msk.f32.gmra.mrb[16].mxu0 %vm377_vm1, %v353_v20 }
  0xcc   : > { %4123 = vmatprep.mubr.msk.f32.mxu0 %vm377_vm1, %v354_v21 }
  0xcf   : > { %4124 = vmatmul.mubr.msk.f32.gmra.mrb[18].mxu0 %vm377_vm1, %v355_v22 }
  0xd0   : > { %4126 = vmatprep.mubr.msk.f32.mxu0 %vm377_vm1, %v356_v23 }
  0xd3   : > { %4127 = vmatmul.mubr.msk.f32.gmra.mrb[20].mxu0 %vm377_vm1, %v357_v24 }
  0xd4   : > { %4129 = vmatprep.mubr.msk.f32.mxu0 %vm377_vm1, %v358_v25 }
  0xd7   : > { %4130 = vmatmul.mubr.msk.f32.gmra.mrb[22].mxu0 %vm377_vm1, %v359_v26 }
  0xd8   : > { %4132 = vmatprep.mubr.msk.f32.mxu0 %vm377_vm1, %v360_v27 }
  0xdb   : > { %4133 = vmatmul.mubr.msk.f32.gmra.mrb[24].mxu0 %vm377_vm1, %v361_v28 }
  0xdc   : > { %4135 = vmatprep.mubr.msk.f32.mxu0 %vm377_vm1, %v362_v29 }
  0xdf   : > { %4136 = vmatmul.mubr.msk.f32.gmra.mrb[26].mxu0 %vm377_vm1, %v363_v30 }
  0xe0   : > { %4138 = vmatprep.mubr.msk.f32.mxu0 %vm377_vm1, %v364_v31 }
  0xe3   : > { %4139 = vmatmul.mubr.msk.f32.gmra.mrb[28].mxu0 %vm377_vm1, %v365_v32 }
  0xe4   : > { %4141 = vmatprep.mubr.msk.f32.mxu0 %vm377_vm1, %v366_v33 }
  0xe7   : > { %4142 = vmatmul.mubr.msk.f32.gmra.mrb[30].mxu0 %vm377_vm1, %v367_v34 }
  0xe8   : > { %4148 = vmatprep.mubr.msk.bf16.mxu0 %vm1152_vm4, %v5458_v40 }
 0x17e   : > { %v4098_v45 = vpop.f32.mrb[0].mxu0 }
 0x17f   : > { %v550_v46 = vadd.f32 %v4098_v45, %v5465_v44  ;;  %v544_v47 = vpop.f32.mrb[1].mxu0 }
 0x180   : > { %v545_v48 = vadd.f32 %v5465_v44, %v544_v47 }
 0x181   : > { %vm704_vm5 = vcmp.ge.f32.partialorder %v550_v46, 0.0  ;;  %v736_v49 = vmul.f32 0.2, %v550_v46 }
 0x182   : > { %vm703_vm6 = vcmp.ge.f32.partialorder %v545_v48, 0.0  ;;  %v735_v50 = vmul.f32 0.2, %v545_v48  ;;  %v4101_v51 = vpop.f32.mrb[2].mxu0 }
 0x183   : > { %v768_v52 = vsel %vm704_vm5, %v550_v46, %v736_v49  ;;  %v560_v53 = vadd.f32 %v4101_v51, %v5465_v44  ;;  %v554_v54 = vpop.f32.mrb[3].mxu0 }
 0x184   : > { %v832_v55 = vrot.slane %v768_v52, 7  ;;  %v767_v56 = vsel %vm703_vm6, %v545_v48, %v735_v50  ;;  %v555_v57 = vadd.f32 %v5465_v44, %v554_v54 }
 0x185   : > { %v831_v58 = vrot.slane %v767_v56, 7  ;;  %v738_v59 = vmul.f32 0.2, %v560_v53  ;;  %vm706_vm7 = vcmp.ge.f32.partialorder %v560_v53, 0.0 }
 0x186   : > { %v5472_v60 = vsel %vm474_vm0, %v832_v55, 0.0  ;;  %vm705_vm8 = vcmp.ge.f32.partialorder %v555_v57, 0.0  ;;  %v737_v61 = vmul.f32 0.2, %v555_v57  ;;  %v4104_v62 = vpop.f32.mrb[4].mxu0 }
 0x187   : > { %v1016_v63 = vrot.slane %v5472_v60, 1  ;;  %v5476_v0 = vsel %vm474_vm0, %v831_v58, %v832_v55  ;;  %v5479_v1 = vsel %vm474_vm0, 0.0, %v831_v58  ;;  %v564_v2 = vpop.f32.mrb[5].mxu0  ;;  %v770_v6 = vsel %vm706_vm7, %v560_v53, %v738_v59 }
 0x188   : > { %v5483_v3 = vpack.c.bf16 %v5476_v0, %v5479_v1  ;;  %v1013_v4 = vrot.slane %v5479_v1, 1  ;;  %v1014_v5 = vrot.slane %v5476_v0, 1  ;;  %v769_v7 = vsel %vm705_vm8, %v555_v57, %v737_v61 }
 0x189   : > { %v570_v8 = vadd.f32 %v4104_v62, %v5465_v44  ;;  %v835_v11 = vrot.slane %v770_v6, 7  ;;  %v834_v12 = vrot.slane %v769_v7, 7  ;;  %v565_v16 = vadd.f32 %v5465_v44, %v564_v2 }
 0x18a   : > { %v1015_v9 = vsel %vm1010_vm9, %v1013_v4, %v1014_v5  ;;  %v1017_v10 = vsel %vm1010_vm9, %v1014_v5, %v1016_v63  ;;  %v4107_v13 = vpop.f32.mrb[6].mxu0 }
 0x18b   : > { %v1120_v14 = vpack.c.bf16 %v1017_v10, %v1015_v9  ;;  %vm708_vm10 = vcmp.ge.f32.partialorder %v570_v8, 0.0  ;;  %v740_v15 = vmul.f32 0.2, %v570_v8  ;;  %v574_v17 = vpop.f32.mrb[7].mxu0  ;;  %v5492_v19 = vsel %vm474_vm0, %v834_v12, %v835_v11 }
 0x18c   : > { %v580_v20 = vadd.f32 %v4107_v13, %v5465_v44  ;;  %v944_v21 = vsel %vm474_vm0, %v835_v11, 0.0  ;;  %vm707_vm11 = vcmp.ge.f32.partialorder %v565_v16, 0.0  ;;  %v739_v25 = vmul.f32 0.2, %v565_v16 }
 0x18d   : > { %4149 = vmatmul.mubr.msk.bf16.vlgmr.msra.gmra.mrb[32].mxu0 %vm1152_vm4, %v1120_v14  ;;  %4292 = vmatprep.mubr.msk.bf16.mxu1 %vm1152_vm4, %v1120_v14  ;;  %v772_v22 = vsel %vm708_vm10, %v570_v8, %v740_v15  ;;  %v575_v27 = vadd.f32 %v5465_v44, %v574_v17  ;;  %v5501_v30 = vsel %vm474_vm0, 0.0, %v834_v12  ;;  %v1021_v32 = vrot.slane %v944_v21, 1 }
 0x18e   : > { %v4110_v23 = vpop.f32.mrb[8].mxu0  ;;  %4181 = vmatpush3.bf16.msra.mxu0 %v4837_v43  ;;  %v838_v24 = vrot.slane %v772_v22, 7  ;;  %vm710_vm12 = vcmp.ge.f32.partialorder %v580_v20, 0.0  ;;  %v742_v26 = vmul.f32 0.2, %v580_v20  ;;  %v771_v31 = vsel %vm707_vm11, %v565_v16, %v739_v25 }
 0x18f   : > { %4182 = vmatprep.subr.bf16.mxu0 %v4838_v18  ;;  %v590_v28 = vadd.f32 %v4110_v23, %v5465_v44  ;;  %v584_v29 = vpop.f32.mrb[9].mxu0  ;;  %v837_v34 = vrot.slane %v771_v31, 7  ;;  %vm709_vm14 = vcmp.ge.f32.partialorder %v575_v27, 0.0  ;;  %v741_v37 = vmul.f32 0.2, %v575_v27 }
 0x190   : > { %v5504_v33 = vsel %vm474_vm0, %v838_v24, 0.0  ;;  %v774_v35 = vsel %vm710_vm12, %v580_v20, %v742_v26  ;;  %v1018_v41 = vrot.slane %v5501_v30, 1  ;;  %v1019_v43 = vrot.slane %v5492_v19, 1  ;;  %v4836_v20 = vld [vmem:[#allocation8 + $0x58] sm:$0xff]  }
 0x191   : > { %vm712_vm15 = vcmp.ge.f32.partialorder %v590_v28, 0.0  ;;  %v744_v39 = vmul.f32 0.2, %v590_v28  ;;  %v5509_v45 = vsel %vm474_vm0, %v837_v34, %v838_v24  ;;  %v585_v46 = vadd.f32 %v5465_v44, %v584_v29 }
 0x192   : > { %v4113_v36 = vpop.f32.mrb[10].mxu0  ;;  %4183 = vmatpush3.bf16.msra.mxu0 %v4838_v18  ;;  %v1594_v48 = vrot.slane %v944_v21, 2  ;;  %v1591_v49 = vrot.slane %v5501_v30, 2  ;;  %v1592_v50 = vrot.slane %v5492_v19, 2  ;;  %v841_v51 = vrot.slane %v774_v35, 7 }
 0x193   : > { %v594_v47 = vpop.f32.mrb[11].mxu0  ;;  %v1026_v52 = vrot.slane %v5504_v33, 1  ;;  %v5516_v53 = vsel %vm474_vm0, 0.0, %v837_v34  ;;  %v773_v54 = vsel %vm709_vm14, %v575_v27, %v741_v37  ;;  %v776_v55 = vsel %vm712_vm15, %v590_v28, %v744_v39 }
 0x194   : > { %v840_v57 = vrot.slane %v773_v54, 7  ;;  %v844_v58 = vrot.slane %v776_v55, 7  ;;  %vm711_vm1 = vcmp.ge.f32.partialorder %v585_v46, 0.0  ;;  %v743_v59 = vmul.f32 0.2, %v585_v46 }
 0x195   : > { %v1020_v62 = vsel %vm1010_vm9, %v1018_v41, %v1019_v43  ;;  %v1022_v63 = vsel %vm1010_vm9, %v1019_v43, %v1021_v32  ;;  %v600_v2 = vadd.f32 %v4113_v36, %v5465_v44  ;;  %v595_v4 = vadd.f32 %v5465_v44, %v594_v47  ;;  %v5564_v41 = vld [vmem:[#allocation8 + $0x60] sm:$0xff]  }
 0x196   : > { %v4116_v56 = vpop.f32.mrb[12].mxu0  ;;  %v1023_v5 = vrot.slane %v5516_v53, 1  ;;  %v1024_v6 = vrot.slane %v5509_v45, 1  ;;  %v5525_v7 = vsel %vm474_vm0, %v840_v57, %v841_v51  ;;  %v775_v8 = vsel %vm711_vm1, %v585_v46, %v743_v59  ;;  %6730 = vst [vmem:[#allocation26_spill] sm:$0xff] %v5564_v41 }
 0x197   : > { %v604_v61 = vpop.f32.mrb[13].mxu0  ;;  %6724 = vst [vmem:[#allocation20_spill] sm:$0xff] %v5525_v7  ;;  %v1593_v10 = vsel %vm1583_vm13, %v1591_v49, %v1592_v50  ;;  %v1595_v11 = vsel %vm1583_vm13, %v1592_v50, %v1594_v48  ;;  %v5531_v12 = vsel %vm474_vm0, %v841_v51, 0.0  ;;  %v5534_v14 = vsel %vm474_vm0, 0.0, %v840_v57  ;;  %v5582_v57 = vld [vmem:[#allocation8 + $0x20] sm:$0xff]  }
 0x198   : > { %6725 = vst [vmem:[#allocation21_spill] sm:$0xff] %v5531_v12  ;;  %6726 = vst [vmem:[#allocation22_spill] sm:$0xff] %v5534_v14  ;;  %v5537_v15 = vsel %vm474_vm0, %v844_v58, 0.0  ;;  %v843_v16 = vrot.slane %v775_v8, 7  ;;  %v5539_v17 = vpack.c.bf16 %v1022_v63, %v1020_v62  ;;  %vm714_vm2 = vcmp.ge.f32.partialorder %v600_v2, 0.0  ;;  %4216 = vmatprep.subr.bf16.mxu0 %v5582_v57 }
 0x199   : > { %6727 = vst [vmem:[#allocation23_spill] sm:$0xff] %v5537_v15  ;;  %v746_v21 = vmul.f32 0.2, %v600_v2  ;;  %vm713_vm3 = vcmp.ge.f32.partialorder %v595_v4, 0.0  ;;  %v745_v22 = vmul.f32 0.2, %v595_v4  ;;  %v1025_v25 = vsel %vm1010_vm9, %v1023_v5, %v1024_v6 }
 0x19a   : > { %v4119_v13 = vpop.f32.mrb[14].mxu0  ;;  %6728 = vst [vmem:[#allocation24_spill] sm:$0xff] %v5539_v17  ;;  %v5542_v23 = vsel %vm474_vm0, %v843_v16, %v844_v58  ;;  %v5545_v24 = vsel %vm474_vm0, 0.0, %v843_v16  ;;  %4152 = vmatprep.mubr.msk.bf16.mxu0 %vm1152_vm4, %v5539_v17  ;;  %4293 = vmatmul.mubr.msk.bf16.vlgmr.msra.gmra.mrb[0].mxu1 %vm1152_vm4, %v5539_v17  ;;  %v1027_v26 = vsel %vm1010_vm9, %v1024_v6, %v1026_v52  ;;  %v1031_v27 = vrot.slane %v5531_v12, 1 }
 0x19b   : > { %v614_v18 = vpop.f32.mrb[15].mxu0  ;;  %v1028_v28 = vrot.slane %v5534_v14, 1  ;;  %v1029_v29 = vrot.slane %v5525_v7, 1  ;;  %v1036_v31 = vrot.slane %v5537_v15, 1  ;;  %4325 = vmatpush3.bf16.msra.mxu1 %v5462_v42  ;;  %v778_v34 = vsel %vm714_vm2, %v600_v2, %v746_v21  ;;  %6731 = vst [vmem:[#allocation27_spill] sm:$0xff] %v5582_v57 }
 0x19c   : > { %v777_v35 = vsel %vm713_vm3, %v595_v4, %v745_v22  ;;  %v5559_v36 = vpack.c.bf16 %v1027_v26, %v1025_v25  ;;  %v610_v37 = vadd.f32 %v4116_v56, %v5465_v44  ;;  %4326 = vmatprep.subr.bf16.mxu1 %v4836_v20  ;;  %v1033_v43 = vrot.slane %v5545_v24, 1 }
 0x19d   : > { %v847_v46 = vrot.slane %v778_v34, 7  ;;  %v846_v47 = vrot.slane %v777_v35, 7  ;;  %v605_v48 = vadd.f32 %v5465_v44, %v604_v61  ;;  %v1034_v42 = vrot.slane %v5542_v23, 1 }
 0x19e   : > { %v4122_v32 = vpop.f32.mrb[16].mxu0  ;;  %6729 = vst [vmem:[#allocation25_spill] sm:$0xff] %v5559_v36  ;;  %4153 = vmatmul.mubr.msk.bf16.gmra.mrb[36].mxu0 %vm1152_vm4, %v5559_v36  ;;  %4296 = vmatprep.mubr.msk.bf16.mxu1 %vm1152_vm4, %v5559_v36  ;;  %vm716_vm5 = vcmp.ge.f32.partialorder %v610_v37, 0.0  ;;  %v748_v49 = vmul.f32 0.2, %v610_v37  ;;  %v620_v50 = vadd.f32 %v4119_v13, %v5465_v44  ;;  %v1030_v54 = vsel %vm1010_vm9, %v1028_v28, %v1029_v29 }
 0x19f   : > { %v5562_v39 = vpop.f32.mrb[17].mxu0  ;;  %v5575_v51 = vsel %vm474_vm0, %v847_v46, 0.0  ;;  %v5578_v52 = vsel %vm474_vm0, %v846_v47, %v847_v46  ;;  %v1032_v55 = vsel %vm1010_vm9, %v1029_v29, %v1031_v27  ;;  %4327 = vmatpush3.bf16.msra.mxu1 %v4836_v20  ;;  %v5586_v61 = vpack.c.bf16 %v1595_v11, %v1593_v10 }
 0x1a0   : > { %vm715_vm6 = vcmp.ge.f32.partialorder %v605_v48, 0.0  ;;  %4360 = vmatprep.subr.bf16.mxu1 %v5564_v41  ;;  %v1041_v63 = vrot.slane %v5575_v51, 1  ;;  %v5593_v2 = vsel %vm474_vm0, 0.0, %v846_v47  ;;  %v780_v4 = vsel %vm716_vm5, %v610_v37, %v748_v49 }
 0x1a1   : > { %6732 = vst [vmem:[#allocation28_spill] sm:$0xff] %v5586_v61  ;;  %v747_v5 = vmul.f32 0.2, %v605_v48  ;;  %v850_v6 = vrot.slane %v780_v4, 7  ;;  %v5597_v8 = vpack.c.bf16 %v1032_v55, %v1030_v54  ;;  %vm718_vm7 = vcmp.ge.f32.partialorder %v620_v50, 0.0 }
 0x1a2   : > { %v4125_v56 = vpop.f32.mrb[18].mxu0  ;;  %v750_v10 = vmul.f32 0.2, %v620_v50  ;;  %v615_v13 = vadd.f32 %v5465_v44, %v614_v18  ;;  %v1035_v16 = vsel %vm1010_vm9, %v1033_v43, %v1034_v42  ;;  %v1037_v20 = vsel %vm1010_vm9, %v1034_v42, %v1036_v31 }
 0x1a3   : > { %v5588_v62 = vpop.f32.mrb[19].mxu0  ;;  %6733 = vst [vmem:[#allocation29_spill] sm:$0xff] %v5597_v8  ;;  %v779_v11 = vsel %vm715_vm6, %v605_v48, %v747_v5  ;;  %v1038_v22 = vrot.slane %v5593_v2, 1  ;;  %4156 = vmatprep.mubr.msk.bf16.mxu0 %vm1152_vm4, %v5597_v8  ;;  %4297 = vmatmul.mubr.msk.bf16.gmra.mrb[4].mxu1 %vm1152_vm4, %v5597_v8  ;;  %v5609_v27 = vpack.c.bf16 %v1037_v20, %v1035_v16  ;;  %v1039_v18 = vrot.slane %v5578_v52, 1 }
 0x1a4   : > { %v849_v25 = vrot.slane %v779_v11, 7  ;;  %v782_v26 = vsel %vm718_vm7, %v620_v50, %v750_v10  ;;  %v5613_v29 = vsel %vm474_vm0, %v850_v6, 0.0  ;;  %vm717_vm8 = vcmp.ge.f32.partialorder %v615_v13, 0.0 }
 0x1a5   : > { %6734 = vst [vmem:[#allocation30_spill] sm:$0xff] %v5609_v27  ;;  %v853_v31 = vrot.slane %v782_v26, 7  ;;  %v749_v37 = vmul.f32 0.2, %v615_v13  ;;  %4300 = vmatprep.mubr.msk.bf16.mxu1 %vm1152_vm4, %v5609_v27  ;;  %v630_v43 = vadd.f32 %v4122_v32, %v5465_v44  ;;  %v1046_v50 = vrot.slane %v5613_v29, 1 }
 0x1a6   : > { %v5602_v21 = vpop.f32.mrb[20].mxu0  ;;  %v5616_v34 = vsel %vm474_vm0, %v849_v25, %v850_v6  ;;  %v5619_v35 = vsel %vm474_vm0, 0.0, %v849_v25  ;;  %4157 = vmatmul.mubr.msk.bf16.gmra.mrb[40].mxu0 %vm1152_vm4, %v5609_v27  ;;  %v625_v10 = vadd.f32 %v5465_v44, %v5562_v39  ;;  %v1040_v16 = vsel %vm1010_vm9, %v1038_v22, %v1039_v18 }
 0x1a7   : > { %v644_v28 = vpop.f32.mrb[21].mxu0  ;;  %v781_v54 = vsel %vm717_vm8, %v615_v13, %v749_v37  ;;  %vm720_vm10 = vcmp.ge.f32.partialorder %v630_v43, 0.0  ;;  %v752_v55 = vmul.f32 0.2, %v630_v43  ;;  %v1043_v5 = vrot.slane %v5619_v35, 1 }
 0x1a8   : > { %v5637_v32 = vsel %vm474_vm0, %v853_v31, 0.0  ;;  %v852_v6 = vrot.slane %v781_v54, 7  ;;  %v1042_v20 = vsel %vm1010_vm9, %v1039_v18, %v1041_v63  ;;  %v640_v13 = vadd.f32 %v4125_v56, %v5465_v44 }
 0x1a9   : > { %v784_v11 = vsel %vm720_vm10, %v630_v43, %v752_v55  ;;  %v1044_v25 = vrot.slane %v5616_v34, 1  ;;  %vm719_vm11 = vcmp.ge.f32.partialorder %v625_v10, 0.0  ;;  %v1051_v56 = vrot.slane %v5637_v32, 1 }
 0x1aa   : > { %v5630_v49 = vpop.f32.mrb[22].mxu0  ;;  %v5646_v26 = vsel %vm474_vm0, %v852_v6, %v853_v31  ;;  %v5649_v37 = vsel %vm474_vm0, 0.0, %v852_v6  ;;  %v856_v38 = vrot.slane %v784_v11, 7  ;;  %v751_v18 = vmul.f32 0.2, %v625_v10 }
 0x1ab   : > { %v5633_v4 = vpop.f32.mrb[23].mxu0  ;;  %v5659_v31 = vpack.c.bf16 %v1042_v20, %v1040_v16  ;;  %vm722_vm12 = vcmp.ge.f32.partialorder %v640_v13, 0.0  ;;  %v1048_v55 = vrot.slane %v5649_v37, 1  ;;  %v1049_v6 = vrot.slane %v5646_v26, 1 }
 0x1ac   : > { %v754_v11 = vmul.f32 0.2, %v640_v13  ;;  %v635_v42 = vadd.f32 %v5465_v44, %v5588_v62  ;;  %v5666_v39 = vsel %vm474_vm0, %v856_v38, 0.0  ;;  %v783_v22 = vsel %vm719_vm11, %v625_v10, %v751_v18 }
 0x1ad   : > { %6735 = vst [vmem:[#allocation31_spill] sm:$0xff] %v5659_v31  ;;  %4160 = vmatprep.mubr.msk.bf16.mxu0 %vm1152_vm4, %v5659_v31  ;;  %4301 = vmatmul.mubr.msk.bf16.gmra.mrb[8].mxu1 %vm1152_vm4, %v5659_v31  ;;  %v1045_v16 = vsel %vm1010_vm9, %v1043_v5, %v1044_v25  ;;  %v1047_v20 = vsel %vm1010_vm9, %v1044_v25, %v1046_v50  ;;  %v855_v46 = vrot.slane %v783_v22, 7 }
 0x1ae   : > { %v5651_v54 = vpop.f32.mrb[24].mxu0  ;;  %v786_v47 = vsel %vm722_vm12, %v640_v13, %v754_v11  ;;  %vm721_vm14 = vcmp.ge.f32.partialorder %v635_v42, 0.0  ;;  %v753_v62 = vmul.f32 0.2, %v635_v42  ;;  %v5678_v10 = vpack.c.bf16 %v1047_v20, %v1045_v16 }
 0x1af   : > { %v5656_v63 = vpop.f32.mrb[25].mxu0  ;;  %v859_v9 = vrot.slane %v786_v47, 7  ;;  %v650_v18 = vadd.f32 %v5602_v21, %v5465_v44  ;;  %v645_v58 = vadd.f32 %v5465_v44, %v644_v28  ;;  %v5684_v5 = vsel %vm474_vm0, %v855_v46, %v856_v38 }
 0x1b0   : > { %6736 = vst [vmem:[#allocation32_spill] sm:$0xff] %v5678_v10  ;;  %v5687_v50 = vsel %vm474_vm0, 0.0, %v855_v46  ;;  %v785_v25 = vsel %vm721_vm14, %v635_v42, %v753_v62  ;;  %v1050_v13 = vsel %vm1010_vm9, %v1048_v55, %v1049_v6  ;;  %v1056_v16 = vrot.slane %v5666_v39, 1  ;;  %4161 = vmatmul.mubr.msk.bf16.gmra.mrb[44].mxu0 %vm1152_vm4, %v5678_v10  ;;  %4304 = vmatprep.mubr.msk.bf16.mxu1 %vm1152_vm4, %v5678_v10 }
 0x1b1   : > { %v5701_v21 = vsel %vm474_vm0, %v859_v9, 0.0  ;;  %v858_v28 = vrot.slane %v785_v25, 7  ;;  %vm724_vm15 = vcmp.ge.f32.partialorder %v650_v18, 0.0  ;;  %v756_v46 = vmul.f32 0.2, %v650_v18 }
 0x1b2   : > { %v5674_v43 = vpop.f32.mrb[26].mxu0  ;;  %v1053_v55 = vrot.slane %v5687_v50, 1  ;;  %v1054_v20 = vrot.slane %v5684_v5, 1  ;;  %vm723_vm1 = vcmp.ge.f32.partialorder %v645_v58, 0.0  ;;  %v755_v62 = vmul.f32 0.2, %v645_v58 }
 0x1b3   : > { %v5676_v48 = vpop.f32.mrb[27].mxu0  ;;  %v5708_v22 = vsel %vm474_vm0, %v858_v28, %v859_v9  ;;  %v5711_v47 = vsel %vm474_vm0, 0.0, %v858_v28  ;;  %v788_v11 = vsel %vm724_vm15, %v650_v18, %v756_v46  ;;  %v1052_v59 = vsel %vm1010_vm9, %v1049_v6, %v1051_v56 }
 0x1b4   : > { %v1061_v40 = vrot.slane %v5701_v21, 1  ;;  %v1058_v10 = vrot.slane %v5711_v47, 1  ;;  %v1059_v31 = vrot.slane %v5708_v22, 1  ;;  %v862_v8 = vrot.slane %v788_v11, 7 }
 0x1b5   : > { %v787_v36 = vsel %vm723_vm1, %v645_v58, %v755_v62  ;;  %v5720_v9 = vpack.c.bf16 %v1052_v59, %v1050_v13  ;;  %v660_v28 = vadd.f32 %v5630_v49, %v5465_v44  ;;  %v655_v6 = vadd.f32 %v5465_v44, %v5633_v4 }
 0x1b6   : > { %v5698_v38 = vpop.f32.mrb[28].mxu0  ;;  %v861_v56 = vrot.slane %v787_v36, 7  ;;  %v1055_v46 = vsel %vm1010_vm9, %v1053_v55, %v1054_v20  ;;  %v1057_v25 = vsel %vm1010_vm9, %v1054_v20, %v1056_v16  ;;  %v5731_v17 = vsel %vm474_vm0, %v862_v8, 0.0 }
 0x1b7   : > { %v5703_v42 = vpop.f32.mrb[29].mxu0  ;;  %6737 = vst [vmem:[#allocation33_spill] sm:$0xff] %v5720_v9  ;;  %4164 = vmatprep.mubr.msk.bf16.mxu0 %vm1152_vm4, %v5720_v9  ;;  %4305 = vmatmul.mubr.msk.bf16.gmra.mrb[12].mxu1 %vm1152_vm4, %v5720_v9  ;;  %vm726_vm2 = vcmp.ge.f32.partialorder %v660_v28, 0.0  ;;  %v758_v58 = vmul.f32 0.2, %v660_v28  ;;  %v5737_v59 = vpack.c.bf16 %v1057_v25, %v1055_v46  ;;  %v1066_v55 = vrot.slane %v5731_v17, 1 }
 0x1b8   : > { %v5743_v13 = vsel %vm474_vm0, %v861_v56, %v862_v8  ;;  %v5749_v20 = vsel %vm474_vm0, 0.0, %v861_v56  ;;  %vm725_vm3 = vcmp.ge.f32.partialorder %v655_v6, 0.0  ;;  %v757_v25 = vmul.f32 0.2, %v655_v6 }
 0x1b9   : > { %6738 = vst [vmem:[#allocation34_spill] sm:$0xff] %v5737_v59  ;;  %4165 = vmatmul.mubr.msk.bf16.gmra.mrb[48].mxu0 %vm1152_vm4, %v5737_v59  ;;  %4308 = vmatprep.mubr.msk.bf16.mxu1 %vm1152_vm4, %v5737_v59  ;;  %v790_v62 = vsel %vm726_vm2, %v660_v28, %v758_v58  ;;  %v670_v8 = vadd.f32 %v5651_v54, %v5465_v44  ;;  %v1063_v54 = vrot.slane %v5749_v20, 1 }
 0x1ba   : > { %v5718_v27 = vpop.f32.mrb[30].mxu0  ;;  %v865_v46 = vrot.slane %v790_v62, 7  ;;  %v665_v4 = vadd.f32 %v5465_v44, %v5656_v63  ;;  %v1060_v11 = vsel %vm1010_vm9, %v1058_v10, %v1059_v31  ;;  %v1062_v56 = vsel %vm1010_vm9, %v1059_v31, %v1061_v40 }
 0x1bb   : > { %v5724_v18 = vpop.f32.mrb[31].mxu0  ;;  %v789_v16 = vsel %vm725_vm3, %v655_v6, %v757_v25  ;;  %vm728_vm5 = vcmp.ge.f32.partialorder %v670_v8, 0.0  ;;  %v760_v36 = vmul.f32 0.2, %v670_v8  ;;  %v5761_v49 = vpack.c.bf16 %v1062_v56, %v1060_v11 }
 0x1bc   : > { %v5764_v28 = vsel %vm474_vm0, %v865_v46, 0.0  ;;  %v864_v58 = vrot.slane %v789_v16, 7  ;;  %vm727_vm6 = vcmp.ge.f32.partialorder %v665_v4, 0.0  ;;  %v759_v59 = vmul.f32 0.2, %v665_v4 }
 0x1bd   : > { %6739 = vst [vmem:[#allocation35_spill] sm:$0xff] %v5761_v49  ;;  %v1064_v62 = vrot.slane %v5743_v13, 1  ;;  %v792_v63 = vsel %vm728_vm5, %v670_v8, %v760_v36  ;;  %4168 = vmatprep.mubr.msk.bf16.mxu0 %vm1152_vm4, %v5761_v49  ;;  %v680_v40 = vadd.f32 %v5674_v43, %v5465_v44  ;;  %v1071_v8 = vrot.slane %v5764_v28, 1 }
 0x1be   : > { %v5773_v31 = vsel %vm474_vm0, %v864_v58, %v865_v46  ;;  %v5776_v10 = vsel %vm474_vm0, 0.0, %v864_v58  ;;  %v868_v6 = vrot.slane %v792_v63, 7  ;;  %v791_v11 = vsel %vm727_vm6, %v665_v4, %v759_v59 }
 0x1bf   : > { %4309 = vmatmul.mubr.msk.bf16.gmra.mrb[16].mxu1 %vm1152_vm4, %v5761_v49  ;;  %v867_v46 = vrot.slane %v791_v11, 7  ;;  %vm730_vm7 = vcmp.ge.f32.partialorder %v680_v40, 0.0  ;;  %v762_v56 = vmul.f32 0.2, %v680_v40  ;;  %v1068_v58 = vrot.slane %v5776_v10, 1 }
 0x1c0   : > { %v5785_v43 = vsel %vm474_vm0, %v868_v6, 0.0  ;;  %v1069_v59 = vrot.slane %v5773_v31, 1  ;;  %v675_v4 = vadd.f32 %v5465_v44, %v5676_v48  ;;  %v1065_v63 = vsel %vm1010_vm9, %v1063_v54, %v1064_v62 }
 0x1c1   : > { %v5793_v16 = vsel %vm474_vm0, %v867_v46, %v868_v6  ;;  %v5796_v36 = vsel %vm474_vm0, 0.0, %v867_v46  ;;  %v794_v25 = vsel %vm730_vm7, %v680_v40, %v762_v56  ;;  %v1067_v11 = vsel %vm1010_vm9, %v1064_v62, %v1066_v55 }
 0x1c2   : > { %v1076_v15 = vrot.slane %v5785_v43, 1  ;;  %v1073_v12 = vrot.slane %v5796_v36, 1  ;;  %v871_v48 = vrot.slane %v794_v25, 7  ;;  %vm729_vm8 = vcmp.ge.f32.partialorder %v675_v4, 0.0 }
 0x1c3   : > { %v761_v54 = vmul.f32 0.2, %v675_v4  ;;  %v5803_v14 = vpack.c.bf16 %v1067_v11, %v1065_v63  ;;  %v690_v6 = vadd.f32 %v5698_v38, %v5465_v44  ;;  %v685_v40 = vadd.f32 %v5465_v44, %v5703_v42 }
 0x1c4   : > { %v1070_v55 = vsel %vm1010_vm9, %v1068_v58, %v1069_v59  ;;  %v1072_v62 = vsel %vm1010_vm9, %v1069_v59, %v1071_v8  ;;  %v5812_v46 = vsel %vm474_vm0, %v871_v48, 0.0  ;;  %v700_v38 = vadd.f32 %v5718_v27, %v5465_v44 }
 0x1c5   : > { %6740 = vst [vmem:[#allocation36_spill] sm:$0xff] %v5803_v14  ;;  %v793_v56 = vsel %vm729_vm8, %v675_v4, %v761_v54  ;;  %4169 = vmatmul.mubr.msk.bf16.gmra.mrb[52].mxu0 %vm1152_vm4, %v5803_v14  ;;  %4312 = vmatprep.mubr.msk.bf16.mxu1 %vm1152_vm4, %v5803_v14  ;;  %v5818_v25 = vpack.c.bf16 %v1072_v62, %v1070_v55  ;;  %v1074_v42 = vrot.slane %v5793_v16, 1  ;;  %v1081_v58 = vrot.slane %v5812_v46, 1 }
 0x1c6   : > { %v870_v8 = vrot.slane %v793_v56, 7  ;;  %vm732_vm10 = vcmp.ge.f32.partialorder %v690_v6, 0.0  ;;  %v764_v59 = vmul.f32 0.2, %v690_v6  ;;  %vm731_vm11 = vcmp.ge.f32.partialorder %v685_v40, 0.0 }
 0x1c7   : > { %6741 = vst [vmem:[#allocation37_spill] sm:$0xff] %v5818_v25  ;;  %v763_v4 = vmul.f32 0.2, %v685_v40  ;;  %4172 = vmatprep.mubr.msk.bf16.mxu0 %vm1152_vm4, %v5818_v25  ;;  %4313 = vmatmul.mubr.msk.bf16.gmra.mrb[20].mxu1 %vm1152_vm4, %v5818_v25  ;;  %vm734_vm12 = vcmp.ge.f32.partialorder %v700_v38, 0.0  ;;  %v766_v11 = vmul.f32 0.2, %v700_v38  ;;  %v695_v54 = vadd.f32 %v5465_v44, %v5724_v18 }
 0x1c8   : > { %v5829_v63 = vsel %vm474_vm0, %v870_v8, %v871_v48  ;;  %v5832_v27 = vsel %vm474_vm0, 0.0, %v870_v8  ;;  %v796_v48 = vsel %vm732_vm10, %v690_v6, %v764_v59  ;;  %v1075_v44 = vsel %vm1010_vm9, %v1073_v12, %v1074_v42 }
 0x1c9   : > { %v1078_v56 = vrot.slane %v5832_v27, 1  ;;  %v1079_v49 = vrot.slane %v5829_v63, 1  ;;  %v795_v25 = vsel %vm731_vm11, %v685_v40, %v763_v4  ;;  %v798_v14 = vsel %vm734_vm12, %v700_v38, %v766_v11 }
 0x1ca   : > { %v874_v8 = vrot.slane %v796_v48, 7  ;;  %v873_v7 = vrot.slane %v795_v25, 7  ;;  %v877_v57 = vrot.slane %v798_v14, 7  ;;  %v765_v41 = vmul.f32 0.2, %v695_v54 }
 0x1cb   : > { %v1077_v18 = vsel %vm1010_vm9, %v1074_v42, %v1076_v15  ;;  %v1080_v62 = vsel %vm1010_vm9, %v1078_v56, %v1079_v49  ;;  %v1082_v55 = vsel %vm1010_vm9, %v1079_v49, %v1081_v58  ;;  %vm733_vm14 = vcmp.ge.f32.partialorder %v695_v54, 0.0 }
 0x1cc   : > { %v5847_v61 = vsel %vm474_vm0, %v874_v8, 0.0  ;;  %v5850_v9 = vsel %vm474_vm0, %v873_v7, %v874_v8  ;;  %v5853_v6 = vsel %vm474_vm0, 0.0, %v873_v7  ;;  %v5863_v42 = vsel %vm474_vm0, %v877_v57, 0.0 }
 0x1cd   : > { %v1086_v12 = vrot.slane %v5847_v61, 1  ;;  %v1083_v15 = vrot.slane %v5853_v6, 1  ;;  %v1084_v40 = vrot.slane %v5850_v9, 1  ;;  %v797_v7 = vsel %vm733_vm14, %v695_v54, %v765_v41 }
 0x1ce   : > { %v5865_v58 = vpack.c.bf16 %v1077_v18, %v1075_v44  ;;  %v5867_v59 = vpack.c.bf16 %v1082_v55, %v1080_v62  ;;  %v876_v11 = vrot.slane %v797_v7, 7  ;;  %v6743_v48 = vrot.slane %v5476_v0, 2 }
 0x1cf   : > { %v1085_v4 = vsel %vm1010_vm9, %v1083_v15, %v1084_v40  ;;  %v1087_v56 = vsel %vm1010_vm9, %v1084_v40, %v1086_v12  ;;  %v6744_v8 = vrot.slane %v5479_v1, 2  ;;  %v6745_v25 = vrot.slane %v5472_v60, 2 }
 0x1d0   : > { %6742 = vst [vmem:[#allocation38_spill] sm:$0xff] %v5867_v59  ;;  %v6746_v38 = vmov %v6743_v48  ;;  %v2185_v55 = vrot.slane %v5863_v42, 1  ;;  %4173 = vmatmul.mubr.msk.bf16.gmra.mrb[56].mxu0 %vm1152_vm4, %v5865_v58  ;;  %4316 = vmatprep.mubr.msk.bf16.mxu1 %vm1152_vm4, %v5865_v58  ;;  %v5887_v62 = vpack.c.bf16 %v1087_v56, %v1085_v4  ;;  %v1646_v60 = vrot.slane %v5796_v36, 2 }
 0x1d1   : > { %v1588_v49 = vsel %vm1583_vm13, %v6744_v8, %v6743_v48  ;;  %v1590_v41 = vsel %vm1583_vm13, %v6746_v38, %v6745_v25  ;;  %v1647_v0 = vrot.slane %v5793_v16, 2  ;;  %v5894_v44 = vsel %vm474_vm0, %v876_v11, %v877_v57  ;;  %4176 = vmatprep.mubr.msk.bf16.mxu0 %vm1152_vm4, %v5867_v59  ;;  %4317 = vmatmul.mubr.msk.bf16.gmra.mrb[24].mxu1 %vm1152_vm4, %v5867_v59 }
 0x1d2   : > { %v5889_v1 = vpack.c.bf16 %v1590_v41, %v1588_v49  ;;  %v5897_v18 = vsel %vm474_vm0, 0.0, %v876_v11  ;;  %v1654_v12 = vrot.slane %v5812_v46, 2  ;;  %v1651_v15 = vrot.slane %v5832_v27, 2  ;;  %4320 = vmatprep.mubr.msk.bf16.mxu1 %vm1152_vm4, %v5887_v62 }
 0x1d3   : > { %v2182_v40 = vrot.slane %v5897_v18, 1  ;;  %v2183_v49 = vrot.slane %v5894_v44, 1  ;;  %v1652_v57 = vrot.slane %v5829_v63, 2  ;;  %v1659_v25 = vrot.slane %v5847_v61, 2 }
 0x1d4   : > { %v6747_v38 = vrot.slane %v5509_v45, 2  ;;  %v6748_v7 = vrot.slane %v5516_v53, 2  ;;  %v6749_v46 = vrot.slane %v5504_v33, 2  ;;  %v1656_v48 = vrot.slane %v5853_v6, 2 }
 0x1d5   : > { %v1657_v8 = vrot.slane %v5850_v9, 2  ;;  %v2184_v41 = vsel %vm1010_vm9, %v2182_v40, %v2183_v49  ;;  %v2186_v61 = vsel %vm1010_vm9, %v2183_v49, %v2185_v55  ;;  %v2406_v54 = vrot.slane %v5863_v42, 2 }
 0x1d6   : > { %v1598_v4 = vsel %vm1583_vm13, %v6748_v7, %v6747_v38  ;;  %v6750_v11 = vmov %v6747_v38  ;;  %v2403_v14 = vrot.slane %v5897_v18, 2  ;;  %v5927_v59 = vpack.c.bf16 %v2186_v61, %v2184_v41 }
 0x1d7   : > { %v1600_v56 = vsel %vm1583_vm13, %v6750_v11, %v6749_v46  ;;  %v5931_v33 = vpack.c.bf16 %v5492_v19, %v5501_v30  ;;  %v5937_v7 = vpack.c.bf16 %v5578_v52, %v5593_v2  ;;  %v6751_v40 = vrot.slane %v5578_v52, 2 }
 0x1d8   : > { %v5933_v38 = vpack.c.bf16 %v1600_v56, %v1598_v4  ;;  %v6752_v55 = vrot.slane %v5593_v2, 2  ;;  %v6753_v49 = vrot.slane %v5575_v51, 2  ;;  %v6755_v30 = vrot.slane %v5616_v34, 2  ;;  %4177 = vmatmul.mubr.msk.bf16.gmra.mrb[60].mxu0 %vm1152_vm4, %v5887_v62 }
 0x1d9   : > { %v6754_v46 = vmov %v6751_v40  ;;  %v6756_v4 = vrot.slane %v5619_v35, 2  ;;  %v6757_v41 = vrot.slane %v5613_v29, 2  ;;  %v5963_v51 = vpack.c.bf16 %v5616_v34, %v5619_v35  ;;  %4321 = vmatmul.mubr.msk.bf16.gmra.mrb[28].mxu1 %vm1152_vm4, %v5927_v59 }
 0x1da   : > { %v1613_v42 = vsel %vm1583_vm13, %v6752_v55, %v6751_v40  ;;  %v1615_v11 = vsel %vm1583_vm13, %v6754_v46, %v6753_v49  ;;  %v6758_v2 = vmov %v6755_v30  ;;  %v5971_v40 = vpack.c.bf16 %v5646_v26, %v5649_v37  ;;  %4328 = vmatprep.mubr.msk.bf16.mxu1 %vm1152_vm4, %v5889_v1 }
 0x1db   : > { %v5949_v19 = vpack.c.bf16 %v1615_v11, %v1613_v42  ;;  %v1618_v56 = vsel %vm1583_vm13, %v6756_v4, %v6755_v30  ;;  %v1620_v61 = vsel %vm1583_vm13, %v6758_v2, %v6757_v41  ;;  %v6759_v55 = vrot.slane %v5646_v26, 2 }
 0x1dc   : > { %v5967_v52 = vpack.c.bf16 %v1620_v61, %v1618_v56  ;;  %v6760_v29 = vrot.slane %v5649_v37, 2  ;;  %v6761_v49 = vrot.slane %v5637_v32, 2  ;;  %v2404_v46 = vrot.slane %v5894_v44, 2 }
 0x1dd   : > { %v6762_v34 = vmov %v6759_v55  ;;  %v5110_v11 = vmov 0.0|0.0   ;;  %v6763_v37 = vrot.slane %v5684_v5, 2  ;;  %v6764_v4 = vrot.slane %v5687_v50, 2 }
 0x1de   : > { %v1623_v42 = vsel %vm1583_vm13, %v6760_v29, %v6759_v55  ;;  %v1625_v35 = vsel %vm1583_vm13, %v6762_v34, %v6761_v49  ;;  %4184 = vmatprep.mubr.bf16.mxu0 %v5110_v11  ;;  %v6765_v26 = vrot.slane %v5666_v39, 2  ;;  %v6005_v61 = vpack.c.bf16 %v5684_v5, %v5687_v50 }
 0x1df   : > { %v5987_v30 = vpack.c.bf16 %v1625_v35, %v1623_v42  ;;  %v1628_v32 = vsel %vm1583_vm13, %v6764_v4, %v6763_v37  ;;  %v6766_v56 = vmov %v6763_v37  ;;  %v6009_v55 = vpack.c.bf16 %v5708_v22, %v5711_v47 }
 0x1e0   : > { %v1630_v41 = vsel %vm1583_vm13, %v6766_v56, %v6765_v26  ;;  %v6767_v29 = vrot.slane %v5708_v22, 2  ;;  %v6768_v39 = vrot.slane %v5711_v47, 2  ;;  %v6769_v49 = vrot.slane %v5701_v21, 2  ;;  %4185 = vmatmul.mubr.msk.bf16.vlgmr.msra.gmra.mrb[32].mxu0 %vm1152_vm4, %v5483_v3 }
 0x1e1   : > { %v6001_v2 = vpack.c.bf16 %v1630_v41, %v1628_v32  ;;  %v6771_v37 = vrot.slane %v5743_v13, 2  ;;  %v6772_v5 = vrot.slane %v5749_v20, 2  ;;  %v6773_v4 = vrot.slane %v5731_v17, 2  ;;  %4188 = vmatprep.mubr.msk.bf16.mxu0 %vm1152_vm4, %v5931_v33 }
 0x1e2   : > { %v1633_v42 = vsel %vm1583_vm13, %v6768_v39, %v6767_v29  ;;  %v6770_v34 = vmov %v6767_v29  ;;  %v6033_v26 = vpack.c.bf16 %v5743_v13, %v5749_v20  ;;  %v6041_v56 = vpack.c.bf16 %v5773_v31, %v5776_v10 }
 0x1e3   : > { %v1635_v35 = vsel %vm1583_vm13, %v6770_v34, %v6769_v49  ;;  %v1638_v50 = vsel %vm1583_vm13, %v6772_v5, %v6771_v37  ;;  %v6774_v32 = vmov %v6771_v37  ;;  %v6775_v41 = vrot.slane %v5773_v31, 2  ;;  %v4840_v5 = vld [vmem:[#allocation8 + $0x68] sm:$0xff]  }
 0x1e4   : > { %v1640_v47 = vsel %vm1583_vm13, %v6774_v32, %v6773_v4  ;;  %v6035_v21 = vpack.c.bf16 %v1635_v35, %v1633_v42  ;;  %v6776_v17 = vrot.slane %v5776_v10, 2  ;;  %v6777_v39 = vrot.slane %v5764_v28, 2  ;;  %v6785_v4 = vld [vmem:[#allocation22_spill] sm:$0xff] }
 0x1e5   : > { %v6037_v22 = vpack.c.bf16 %v1640_v47, %v1638_v50  ;;  %v6778_v49 = vmov %v6775_v41  ;;  %v1648_v20 = vsel %vm1583_vm13, %v1646_v60, %v1647_v0  ;;  %v6779_v42 = vrot.slane %v5785_v43, 2 }
 0x1e6   : > { %v1643_v29 = vsel %vm1583_vm13, %v6776_v17, %v6775_v41  ;;  %v1645_v13 = vsel %vm1583_vm13, %v6778_v49, %v6777_v39  ;;  %v6059_v35 = vpack.c.bf16 %v5793_v16, %v5796_v36  ;;  %v6067_v28 = vpack.c.bf16 %v5829_v63, %v5832_v27  ;;  %v4842_v27 = vld [vmem:[#allocation8 + $0x28] sm:$0xff]   ;;  %v6790_v49 = vld [vmem:[#allocation23_spill] sm:$0xff] }
 0x1e7   : > { %v1650_v34 = vsel %vm1583_vm13, %v1647_v0, %v6779_v42  ;;  %v6061_v37 = vpack.c.bf16 %v1645_v13, %v1643_v29  ;;  %v1653_v31 = vsel %vm1583_vm13, %v1651_v15, %v1652_v57  ;;  %v1655_v60 = vsel %vm1583_vm13, %v1652_v57, %v1654_v12  ;;  %v6787_v41 = vld [vmem:[#allocation21_spill] sm:$0xff]  ;;  %v4845_v29 = vld [vmem:[#allocation8 + $0x30] sm:$0xff]  }
 0x1e8   : > { %v6063_v10 = vpack.c.bf16 %v1650_v34, %v1648_v20  ;;  %v1658_v43 = vsel %vm1583_vm13, %v1656_v48, %v1657_v8  ;;  %v1660_v0 = vsel %vm1583_vm13, %v1657_v8, %v1659_v25  ;;  %v6075_v16 = vpack.c.bf16 %v5850_v9, %v5853_v6  ;;  %v6780_v9 = vld [vmem:[#allocation28_spill] sm:$0xff]  ;;  %v6781_v8 = vld [vmem:[#allocation26_spill] sm:$0xff] }
 0x1e9   : > { %v6079_v36 = vpack.c.bf16 %v1655_v60, %v1653_v31  ;;  %v6081_v63 = vpack.c.bf16 %v1660_v0, %v1658_v43  ;;  %v2405_v15 = vsel %vm1583_vm13, %v2403_v14, %v2404_v46  ;;  %v2407_v12 = vsel %vm1583_vm13, %v2404_v46, %v2406_v54  ;;  %4329 = vmatmul.mubr.msk.bf16.vlgmr.msra.gmra.mrb[0].mxu1 %vm1152_vm4, %v6780_v9  ;;  %v6782_v14 = vld [vmem:[#allocation27_spill] sm:$0xff]  ;;  %v6783_v46 = vld [vmem:[#allocation20_spill] sm:$0xff] }
 0x1ea   : > { %v1606_v57 = vrot.slane %v5545_v24, 2  ;;  %v1607_v25 = vrot.slane %v5542_v23, 2  ;;  %v6091_v6 = vpack.c.bf16 %v2407_v12, %v2405_v15  ;;  %v6095_v48 = vpack.c.bf16 %v5894_v44, %v5897_v18  ;;  %4361 = vmatpush3.bf16.msra.mxu1 %v6781_v8  ;;  %4332 = vmatprep.mubr.msk.bf16.mxu1 %vm1152_vm4, %v5933_v38  ;;  %v4843_v54 = vld [vmem:[#allocation8 + $0x70] sm:$0xff]   ;;  %v4846_v43 = vld [vmem:[#allocation8 + $0x38] sm:$0xff]   ;;  %v4847_v0 = vld [vmem:[#allocation8 + $0x80] sm:$0xff]  }
 0x1eb   : > { %4362 = vmatprep.subr.bf16.mxu1 %v4840_v5  ;;  %4217 = vmatpush3.bf16.msra.mxu0 %v6782_v14  ;;  %v6784_v50 = vrot.slane %v6783_v46, 2  ;;  %v6786_v32 = vrot.slane %v6785_v4, 2  ;;  %v6788_v17 = vrot.slane %v6787_v41, 2  ;;  %v6791_v13 = vrot.slane %v6790_v49, 2  ;;  %v6794_v15 = vld [vmem:[#allocation25_spill] sm:$0xff]  ;;  %v6801_v8 = vld [vmem:[#allocation35_spill] sm:$0xff] }
 0x1ec   : > { %4218 = vmatprep.subr.bf16.mxu0 %v4842_v27  ;;  %v1608_v39 = vsel %vm1583_vm13, %v1606_v57, %v1607_v25  ;;  %v6117_v42 = vpack.c.bf16 %v5509_v45, %v5516_v53  ;;  %v6121_v34 = vpack.c.bf16 %v6783_v46, %v6785_v4  ;;  %v6137_v45 = vpack.c.bf16 %v5542_v23, %v5545_v24  ;;  %v6795_v12 = vld [vmem:[#allocation29_spill] sm:$0xff] }
 0x1ed   : > { %v1603_v47 = vsel %vm1583_vm13, %v6786_v32, %v6784_v50  ;;  %v6789_v44 = vmov %v6784_v50  ;;  %v1610_v20 = vsel %vm1583_vm13, %v1607_v25, %v6791_v13  ;;  %v6792_v53 = vmov 0.0   ;;  %v6799_v57 = vld [vmem:[#allocation33_spill] sm:$0xff]  ;;  %v6800_v25 = vld [vmem:[#allocation34_spill] sm:$0xff] }
 0x1ee   : > { %v1605_v18 = vsel %vm1583_vm13, %v6789_v44, %v6788_v17  ;;  %4363 = vmatpush3.bf16.msra.mxu1 %v4840_v5  ;;  %4189 = vmatmul.mubr.msk.bf16.gmra.mrb[36].mxu0 %vm1152_vm4, %v6117_v42  ;;  %v6127_v60 = vpack.c.bf16 %v1610_v20, %v1608_v39  ;;  %v1584_v23 = vrot.slane %v6792_v53, 2  ;;  %v4844_v5 = vld [vmem:[#allocation8 + $0x78] sm:$0xff]  }
 0x1ef   : > { %v6123_v31 = vpack.c.bf16 %v1605_v18, %v1603_v47  ;;  %4219 = vmatpush3.bf16.msra.mxu0 %v4842_v27  ;;  %4396 = vmatprep.subr.bf16.mxu1 %v4843_v54  ;;  %v4848_v27 = vld [vmem:[#allocation8 + $0x88] sm:$0xff]   ;;  %v6397_v18 = vld [vmem:[#allocation10] ss:$0 sm:$0xff] }
 0x1f0   : > { %4252 = vmatprep.subr.bf16.mxu0 %v4845_v29  ;;  %4192 = vmatprep.mubr.msk.bf16.mxu0 %vm1152_vm4, %v6121_v34  ;;  %v6180_v24 = vpack.c.bf16 %v1584_v23, %v1584_v23 }
 0x1f1   : > { %4333 = vmatmul.mubr.msk.bf16.gmra.mrb[4].mxu1 %vm1152_vm4, %v6123_v31 }
 0x1f2   : > { %4336 = vmatprep.mubr.msk.bf16.mxu1 %vm1152_vm4, %v6127_v60 }
 0x1f6   : > { %4193 = vmatmul.mubr.msk.bf16.gmra.mrb[40].mxu0 %vm1152_vm4, %v6137_v45 }
 0x1f7   : > { %4196 = vmatprep.mubr.msk.bf16.mxu0 %vm1152_vm4, %v5937_v7 }
 0x1f9   : > { %4337 = vmatmul.mubr.msk.bf16.gmra.mrb[8].mxu1 %vm1152_vm4, %v5949_v19 }
 0x1fa   : > { %4340 = vmatprep.mubr.msk.bf16.mxu1 %vm1152_vm4, %v5967_v52 }
 0x1fe   : > { %4197 = vmatmul.mubr.msk.bf16.gmra.mrb[44].mxu0 %vm1152_vm4, %v5963_v51 }
 0x1ff   : > { %4200 = vmatprep.mubr.msk.bf16.mxu0 %vm1152_vm4, %v5971_v40 }
 0x201   : > { %4341 = vmatmul.mubr.msk.bf16.gmra.mrb[12].mxu1 %vm1152_vm4, %v5987_v30 }
 0x202   : > { %4344 = vmatprep.mubr.msk.bf16.mxu1 %vm1152_vm4, %v6001_v2 }
 0x206   : > { %4201 = vmatmul.mubr.msk.bf16.gmra.mrb[48].mxu0 %vm1152_vm4, %v6005_v61 }
 0x207   : > { %4204 = vmatprep.mubr.msk.bf16.mxu0 %vm1152_vm4, %v6009_v55 }
 0x209   : > { %4345 = vmatmul.mubr.msk.bf16.gmra.mrb[16].mxu1 %vm1152_vm4, %v6035_v21 }
 0x20a   : > { %4348 = vmatprep.mubr.msk.bf16.mxu1 %vm1152_vm4, %v6037_v22 }
 0x20e   : > { %4205 = vmatmul.mubr.msk.bf16.gmra.mrb[52].mxu0 %vm1152_vm4, %v6033_v26 }
 0x20f   : > { %4208 = vmatprep.mubr.msk.bf16.mxu0 %vm1152_vm4, %v6041_v56 }
 0x211   : > { %4349 = vmatmul.mubr.msk.bf16.gmra.mrb[20].mxu1 %vm1152_vm4, %v6061_v37 }
 0x212   : > { %4352 = vmatprep.mubr.msk.bf16.mxu1 %vm1152_vm4, %v6063_v10 }
 0x216   : > { %4209 = vmatmul.mubr.msk.bf16.gmra.mrb[56].mxu0 %vm1152_vm4, %v6059_v35 }
 0x217   : > { %4212 = vmatprep.mubr.msk.bf16.mxu0 %vm1152_vm4, %v6067_v28 }
 0x219   : > { %4353 = vmatmul.mubr.msk.bf16.gmra.mrb[24].mxu1 %vm1152_vm4, %v6079_v36 }
 0x21a   : > { %4356 = vmatprep.mubr.msk.bf16.mxu1 %vm1152_vm4, %v6081_v63 }
 0x21e   : > { %4213 = vmatmul.mubr.msk.bf16.gmra.mrb[60].mxu0 %vm1152_vm4, %v6075_v16 }
 0x21f   : > { %4220 = vmatprep.mubr.msk.bf16.mxu0 %vm1152_vm4, %v6180_v24 }
 0x221   : > { %4357 = vmatmul.mubr.msk.bf16.gmra.mrb[28].mxu1 %vm1152_vm4, %v6091_v6 }
 0x222   : > { %4364 = vmatprep.mubr.msk.bf16.mxu1 %vm1152_vm4, %v5931_v33 }
 0x226   : > { %4221 = vmatmul.mubr.msk.bf16.vlgmr.msra.gmra.mrb[32].mxu0 %vm1152_vm4, %v5889_v1  ;;  %v6793_v1 = vld [vmem:[#allocation24_spill] sm:$0xff] }
 0x227   : > { %4224 = vmatprep.mubr.msk.bf16.mxu0 %vm1152_vm4, %v6780_v9  ;;  %4253 = vmatpush3.bf16.msra.mxu0 %v4845_v29 }
 0x228   : > { %4254 = vmatprep.subr.bf16.mxu0 %v4846_v43 }
 0x229   : > { %4365 = vmatmul.mubr.msk.bf16.vlgmr.msra.gmra.mrb[0].mxu1 %vm1152_vm4, %v6117_v42 }
 0x22a   : > { %4397 = vmatpush3.bf16.msra.mxu1 %v4843_v54  ;;  %4368 = vmatprep.mubr.msk.bf16.mxu1 %vm1152_vm4, %v6121_v34 }
 0x22b   : > { %4398 = vmatprep.subr.bf16.mxu1 %v4844_v5  ;;  %4255 = vmatpush3.bf16.msra.mxu0 %v4846_v43 }
 0x22e   : > { %4399 = vmatpush3.bf16.msra.mxu1 %v4844_v5  ;;  %4225 = vmatmul.mubr.msk.bf16.gmra.mrb[36].mxu0 %vm1152_vm4, %v5933_v38 }
 0x22f   : > { %4432 = vmatprep.subr.bf16.mxu1 %v4847_v0  ;;  %4228 = vmatprep.mubr.msk.bf16.mxu0 %vm1152_vm4, %v6123_v31 }
 0x231   : > { %4369 = vmatmul.mubr.msk.bf16.gmra.mrb[4].mxu1 %vm1152_vm4, %v6137_v45 }
 0x232   : > { %4372 = vmatprep.mubr.msk.bf16.mxu1 %vm1152_vm4, %v5937_v7 }
 0x236   : > { %4229 = vmatmul.mubr.msk.bf16.gmra.mrb[40].mxu0 %vm1152_vm4, %v6127_v60 }
 0x237   : > { %4232 = vmatprep.mubr.msk.bf16.mxu0 %vm1152_vm4, %v5949_v19 }
 0x239   : > { %4373 = vmatmul.mubr.msk.bf16.gmra.mrb[8].mxu1 %vm1152_vm4, %v5963_v51 }
 0x23a   : > { %4376 = vmatprep.mubr.msk.bf16.mxu1 %vm1152_vm4, %v5971_v40 }
 0x23e   : > { %4233 = vmatmul.mubr.msk.bf16.gmra.mrb[44].mxu0 %vm1152_vm4, %v5967_v52 }
 0x23f   : > { %4236 = vmatprep.mubr.msk.bf16.mxu0 %vm1152_vm4, %v5987_v30 }
 0x241   : > { %4377 = vmatmul.mubr.msk.bf16.gmra.mrb[12].mxu1 %vm1152_vm4, %v6005_v61 }
 0x242   : > { %4380 = vmatprep.mubr.msk.bf16.mxu1 %vm1152_vm4, %v6009_v55 }
 0x246   : > { %4237 = vmatmul.mubr.msk.bf16.gmra.mrb[48].mxu0 %vm1152_vm4, %v6001_v2 }
 0x247   : > { %4240 = vmatprep.mubr.msk.bf16.mxu0 %vm1152_vm4, %v6035_v21 }
 0x249   : > { %4381 = vmatmul.mubr.msk.bf16.gmra.mrb[16].mxu1 %vm1152_vm4, %v6033_v26 }
 0x24a   : > { %4384 = vmatprep.mubr.msk.bf16.mxu1 %vm1152_vm4, %v6041_v56 }
 0x24e   : > { %4241 = vmatmul.mubr.msk.bf16.gmra.mrb[52].mxu0 %vm1152_vm4, %v6037_v22 }
 0x24f   : > { %4244 = vmatprep.mubr.msk.bf16.mxu0 %vm1152_vm4, %v6061_v37 }
 0x251   : > { %4385 = vmatmul.mubr.msk.bf16.gmra.mrb[20].mxu1 %vm1152_vm4, %v6059_v35 }
 0x252   : > { %4388 = vmatprep.mubr.msk.bf16.mxu1 %vm1152_vm4, %v6067_v28 }
 0x256   : > { %4245 = vmatmul.mubr.msk.bf16.gmra.mrb[56].mxu0 %vm1152_vm4, %v6063_v10 }
 0x257   : > { %4248 = vmatprep.mubr.msk.bf16.mxu0 %vm1152_vm4, %v6079_v36 }
 0x259   : > { %4389 = vmatmul.mubr.msk.bf16.gmra.mrb[24].mxu1 %vm1152_vm4, %v6075_v16 }
 0x25a   : > { %4392 = vmatprep.mubr.msk.bf16.mxu1 %vm1152_vm4, %v6095_v48 }
 0x25e   : > { %4249 = vmatmul.mubr.msk.bf16.gmra.mrb[60].mxu0 %vm1152_vm4, %v6081_v63 }
 0x25f   : > { %4256 = vmatprep.mubr.msk.bf16.mxu0 %vm1152_vm4, %v5483_v3  ;;  %v6796_v3 = vld [vmem:[#allocation30_spill] sm:$0xff] }
 0x261   : > { %4393 = vmatmul.mubr.bf16.gmra.mrb[28].mxu1 %v5110_v11  ;;  %v6798_v11 = vld [vmem:[#allocation32_spill] sm:$0xff] }
 0x262   : > { %4400 = vmatprep.mubr.msk.bf16.mxu1 %vm1152_vm4, %v6793_v1 }
 0x266   : > { %4257 = vmatmul.mubr.msk.bf16.vlgmr.msra.gmra.mrb[32].mxu0 %vm1152_vm4, %v5931_v33  ;;  %v6797_v33 = vld [vmem:[#allocation31_spill] sm:$0xff] }
 0x267   : > { %4260 = vmatprep.mubr.msk.bf16.mxu0 %vm1152_vm4, %v6117_v42 }
 0x269   : > { %4401 = vmatmul.mubr.msk.bf16.vlgmr.msra.gmra.mrb[0].mxu1 %vm1152_vm4, %v6794_v15 }
 0x26a   : > { %4433 = vmatpush3.bf16.msra.mxu1 %v4847_v0  ;;  %4404 = vmatprep.mubr.msk.bf16.mxu1 %vm1152_vm4, %v6795_v12 }
 0x26b   : > { %4434 = vmatprep.subr.bf16.mxu1 %v4848_v27 }
 0x26e   : > { %4435 = vmatpush3.bf16.msra.mxu1 %v4848_v27  ;;  %4261 = vmatmul.mubr.msk.bf16.gmra.mrb[36].mxu0 %vm1152_vm4, %v6121_v34 }
 0x26f   : > { %4264 = vmatprep.mubr.msk.bf16.mxu0 %vm1152_vm4, %v6137_v45 }
 0x271   : > { %4405 = vmatmul.mubr.msk.bf16.gmra.mrb[4].mxu1 %vm1152_vm4, %v6796_v3 }
 0x272   : > { %4408 = vmatprep.mubr.msk.bf16.mxu1 %vm1152_vm4, %v6797_v33 }
 0x276   : > { %4265 = vmatmul.mubr.msk.bf16.gmra.mrb[40].mxu0 %vm1152_vm4, %v5937_v7  ;;  %v6802_v7 = vld [vmem:[#allocation36_spill] sm:$0xff] }
 0x277   : > { %4268 = vmatprep.mubr.msk.bf16.mxu0 %vm1152_vm4, %v5963_v51  ;;  %v6803_v51 = vld [vmem:[#allocation37_spill] sm:$0xff] }
 0x279   : > { %4409 = vmatmul.mubr.msk.bf16.gmra.mrb[8].mxu1 %vm1152_vm4, %v6798_v11 }
 0x27a   : > { %4412 = vmatprep.mubr.msk.bf16.mxu1 %vm1152_vm4, %v6799_v57 }
 0x27e   : > { %4269 = vmatmul.mubr.msk.bf16.gmra.mrb[44].mxu0 %vm1152_vm4, %v5971_v40  ;;  %v6804_v40 = vld [vmem:[#allocation38_spill] sm:$0xff] }
 0x27f   : > { %4272 = vmatprep.mubr.msk.bf16.mxu0 %vm1152_vm4, %v6005_v61  ;;  %v6805_v61 = vld [vmem:[#allocation19_spill] sm:$0xff] }
 0x281   : > { %4413 = vmatmul.mubr.msk.bf16.gmra.mrb[12].mxu1 %vm1152_vm4, %v6800_v25 }
 0x282   : > { %4416 = vmatprep.mubr.msk.bf16.mxu1 %vm1152_vm4, %v6801_v8 }
 0x286   : > { %4273 = vmatmul.mubr.msk.bf16.gmra.mrb[48].mxu0 %vm1152_vm4, %v6009_v55 }
 0x287   : > { %4276 = vmatprep.mubr.msk.bf16.mxu0 %vm1152_vm4, %v6033_v26 }
 0x289   : > { %4417 = vmatmul.mubr.msk.bf16.gmra.mrb[16].mxu1 %vm1152_vm4, %v6802_v7 }
 0x28a   : > { %4420 = vmatprep.mubr.msk.bf16.mxu1 %vm1152_vm4, %v6803_v51 }
 0x28e   : > { %4277 = vmatmul.mubr.msk.bf16.gmra.mrb[52].mxu0 %vm1152_vm4, %v6041_v56 }
 0x28f   : > { %4280 = vmatprep.mubr.msk.bf16.mxu0 %vm1152_vm4, %v6059_v35 }
 0x291   : > { %4421 = vmatmul.mubr.msk.bf16.gmra.mrb[20].mxu1 %vm1152_vm4, %v5865_v58 }
 0x292   : > { %4424 = vmatprep.mubr.msk.bf16.mxu1 %vm1152_vm4, %v6804_v40 }
 0x296   : > { %4281 = vmatmul.mubr.msk.bf16.gmra.mrb[56].mxu0 %vm1152_vm4, %v6067_v28 }
 0x297   : > { %4284 = vmatprep.mubr.msk.bf16.mxu0 %vm1152_vm4, %v6075_v16 }
 0x299   : > { %4425 = vmatmul.mubr.msk.bf16.gmra.mrb[24].mxu1 %vm1152_vm4, %v5887_v62 }
 0x29a   : > { %4428 = vmatprep.mubr.msk.bf16.mxu1 %vm1152_vm4, %v5927_v59 }
 0x29e   : > { %4285 = vmatmul.mubr.msk.bf16.gmra.mrb[60].mxu0 %vm1152_vm4, %v6095_v48 }
 0x2a1   : > { %4429 = vmatmul.mubr.msk.bf16.gmra.mrb[28].mxu1 %vm1152_vm4, %v6805_v61 }
 0x2a2   : > { %4436 = vmatprep.mubr.msk.bf16.mxu1 %vm1152_vm4, %v6780_v9 }
 0x2a9   : > { %4437 = vmatmul.mubr.msk.bf16.vlgmr.msra.gmra.mrb[0].mxu1 %vm1152_vm4, %v5933_v38 }
 0x2aa   : > { %4440 = vmatprep.mubr.msk.bf16.mxu1 %vm1152_vm4, %v6123_v31 }
 0x2b1   : > { %4441 = vmatmul.mubr.msk.bf16.gmra.mrb[4].mxu1 %vm1152_vm4, %v6127_v60 }
 0x2b2   : > { %4444 = vmatprep.mubr.msk.bf16.mxu1 %vm1152_vm4, %v5949_v19 }
 0x2b9   : > { %4445 = vmatmul.mubr.msk.bf16.gmra.mrb[8].mxu1 %vm1152_vm4, %v5967_v52 }
 0x2ba   : > { %4448 = vmatprep.mubr.msk.bf16.mxu1 %vm1152_vm4, %v5987_v30 }
 0x2c1   : > { %4449 = vmatmul.mubr.msk.bf16.gmra.mrb[12].mxu1 %vm1152_vm4, %v6001_v2 }
 0x2c2   : > { %4452 = vmatprep.mubr.msk.bf16.mxu1 %vm1152_vm4, %v6035_v21 }
 0x2c9   : > { %4453 = vmatmul.mubr.msk.bf16.gmra.mrb[16].mxu1 %vm1152_vm4, %v6037_v22 }
 0x2ca   : > { %4456 = vmatprep.mubr.msk.bf16.mxu1 %vm1152_vm4, %v6061_v37 }
 0x2d1   : > { %4457 = vmatmul.mubr.msk.bf16.gmra.mrb[20].mxu1 %vm1152_vm4, %v6063_v10 }
 0x2d2   : > { %4460 = vmatprep.mubr.msk.bf16.mxu1 %vm1152_vm4, %v6079_v36 }
 0x2d9   : > { %4461 = vmatmul.mubr.msk.bf16.gmra.mrb[24].mxu1 %vm1152_vm4, %v6081_v63 }
 0x2da   : > { %4464 = vmatprep.mubr.msk.bf16.mxu1 %vm1152_vm4, %v6091_v6 }
 0x2e1   : > { %4465 = vmatmul.mubr.msk.bf16.gmra.mrb[28].mxu1 %vm1152_vm4, %v6180_v24  ;;  %vm3293_vm4 = vcmask 523264  }
 0x339   : > { %v4258_v58 = vpop.f32.mrb[32].mxu0 }
 0x33a   : > { %v2021_v59 = vpop.f32.mrb[33].mxu0 }
 0x33b   : > { %v4259_v62 = vpop.f32.mrb[34].mxu0 }
 0x33c   : > { %v2024_v38 = vpop.f32.mrb[35].mxu0 }
 0x341   : > { %v4262_v19 = vpop.f32.mrb[36].mxu0 }
 0x342   : > { %v2037_v52 = vpop.f32.mrb[37].mxu0 }
 0x343   : > { %v6345_v30 = vpop.f32.mrb[38].mxu0 }
 0x344   : > { %v6347_v2 = vpop.f32.mrb[39].mxu0 }
 0x349   : > { %v6349_v55 = vpop.f32.mrb[40].mxu0 }
 0x34a   : > { %v6351_v26 = vpop.f32.mrb[41].mxu0 }
 0x34b   : > { %v6353_v21 = vpop.f32.mrb[42].mxu0 }
 0x34c   : > { %v6355_v22 = vpop.f32.mrb[43].mxu0 }
 0x351   : > { %v6357_v56 = vpop.f32.mrb[44].mxu0 }
 0x352   : > { %v6359_v35 = vpop.f32.mrb[45].mxu0 }
 0x353   : > { %v6361_v37 = vpop.f32.mrb[46].mxu0 }
 0x354   : > { %v6363_v10 = vpop.f32.mrb[47].mxu0 }
 0x359   : > { %v6365_v28 = vpop.f32.mrb[48].mxu0 }
 0x35a   : > { %v6367_v16 = vpop.f32.mrb[49].mxu0 }
 0x35b   : > { %v6369_v36 = vpop.f32.mrb[50].mxu0 }
 0x35c   : > { %v6371_v63 = vpop.f32.mrb[51].mxu0 }
 0x361   : > { %v6373_v9 = vpop.f32.mrb[52].mxu0 }
 0x362   : > { %v6375_v6 = vpop.f32.mrb[53].mxu0 }
 0x363   : > { %v6377_v48 = vpop.f32.mrb[54].mxu0 }
 0x364   : > { %v6379_v14 = vpop.f32.mrb[55].mxu0 }
 0x369   : > { %v6381_v54 = vpop.f32.mrb[56].mxu0 }
 0x36a   : > { %v6383_v46 = vpop.f32.mrb[57].mxu0 }
 0x36b   : > { %v6385_v50 = vpop.f32.mrb[58].mxu0 }
 0x36c   : > { %v6387_v4 = vpop.f32.mrb[59].mxu0 }
 0x371   : > { %v6389_v32 = vpop.f32.mrb[60].mxu0 }
 0x372   : > { %v6391_v47 = vpop.f32.mrb[61].mxu0 }
 0x373   : > { %v6393_v41 = vpop.f32.mrb[62].mxu0 }
 0x374   : > { %v6395_v17 = vpop.f32.mrb[63].mxu0 }
 0x37c   : > { %v4438_v44 = vpop.f32.mrb[0].mxu1 }
 0x37d   : > { %v4474_v29 = vadd.f32 %v4438_v44, %v4258_v58  ;;  %v3095_v39 = vpop.f32.mrb[1].mxu1 }
 0x37e   : > { %v4475_v49 = vadd.f32 %v3095_v39, %v2021_v59  ;;  %v4439_v13 = vpop.f32.mrb[2].mxu1 }
 0x37f   : > { %v3263_v20 = vadd.f32 %v4474_v29, %v6397_v18  ;;  %v4476_v42 = vadd.f32 %v4439_v13, %v4259_v62  ;;  %v3098_v34 = vpop.f32.mrb[3].mxu1 }
 0x380   : > { %v3261_v31 = vadd.f32 %v4475_v49, %v6397_v18  ;;  %v4477_v60 = vadd.f32 %v3098_v34, %v2024_v38 }
 0x381   : > { %3296 = vst.msk [vmem:[%s6403_s27 + $0x10] sm:$0xff] %vm3293_vm4, %v3263_v20  ;;  %v3264_v45 = vadd.f32 %v4476_v42, %v6397_v18  ;;  %v3397_v24 = vmul.f32 %v3263_v20, %v3263_v20  ;;  %v3329_v33 = vsel %vm3293_vm4, %v3263_v20, 0.0 }
 0x382   : > { %3294 = vst.msk [vmem:[%s6403_s27] sm:$0xff] %vm3293_vm4, %v3261_v31  ;;  %v3395_v53 = vmul.f32 %v3261_v31, %v3261_v31  ;;  %v3262_v23 = vadd.f32 %v4477_v60, %v6397_v18  ;;  %v3326_v5 = vsel %vm3293_vm4, %v3261_v31, 0.0 }
 0x383   : > { %3297 = vst.msk [vmem:[%s6403_s27 + $0x18] sm:$0xff] %vm3293_vm4, %v3264_v45  ;;  %v3398_v27 = vmul.f32 %v3264_v45, %v3264_v45  ;;  %v3430_v59 = vsel %vm3293_vm4, %v3397_v24, 0.0  ;;  %v3331_v62 = vsel %vm3293_vm4, %v3264_v45, 0.0 }
 0x384   : > { %3295 = vst.msk [vmem:[%s6403_s27 + $0x8] sm:$0xff] %vm3293_vm4, %v3262_v23  ;;  %v3327_v43 = vsel %vm3293_vm4, %v3262_v23, 0.0  ;;  %v3396_v0 = vmul.f32 %v3262_v23, %v3262_v23  ;;  %v4442_v1 = vpop.f32.mrb[4].mxu1  ;;  %v3427_v11 = vsel %vm3293_vm4, %v3395_v53, 0.0 }
 0x385   : > { %v3328_v15 = vadd.f32 %v3327_v43, %v3326_v5  ;;  %v4478_v12 = vadd.f32 %v4442_v1, %v4262_v19  ;;  %v3111_v3 = vpop.f32.mrb[5].mxu1 }
 0x386   : > { %v3428_v57 = vsel %vm3293_vm4, %v3396_v0, 0.0  ;;  %v4479_v25 = vadd.f32 %v3111_v3, %v2037_v52  ;;  %v4443_v8 = vpop.f32.mrb[6].mxu1  ;;  %v3432_v52 = vsel %vm3293_vm4, %v3398_v27, 0.0 }
 0x387   : > { %v3330_v7 = vadd.f32 %v3329_v33, %v3328_v15  ;;  %v3429_v51 = vadd.f32 %v3428_v57, %v3427_v11  ;;  %v3267_v40 = vadd.f32 %v4478_v12, %v6397_v18  ;;  %v4480_v61 = vadd.f32 %v4443_v8, %v6345_v30  ;;  %v3114_v58 = vpop.f32.mrb[7].mxu1 }
 0x388   : > { %v3265_v38 = vadd.f32 %v4479_v25, %v6397_v18  ;;  %v4481_v19 = vadd.f32 %v3114_v58, %v6347_v2 }
 0x389   : > { %v3431_v44 = vadd.f32 %v3430_v59, %v3429_v51  ;;  %3300 = vst.msk [vmem:[%s6403_s27 + $0x30] sm:$0xff] %vm3293_vm4, %v3267_v40  ;;  %v3332_v29 = vadd.f32 %v3331_v62, %v3330_v7  ;;  %v3268_v49 = vadd.f32 %v4480_v61, %v6397_v18  ;;  %v3401_v34 = vmul.f32 %v3267_v40, %v3267_v40 }
 0x38a   : > { %3298 = vst.msk [vmem:[%s6403_s27 + $0x20] sm:$0xff] %vm3293_vm4, %v3265_v38  ;;  %v3333_v30 = vsel %vm3293_vm4, %v3265_v38, 0.0  ;;  %v3399_v39 = vmul.f32 %v3265_v38, %v3265_v38  ;;  %v3266_v13 = vadd.f32 %v4481_v19, %v6397_v18  ;;  %v3337_v43 = vsel %vm3293_vm4, %v3267_v40, 0.0 }
 0x38b   : > { %v3334_v20 = vadd.f32 %v3333_v30, %v3332_v29  ;;  %v3433_v42 = vadd.f32 %v3432_v52, %v3431_v44  ;;  %3301 = vst.msk [vmem:[%s6403_s27 + $0x38] sm:$0xff] %vm3293_vm4, %v3268_v49  ;;  %v3402_v0 = vmul.f32 %v3268_v49, %v3268_v49 }
 0x38c   : > { %v3434_v2 = vsel %vm3293_vm4, %v3399_v39, 0.0  ;;  %3299 = vst.msk [vmem:[%s6403_s27 + $0x28] sm:$0xff] %vm3293_vm4, %v3266_v13  ;;  %v3335_v31 = vsel %vm3293_vm4, %v3266_v13, 0.0  ;;  %v4446_v60 = vpop.f32.mrb[8].mxu1  ;;  %v3400_v23 = vmul.f32 %v3266_v13, %v3266_v13 }
 0x38d   : > { %v3435_v45 = vadd.f32 %v3434_v2, %v3433_v42  ;;  %v3336_v53 = vadd.f32 %v3335_v31, %v3334_v20  ;;  %v4482_v24 = vadd.f32 %v4446_v60, %v6349_v55  ;;  %v3127_v5 = vpop.f32.mrb[9].mxu1  ;;  %v3339_v55 = vsel %vm3293_vm4, %v3268_v49, 0.0 }
 0x38e   : > { %v4483_v1 = vadd.f32 %v3127_v5, %v6351_v26  ;;  %v4447_v27 = vpop.f32.mrb[10].mxu1  ;;  %v3436_v12 = vsel %vm3293_vm4, %v3400_v23, 0.0  ;;  %v3438_v26 = vsel %vm3293_vm4, %v3401_v34, 0.0  ;;  %v3440_v59 = vsel %vm3293_vm4, %v3402_v0, 0.0 }
 0x38f   : > { %v3338_v15 = vadd.f32 %v3337_v43, %v3336_v53  ;;  %v3271_v3 = vadd.f32 %v4482_v24, %v6397_v18  ;;  %v4484_v33 = vadd.f32 %v4447_v27, %v6353_v21  ;;  %v3130_v11 = vpop.f32.mrb[11].mxu1  ;;  %v3437_v57 = vadd.f32 %v3436_v12, %v3435_v45 }
 0x390   : > { %v3269_v25 = vadd.f32 %v4483_v1, %v6397_v18  ;;  %v4485_v8 = vadd.f32 %v3130_v11, %v6355_v22 }
 0x391   : > { %3304 = vst.msk [vmem:[%s6403_s27 + $0x50] sm:$0xff] %vm3293_vm4, %v3271_v3  ;;  %v3340_v7 = vadd.f32 %v3339_v55, %v3338_v15  ;;  %v3272_v51 = vadd.f32 %v4484_v33, %v6397_v18  ;;  %v3439_v40 = vadd.f32 %v3438_v26, %v3437_v57  ;;  %v3405_v29 = vmul.f32 %v3271_v3, %v3271_v3 }
 0x392   : > { %3302 = vst.msk [vmem:[%s6403_s27 + $0x40] sm:$0xff] %vm3293_vm4, %v3269_v25  ;;  %v3341_v21 = vsel %vm3293_vm4, %v3269_v25, 0.0  ;;  %v3403_v61 = vmul.f32 %v3269_v25, %v3269_v25  ;;  %v3270_v58 = vadd.f32 %v4485_v8, %v6397_v18  ;;  %v3345_v13 = vsel %vm3293_vm4, %v3271_v3, 0.0 }
 0x393   : > { %v3342_v62 = vadd.f32 %v3341_v21, %v3340_v7  ;;  %3305 = vst.msk [vmem:[%s6403_s27 + $0x58] sm:$0xff] %vm3293_vm4, %v3272_v51  ;;  %v3441_v22 = vadd.f32 %v3440_v59, %v3439_v40  ;;  %v3406_v31 = vmul.f32 %v3272_v51, %v3272_v51 }
 0x394   : > { %v3442_v38 = vsel %vm3293_vm4, %v3403_v61, 0.0  ;;  %3303 = vst.msk [vmem:[%s6403_s27 + $0x48] sm:$0xff] %vm3293_vm4, %v3270_v58  ;;  %v3343_v19 = vsel %vm3293_vm4, %v3270_v58, 0.0  ;;  %v3404_v52 = vmul.f32 %v3270_v58, %v3270_v58  ;;  %v4450_v44 = vpop.f32.mrb[12].mxu1 }
 0x395   : > { %v3344_v30 = vadd.f32 %v3343_v19, %v3342_v62  ;;  %v4486_v39 = vadd.f32 %v4450_v44, %v6357_v56  ;;  %v3143_v49 = vpop.f32.mrb[13].mxu1  ;;  %v3443_v20 = vadd.f32 %v3442_v38, %v3441_v22  ;;  %v3347_v56 = vsel %vm3293_vm4, %v3272_v51, 0.0 }
 0x396   : > { %v3444_v42 = vsel %vm3293_vm4, %v3404_v52, 0.0  ;;  %v4487_v34 = vadd.f32 %v3143_v49, %v6359_v35  ;;  %v4451_v2 = vpop.f32.mrb[14].mxu1  ;;  %v3446_v35 = vsel %vm3293_vm4, %v3405_v29, 0.0  ;;  %v3448_v3 = vsel %vm3293_vm4, %v3406_v31, 0.0 }
 0x397   : > { %v3346_v60 = vadd.f32 %v3345_v13, %v3344_v30  ;;  %v3275_v45 = vadd.f32 %v4486_v39, %v6397_v18  ;;  %v4488_v53 = vadd.f32 %v4451_v2, %v6361_v37  ;;  %v3146_v23 = vpop.f32.mrb[15].mxu1  ;;  %v3445_v24 = vadd.f32 %v3444_v42, %v3443_v20 }
 0x398   : > { %v3273_v5 = vadd.f32 %v4487_v34, %v6397_v18  ;;  %v4489_v43 = vadd.f32 %v3146_v23, %v6363_v10 }
 0x399   : > { %3308 = vst.msk [vmem:[%s6403_s27 + $0x70] sm:$0xff] %vm3293_vm4, %v3275_v45  ;;  %v3348_v0 = vadd.f32 %v3347_v56, %v3346_v60  ;;  %v3276_v1 = vadd.f32 %v4488_v53, %v6397_v18  ;;  %v3447_v27 = vadd.f32 %v3446_v35, %v3445_v24  ;;  %v3409_v8 = vmul.f32 %v3275_v45, %v3275_v45 }
 0x39a   : > { %3306 = vst.msk [vmem:[%s6403_s27 + $0x60] sm:$0xff] %vm3293_vm4, %v3273_v5  ;;  %v3349_v37 = vsel %vm3293_vm4, %v3273_v5, 0.0  ;;  %v3407_v15 = vmul.f32 %v3273_v5, %v3273_v5  ;;  %v3274_v12 = vadd.f32 %v4489_v43, %v6397_v18  ;;  %v3353_v40 = vsel %vm3293_vm4, %v3275_v45, 0.0 }
 0x39b   : > { %v3350_v33 = vadd.f32 %v3349_v37, %v3348_v0  ;;  %3309 = vst.msk [vmem:[%s6403_s27 + $0x78] sm:$0xff] %vm3293_vm4, %v3276_v1  ;;  %v3449_v10 = vadd.f32 %v3448_v3, %v3447_v27  ;;  %v3410_v62 = vmul.f32 %v3276_v1, %v3276_v1 }
 0x39c   : > { %v3450_v11 = vsel %vm3293_vm4, %v3407_v15, 0.0  ;;  %3307 = vst.msk [vmem:[%s6403_s27 + $0x68] sm:$0xff] %vm3293_vm4, %v3274_v12  ;;  %v3351_v55 = vsel %vm3293_vm4, %v3274_v12, 0.0  ;;  %v3408_v57 = vmul.f32 %v3274_v12, %v3274_v12  ;;  %v4454_v25 = vpop.f32.mrb[16].mxu1 }
 0x39d   : > { %v3352_v26 = vadd.f32 %v3351_v55, %v3350_v33  ;;  %v4490_v7 = vadd.f32 %v4454_v25, %v6365_v28  ;;  %v3159_v51 = vpop.f32.mrb[17].mxu1  ;;  %v3451_v21 = vadd.f32 %v3450_v11, %v3449_v10  ;;  %v3355_v28 = vsel %vm3293_vm4, %v3276_v1, 0.0 }
 0x39e   : > { %v3452_v61 = vsel %vm3293_vm4, %v3408_v57, 0.0  ;;  %v4491_v58 = vadd.f32 %v3159_v51, %v6367_v16  ;;  %v4455_v59 = vpop.f32.mrb[18].mxu1  ;;  %v3454_v16 = vsel %vm3293_vm4, %v3409_v8, 0.0  ;;  %v3456_v34 = vsel %vm3293_vm4, %v3410_v62, 0.0 }
 0x39f   : > { %v3354_v22 = vadd.f32 %v3353_v40, %v3352_v26  ;;  %v3279_v38 = vadd.f32 %v4490_v7, %v6397_v18  ;;  %v4492_v19 = vadd.f32 %v4455_v59, %v6369_v36  ;;  %v3162_v52 = vpop.f32.mrb[19].mxu1  ;;  %v3453_v44 = vadd.f32 %v3452_v61, %v3451_v21 }
 0x3a0   : > { %v3277_v29 = vadd.f32 %v4491_v58, %v6397_v18  ;;  %v4493_v30 = vadd.f32 %v3162_v52, %v6371_v63 }
 0x3a1   : > { %3312 = vst.msk [vmem:[%s6403_s27 + $0x90] sm:$0xff] %vm3293_vm4, %v3279_v38  ;;  %v3356_v39 = vadd.f32 %v3355_v28, %v3354_v22  ;;  %v3280_v49 = vadd.f32 %v4492_v19, %v6397_v18  ;;  %v3455_v13 = vadd.f32 %v3454_v16, %v3453_v44  ;;  %v3413_v23 = vmul.f32 %v3279_v38, %v3279_v38 }
 0x3a2   : > { %3310 = vst.msk [vmem:[%s6403_s27 + $0x80] sm:$0xff] %vm3293_vm4, %v3277_v29  ;;  %v3357_v36 = vsel %vm3293_vm4, %v3277_v29, 0.0  ;;  %v3411_v20 = vmul.f32 %v3277_v29, %v3277_v29  ;;  %v3278_v42 = vadd.f32 %v4493_v30, %v6397_v18  ;;  %v3361_v43 = vsel %vm3293_vm4, %v3279_v38, 0.0 }
 0x3a3   : > { %v3358_v2 = vadd.f32 %v3357_v36, %v3356_v39  ;;  %3313 = vst.msk [vmem:[%s6403_s27 + $0x98] sm:$0xff] %vm3293_vm4, %v3280_v49  ;;  %v3457_v63 = vadd.f32 %v3456_v34, %v3455_v13  ;;  %v3414_v37 = vmul.f32 %v3280_v49, %v3280_v49 }
 0x3a4   : > { %v3458_v31 = vsel %vm3293_vm4, %v3411_v20, 0.0  ;;  %3311 = vst.msk [vmem:[%s6403_s27 + $0x88] sm:$0xff] %vm3293_vm4, %v3278_v42  ;;  %v3359_v60 = vsel %vm3293_vm4, %v3278_v42, 0.0  ;;  %v3412_v45 = vmul.f32 %v3278_v42, %v3278_v42  ;;  %v4458_v53 = vpop.f32.mrb[20].mxu1 }
 0x3a5   : > { %v3360_v56 = vadd.f32 %v3359_v60, %v3358_v2  ;;  %v4494_v24 = vadd.f32 %v4458_v53, %v6373_v9  ;;  %v3175_v5 = vpop.f32.mrb[21].mxu1  ;;  %v3459_v35 = vadd.f32 %v3458_v31, %v3457_v63  ;;  %v3363_v9 = vsel %vm3293_vm4, %v3280_v49, 0.0 }
 0x3a6   : > { %v3460_v0 = vsel %vm3293_vm4, %v3412_v45, 0.0  ;;  %v4495_v1 = vadd.f32 %v3175_v5, %v6375_v6  ;;  %v4459_v27 = vpop.f32.mrb[22].mxu1  ;;  %v3462_v6 = vsel %vm3293_vm4, %v3413_v23, 0.0  ;;  %v3464_v51 = vsel %vm3293_vm4, %v3414_v37, 0.0 }
 0x3a7   : > { %v3362_v15 = vadd.f32 %v3361_v43, %v3360_v56  ;;  %v3283_v12 = vadd.f32 %v4494_v24, %v6397_v18  ;;  %v4496_v3 = vadd.f32 %v4459_v27, %v6377_v48  ;;  %v3178_v33 = vpop.f32.mrb[23].mxu1  ;;  %v3461_v10 = vadd.f32 %v3460_v0, %v3459_v35 }
 0x3a8   : > { %v3281_v11 = vadd.f32 %v4495_v1, %v6397_v18  ;;  %v4497_v55 = vadd.f32 %v3178_v33, %v6379_v14 }
 0x3a9   : > { %3316 = vst.msk [vmem:[%s6403_s27 + $0xb0] sm:$0xff] %vm3293_vm4, %v3283_v12  ;;  %v3364_v57 = vadd.f32 %v3363_v9, %v3362_v15  ;;  %v3284_v25 = vadd.f32 %v4496_v3, %v6397_v18  ;;  %v3463_v8 = vadd.f32 %v3462_v6, %v3461_v10  ;;  %v3417_v62 = vmul.f32 %v3283_v12, %v3283_v12 }
 0x3aa   : > { %3314 = vst.msk [vmem:[%s6403_s27 + $0xa0] sm:$0xff] %vm3293_vm4, %v3281_v11  ;;  %v3365_v48 = vsel %vm3293_vm4, %v3281_v11, 0.0  ;;  %v3415_v26 = vmul.f32 %v3281_v11, %v3281_v11  ;;  %v3282_v7 = vadd.f32 %v4497_v55, %v6397_v18  ;;  %v3369_v52 = vsel %vm3293_vm4, %v3283_v12, 0.0 }
 0x3ab   : > { %v3366_v40 = vadd.f32 %v3365_v48, %v3364_v57  ;;  %3317 = vst.msk [vmem:[%s6403_s27 + $0xb8] sm:$0xff] %vm3293_vm4, %v3284_v25  ;;  %v3465_v14 = vadd.f32 %v3464_v51, %v3463_v8  ;;  %v3418_v16 = vmul.f32 %v3284_v25, %v3284_v25  ;;  %v3470_v2 = vsel %vm3293_vm4, %v3417_v62, 0.0 }
 0x3ac   : > { %v3466_v21 = vsel %vm3293_vm4, %v3415_v26, 0.0  ;;  %3315 = vst.msk [vmem:[%s6403_s27 + $0xa8] sm:$0xff] %vm3293_vm4, %v3282_v7  ;;  %v3367_v61 = vsel %vm3293_vm4, %v3282_v7, 0.0  ;;  %v3416_v58 = vmul.f32 %v3282_v7, %v3282_v7  ;;  %v4462_v59 = vpop.f32.mrb[24].mxu1 }
 0x3ad   : > { %v3368_v22 = vadd.f32 %v3367_v61, %v3366_v40  ;;  %v4498_v38 = vadd.f32 %v4462_v59, %v6381_v54  ;;  %v3191_v19 = vpop.f32.mrb[25].mxu1  ;;  %v3467_v28 = vadd.f32 %v3466_v21, %v3465_v14  ;;  %v3371_v54 = vsel %vm3293_vm4, %v3284_v25, 0.0 }
 0x3ae   : > { %v3468_v44 = vsel %vm3293_vm4, %v3416_v58, 0.0  ;;  %v4499_v29 = vadd.f32 %v3191_v19, %v6383_v46  ;;  %v4463_v30 = vpop.f32.mrb[26].mxu1  ;;  %v3472_v23 = vsel %vm3293_vm4, %v3418_v16, 0.0 }
 0x3af   : > { %v3370_v39 = vadd.f32 %v3369_v52, %v3368_v22  ;;  %v3287_v49 = vadd.f32 %v4498_v38, %v6397_v18  ;;  %v4500_v13 = vadd.f32 %v4463_v30, %v6385_v50  ;;  %v3194_v36 = vpop.f32.mrb[27].mxu1  ;;  %v3469_v20 = vadd.f32 %v3468_v44, %v3467_v28 }
 0x3b0   : > { %v3285_v42 = vadd.f32 %v4499_v29, %v6397_v18  ;;  %v4501_v34 = vadd.f32 %v3194_v36, %v6387_v4 }
 0x3b1   : > { %3320 = vst.msk [vmem:[%s6403_s27 + $0xd0] sm:$0xff] %vm3293_vm4, %v3287_v49  ;;  %v3421_v46 = vmul.f32 %v3287_v49, %v3287_v49  ;;  %v3372_v63 = vadd.f32 %v3371_v54, %v3370_v39  ;;  %v3288_v31 = vadd.f32 %v4500_v13, %v6397_v18  ;;  %v3471_v60 = vadd.f32 %v3470_v2, %v3469_v20 }
 0x3b2   : > { %3318 = vst.msk [vmem:[%s6403_s27 + $0xc0] sm:$0xff] %vm3293_vm4, %v3285_v42  ;;  %v3373_v50 = vsel %vm3293_vm4, %v3285_v42, 0.0  ;;  %v3419_v45 = vmul.f32 %v3285_v42, %v3285_v42  ;;  %v3286_v53 = vadd.f32 %v4501_v34, %v6397_v18  ;;  %v3377_v1 = vsel %vm3293_vm4, %v3287_v49, 0.0 }
 0x3b3   : > { %v3374_v4 = vadd.f32 %v3373_v50, %v3372_v63  ;;  %3321 = vst.msk [vmem:[%s6403_s27 + $0xd8] sm:$0xff] %vm3293_vm4, %v3288_v31  ;;  %v3422_v56 = vmul.f32 %v3288_v31, %v3288_v31  ;;  %v3473_v24 = vadd.f32 %v3472_v23, %v3471_v60  ;;  %v3478_v12 = vsel %vm3293_vm4, %v3421_v46, 0.0 }
 0x3b4   : > { %v3474_v5 = vsel %vm3293_vm4, %v3419_v45, 0.0  ;;  %3319 = vst.msk [vmem:[%s6403_s27 + $0xc8] sm:$0xff] %vm3293_vm4, %v3286_v53  ;;  %v3375_v43 = vsel %vm3293_vm4, %v3286_v53, 0.0  ;;  %v3420_v35 = vmul.f32 %v3286_v53, %v3286_v53  ;;  %v4466_v0 = vpop.f32.mrb[28].mxu1  ;;  %v3379_v11 = vsel %vm3293_vm4, %v3288_v31, 0.0 }
 0x3b5   : > { %v3376_v27 = vadd.f32 %v3375_v43, %v3374_v4  ;;  %v4502_v37 = vadd.f32 %v4466_v0, %v6389_v32  ;;  %v3207_v15 = vpop.f32.mrb[29].mxu1  ;;  %v3475_v3 = vadd.f32 %v3474_v5, %v3473_v24  ;;  %v3480_v25 = vsel %vm3293_vm4, %v3422_v56, 0.0 }
 0x3b6   : > { %v3476_v33 = vsel %vm3293_vm4, %v3420_v35, 0.0  ;;  %v4503_v9 = vadd.f32 %v3207_v15, %v6391_v47  ;;  %v4467_v10 = vpop.f32.mrb[30].mxu1 }
 0x3b7   : > { %v3378_v55 = vadd.f32 %v3377_v1, %v3376_v27  ;;  %v3291_v6 = vadd.f32 %v4502_v37, %v6397_v18  ;;  %v4504_v32 = vadd.f32 %v4467_v10, %v6393_v41  ;;  %v3210_v57 = vpop.f32.mrb[31].mxu1  ;;  %v3477_v8 = vadd.f32 %v3476_v33, %v3475_v3 }
 0x3b8   : > { %v3289_v48 = vadd.f32 %v4503_v9, %v6397_v18  ;;  %v4505_v47 = vadd.f32 %v3210_v57, %v6395_v17 }
 0x3b9   : > { %3324 = vst.msk [vmem:[%s6403_s27 + $0xf0] sm:$0xff] %vm3293_vm4, %v3291_v6  ;;  %v3385_v26 = vsel %vm3293_vm4, %v3291_v6, 0.0  ;;  %v3425_v7 = vmul.f32 %v3291_v6, %v3291_v6  ;;  %v3380_v51 = vadd.f32 %v3379_v11, %v3378_v55  ;;  %v3292_v40 = vadd.f32 %v4504_v32, %v6397_v18 }
 0x3ba   : > { %v3479_v41 = vadd.f32 %v3478_v12, %v3477_v8  ;;  %3322 = vst.msk [vmem:[%s6403_s27 + $0xe0] sm:$0xff] %vm3293_vm4, %v3289_v48  ;;  %v3381_v17 = vsel %vm3293_vm4, %v3289_v48, 0.0  ;;  %v3423_v14 = vmul.f32 %v3289_v48, %v3289_v48  ;;  %v3290_v21 = vadd.f32 %v4505_v47, %v6397_v18 }
 0x3bb   : > { %v3486_v61 = vsel %vm3293_vm4, %v3425_v7, 0.0  ;;  %v3382_v58 = vadd.f32 %v3381_v17, %v3380_v51  ;;  %3325 = vst.msk [vmem:[%s6403_s27 + $0xf8] sm:$0xff] %vm3293_vm4, %v3292_v40  ;;  %v3387_v59 = vsel %vm3293_vm4, %v3292_v40, 0.0  ;;  %v3426_v62 = vmul.f32 %v3292_v40, %v3292_v40 }
 0x3bc   : > { %v3481_v22 = vadd.f32 %v3480_v25, %v3479_v41  ;;  %v3482_v38 = vsel %vm3293_vm4, %v3423_v14, 0.0  ;;  %3323 = vst.msk [vmem:[%s6403_s27 + $0xe8] sm:$0xff] %vm3293_vm4, %v3290_v21  ;;  %v3383_v19 = vsel %vm3293_vm4, %v3290_v21, 0.0  ;;  %v3424_v52 = vmul.f32 %v3290_v21, %v3290_v21 }
 0x3bd   : > { %v3488_v18 = vsel %vm3293_vm4, %v3426_v62, 0.0  ;;  %v3384_v28 = vadd.f32 %v3383_v19, %v3382_v58 }
 0x3be   : > { %5004 = shalt.err (!%p5001_p13)
}
 0x3bf   : > { %s5005_s15 = scalar_lea.hbm %s6580_s12, 4096  ;;  %s5009_s27 = scalar_lea.hbm %s6677_s5, 8192 }
 0x3c0   : > { %p5006_p9 = scmp.ne.s32.totalorder %s6580_s12, %s5005_s15  ;;  %p5010_p6 = scmp.lt.u32.totalorder %s6580_s12, %s6677_s5 }
 0x3c1   : > { %p5011_p10 = scmp.lt.u32.totalorder %s5009_s27, %s5005_s15  ;;  %p5013_p4 = scmp.lt.u32.totalorder %s5005_s15, %s6580_s12 }
 0x3c2   : > { %p5007_p0 = pnand %p5006_p9, %p5320_p8 }
 0x3c3   : > { %p5012_p3 = por %p5011_p10, %p5010_p6 }
 0x3c4   : > { %p5008_p11 = pneg %p5007_p0 }
 0x3c5   : > { %p5014_p5 = por %p5013_p4, %p5012_p3 }
 0x3c7   : > { %p5015_p7 = pnand %p5014_p5, %p5008_p11 }
 0x3c9   : > { %5018 = shalt.err (!%p5015_p7)
}
 0x3ca   : > { %s5112_s19 = smov 128   ;;  %s5113_s9 = smov 8   ;;  %v3483_v44 = vadd.f32 %v3482_v38, %v3481_v22  ;;  %v3484_v29 = vsel %vm3293_vm4, %v3424_v52, 0.0  ;;  %v3386_v30 = vadd.f32 %v3385_v26, %v3384_v28  ;;  %vm3497_vm9 = vcmask 517120  }
 0x3cb   : > { %4748 = dma.vmem_to_hbm [thread:$0]  (%p5320_p8), %s6582_s7, 4096, %s6580_s12, %s3500_s18, %s5112_s19, %s5112_s19, %s5113_s9  }
 0x3cc   : > { %v3485_v16 = vadd.f32 %v3484_v29, %v3483_v44  ;;  %v3388_v39 = vadd.f32 %v3387_v59, %v3386_v30  ;;  %s3691_s8 = sshll.u32 %s5372_s14, 1  ;;  %s3891_s7 = sshll.u32 %s5171_s25, 5 }
 0x3cd   : > { %s334_s12 = scalar_lea.vmem [#allocation12], %s3691_s8  ;;  %s6627_s15 = scalar_lea.hbm %s6678_s6, %s3891_s7 }
 0x3ce   : > { %v3487_v49 = vadd.f32 %v3486_v61, %v3485_v16  ;;  %v3389_v13 = vrot.slane %v3388_v39, 4  ;;  %s3534_s18 = sshll.u32 %s334_s12, 4  ;;  %s3505_s17 = scalar_lea.sflag [#allocation13], %s5372_s14  ;;  %s6629_s18 = int_to_ptr.vmem [resolvable:$true] %s3534_s18 }
 0x3cf   : > { %s5019_s25 = scalar_lea.vmem %s6629_s18, 32  ;;  %s5114_s10 = smov [#allocation12]  }
 0x3d0   : > { %v3489_v36 = vadd.f32 %v3488_v18, %v3487_v49  ;;  %v3390_v54 = vadd.f32 %v3389_v13, %v3388_v39  ;;  %p5020_p12 = scmp.ne.s32.totalorder %s6629_s18, %s5019_s25  ;;  %s5023_s27 = sshll.u32 %s5114_s10, 4  ;;  %s5024_s27 = int_to_ptr.vmem [resolvable:$false] %s5023_s27 }
 0x3d1   : > { %s5025_s29 = scalar_lea.vmem %s5024_s27, 64  ;;  %p5026_p13 = scmp.lt.s32.totalorder %s6629_s18, %s5024_s27 }
 0x3d2   : > { %v3490_v20 = vrot.slane %v3489_v36, 4  ;;  %v3391_v42 = vrot.slane %v3390_v54, 2  ;;  %p5021_p1 = pnand %p5020_p12, %p5320_p8  ;;  %p5027_p9 = scmp.lt.s32.totalorder %s5025_s29, %s5019_s25 }
 0x3d4   : > { %v3491_v34 = vadd.f32 %v3490_v20, %v3489_v36  ;;  %v3392_v2 = vadd.f32 %v3391_v42, %v3390_v54  ;;  %p5022_p2 = pneg %p5021_p1  ;;  %p5028_p0 = por %p5027_p9, %p5026_p13 }
 0x3d6   : > { %v3492_v46 = vrot.slane %v3491_v34, 2  ;;  %v3393_v63 = vrot.slane %v3392_v2, 1  ;;  %p5029_p11 = pnand %p5028_p0, %p5022_p2 }
 0x3d8   : > { %v3493_v31 = vadd.f32 %v3492_v46, %v3491_v34  ;;  %v3394_v50 = vadd.f32 %v3393_v63, %v3392_v2 }
 0x3da   : > { %v3494_v60 = vrot.slane %v3493_v31, 1 }
 0x3dc   : > { %v3495_v45 = vadd.f32 %v3494_v60, %v3493_v31 }
 0x3de   : > { %v3496_v53 = vsel %vm474_vm0, %v3394_v50, %v3495_v45 }
 0x3df   : > { %3498 = vst.msk [vmem:[%s334_s12] sm:$0x3] %vm3497_vm9, %v3496_v53 }
 0x3e0   : > { %5032 = shalt.err (!%p5029_p11)
}
 0x3e1   : > { %s5033_s14 = scalar_lea.hbm %s6627_s15, 32  ;;  %s5037_s9 = scalar_lea.hbm %s6678_s6, 64 }
 0x3e2   : > { %p5034_p6 = scmp.ne.s32.totalorder %s6627_s15, %s5033_s14  ;;  %p5038_p4 = scmp.lt.u32.totalorder %s6627_s15, %s6678_s6 }
 0x3e3   : > { %p5039_p5 = scmp.lt.u32.totalorder %s5037_s9, %s5033_s14  ;;  %p5041_p12 = scmp.lt.u32.totalorder %s5033_s14, %s6627_s15 }
 0x3e4   : > { %p5035_p10 = pnand %p5034_p6, %p5320_p8 }
 0x3e5   : > { %p5040_p7 = por %p5039_p5, %p5038_p4 }
 0x3e6   : > { %p5036_p3 = pneg %p5035_p10 }
 0x3e7   : > { %p5042_p1 = por %p5041_p12, %p5040_p7 }
 0x3e9   : > { %p5043_p2 = pnand %p5042_p1, %p5036_p3 }
 0x3eb   : > { %5046 = shalt.err (!%p5043_p2)
}
 0x3ec   : > { %4749 = dma.vmem_to_hbm [thread:$0]  (%p5320_p8), %s6629_s18, 32, %s6627_s15, %s3505_s17  }
 0x3ed PF: > { %s3546_s12 = sand.u32 1, %s5085_s21   ;;  %p6806_p13 = scmp.ne.s32.totalorder %s6708_s28, 0 }
 0x3ee   : > { %p6807_p9 = scmp.ge.s32.totalorder %s5097_s24, 2  ;;  %s3547_s30 = scalar_lea.sflag [#allocation4], %s3546_s12 }
 0x3f0   : > { %p4770_p0 = pnand %p6807_p9, %p6806_p13 }
 0x3f2   : > { %5076 = dma.done.wait (!%p4770_p0), %s3547_s30, 4096  }
 0x3f3   : > { %5078 = vsyncadd (!%p4770_p0), %s3547_s30, 4294963200  ;;  %s3556_s20 = scalar_lea.sflag [#allocation13], %s3546_s12 }
 0x3f4   : > { %5080 = dma.done.wait (!%p4770_p0), %s3556_s20, 32  }
 0x3f5   : > { %5082 = vsyncadd (!%p4770_p0), %s3556_s20, 4294967264  ;;  %p25_p8 = scmp.ge.s32.totalorder %s5307_s16, 4   ;;  %s6808_s21 = smov %s5089_s22 }
 0x3f6   : > { %s6809_s22 = smov %s5093_s23  ;;  %s6810_s23 = smov %s5316_s26 }
 0x3f7   : > { %s6811_s24 = smov %s5307_s16  ;;  %27 = sbr.rel (!%p25_p8) target bundleno = 9 (0x9), region = 126 }
 0x3fe   :  { %3561 = vsyncpa [#allocation3], 1 }
 0x3ff   :  { %3563 = vsyncpa [#allocation3 + $0x1], 1 }
 0x400   :  { %3564 = vsyncpa [#allocation6], 1 }
 0x401   :  { %3565 = vsyncpa [#allocation9], 1 }
 0x402   :  { %3566 = vsyncpa [#allocation4], 1 }
 0x403   :  { %3568 = vsyncpa [#allocation4 + $0x1], 1 }
 0x404   :  { %3569 = vsyncpa [#allocation13], 1 }
 0x405   :  { %3571 = vsyncpa [#allocation13 + $0x1], 1 }

</bundles_post_ra>
